<compile_context>
chip_gen: v6e
topology: v6e:2x2x1
jax: 0.10.0
libtpu: 0.0.40
codegen_flags: <defaults>
</compile_context>

<pallas_src>
import jax
import jax.numpy as jnp
from jax.experimental import pallas as pl
from jax.experimental.pallas import tpu as pltpu

L_IN, C_IN = 31, 21          # input sequence length / alphabet size
FEAT_IN = L_IN * C_IN        # 651 real flattened input features
FEAT_PAD = 768               # 651 padded to a multiple of 256 (MXU / lane aligned)
L1_PAD = 1024                # layer-1 width 32*31=992 padded to 1024
N_CLASSES = 2                # real logits; head zero-padded to HEAD_PAD lanes
HEAD_PAD = 128               # minimum lane-dense width for the only HBM store
TB_MAX = 512                 # max batch-tile rows (bf16 keeps VMEM tiny)


def _round_up(n, m):
    return (n + m - 1) // m * m


def _cdiv(a, b):
    return -(-a // b)


# ------------------------------ Pallas kernel --------------------------------
def _kcrnet_kernel(x_ref, m1_ref, b1_ref, m2_ref, b2_ref, m3_ref, b3_ref,
                   w4_ref, b4_ref, w5_ref, b5_ref, o_ref):
    """Fused forward for one batch tile: 5 bf16 MXU matmuls with f32
    accumulation; every operand stays resident in VMEM between layers."""
    def mm(h, w_ref):
        return jnp.dot(h.astype(jnp.bfloat16), w_ref[...],
                       preferred_element_type=jnp.float32)

    h = x_ref[...]                                                   # (TB, 768) bf16
    h = jnp.maximum(mm(h, m1_ref) + b1_ref[...], 0.0)                # conv1 + ReLU
    h = jnp.maximum(mm(h, m2_ref) + b2_ref[...], 0.0)                # conv2 + ReLU
    h = jnp.maximum(mm(h, m3_ref) + b3_ref[...], 0.0)                # conv3 + ReLU
    h = jnp.maximum(mm(h, w4_ref) + b4_ref[...], 0.0)                # linear1 + ReLU
    o_ref[...] = (mm(h, w5_ref) + b5_ref[...]).astype(o_ref.dtype)   # linear2 (padded head)


# ---------------------- one-time parameter preparation -----------------------
def _conv_as_matrix(w, length_in, stride, padding, in_order):
    """Fold a Conv1d (weight w: (OC, IC, K)) into a dense matrix on flattened
    activations.  Input flatten order: 'lc' -> idx = l*IC + c (row-major (L,C)
    reshape of the network input); 'cl' -> idx = c*L + l (channel-major, i.e.
    torch Flatten on an NCL tensor).  Output order is always channel-major."""
    oc, ic, _ = w.shape
    n_in = length_in * ic
    basis = jnp.eye(n_in, dtype=jnp.float32)
    if in_order == "lc":
        basis = basis.reshape(n_in, length_in, ic).transpose(0, 2, 1)   # -> NCL
    else:
        basis = basis.reshape(n_in, ic, length_in)                      # -> NCL
    y = jax.lax.conv_general_dilated(
        basis, w, window_strides=(stride,), padding=[(padding, padding)],
        dimension_numbers=("NCH", "OIH", "NCH"))                        # (n_in, OC, L_out)
    length_out = y.shape[-1]
    return y.reshape(n_in, oc * length_out), length_out


def prepare_params(p):
    """Hoist all weight folding / padding / casts out of the hot path (run once).
    Weights -> bf16 (MXU native), biases stay f32 (added to the f32 accumulator)."""
    m1, l1 = _conv_as_matrix(p["conv1_w"], L_IN, 1, 2, "lc")     # (651, 992)
    m2, l2 = _conv_as_matrix(p["conv2_w"], l1, 2, 2, "cl")       # (992, 512)
    m3, l3 = _conv_as_matrix(p["conv3_w"], l2, 2, 2, "cl")       # (512, 256)
    n1 = p["conv1_w"].shape[0] * l1                              # 992 real layer-1 width

    # Zero-pad K/N of layer 1 (651->768, 992->1024) and the matching K rows of
    # layer 2 so the two dominant matmuls run on fully aligned MXU tiles.
    m1p = jnp.zeros((FEAT_PAD, L1_PAD), jnp.float32).at[:m1.shape[0], :n1].set(m1)
    m2p = jnp.zeros((L1_PAD, m2.shape[1]), jnp.float32).at[:n1, :].set(m2)

    # channel-major flattened biases: bias[c*L + l] = b[c]
    b1 = jnp.zeros((1, L1_PAD), jnp.float32).at[0, :n1].set(jnp.repeat(p["conv1_b"], l1))
    b2 = jnp.repeat(p["conv2_b"], l2)[None, :]
    b3 = jnp.repeat(p["conv3_b"], l3)[None, :]

    w4 = p["lin1_w"].T                                           # (256, 128)
    b4 = p["lin1_b"][None, :]

    # Head padded to 128 lane-dense output columns.
    in5 = p["lin2_w"].shape[1]
    w5 = jnp.zeros((in5, HEAD_PAD), jnp.float32).at[:, :N_CLASSES].set(p["lin2_w"].T)
    b5 = jnp.zeros((1, HEAD_PAD), jnp.float32).at[0, :N_CLASSES].set(p["lin2_b"])

    bf = lambda a: a.astype(jnp.bfloat16)
    return {"m1": bf(m1p), "b1": b1, "m2": bf(m2p), "b2": b2, "m3": bf(m3), "b3": b3,
            "w4": bf(w4), "b4": b4, "w5": bf(w5), "b5": b5}


# ------------------------------- forward -------------------------------------
def kcrnet_forward(x, fp):
    """x: (B, 31, 21) float32 -> logits (B, 2). Single fused pallas_call."""
    B = x.shape[0]
    x2 = x.reshape(B, FEAT_IN)                       # row-major (L, C) flatten

    # Even number of batch tiles (>= 2) so "parallel" shards across both TCs on
    # v7x; tile rows sized to minimize pad waste, capped at TB_MAX, sublane-mult.
    n_tiles = _cdiv(B, TB_MAX)
    if n_tiles % 2:
        n_tiles += 1
    tb = _round_up(_cdiv(B, n_tiles), 8)
    bp = tb * n_tiles

    # Pad batch -> bp rows and features 651 -> 768 lanes; cast once to bf16
    # (halves the x DMA, MXU consumes bf16 natively).
    x2 = jnp.pad(x2, ((0, bp - B), (0, FEAT_PAD - FEAT_IN))).astype(jnp.bfloat16)

    def batch_map(i):
        return (i, 0)

    def const_map(i):                                # weights: resident in VMEM
        return (0, 0)

    weight_args = (fp["m1"], fp["b1"], fp["m2"], fp["b2"], fp["m3"], fp["b3"],
                   fp["w4"], fp["b4"], fp["w5"], fp["b5"])
    in_specs = [pl.BlockSpec((tb, FEAT_PAD), batch_map)]
    in_specs += [pl.BlockSpec(a.shape, const_map) for a in weight_args]

    out = pl.pallas_call(
        _kcrnet_kernel,
        out_shape=jax.ShapeDtypeStruct((bp, HEAD_PAD), jnp.float32),
        grid=(n_tiles,),
        in_specs=in_specs,
        out_specs=pl.BlockSpec((tb, HEAD_PAD), batch_map),
        compiler_params=pltpu.CompilerParams(
            dimension_semantics=("parallel",),
            vmem_limit_bytes=24 * 1024 * 1024),
    )(x2, *weight_args)
    return out[:B, :N_CLASSES]


# --------------------------- init & pure-JAX reference -----------------------
def init_params(key):
    ks = jax.random.split(key, 10)

    def conv_w(k, oc, ic, ksz):
        return jax.random.normal(k, (oc, ic, ksz), jnp.float32) / jnp.sqrt(ic * ksz)

    def lin_w(k, of, inf):
        return jax.random.normal(k, (of, inf), jnp.float32) / jnp.sqrt(inf)

    return {
        "conv1_w": conv_w(ks[0], 32, 21, 5),
        "conv1_b": 0.01 * jax.random.normal(ks[1], (32,), jnp.float32),
        "conv2_w": conv_w(ks[2], 32, 32, 5),
        "conv2_b": 0.01 * jax.random.normal(ks[3], (32,), jnp.float32),
        "conv3_w": conv_w(ks[4], 32, 32, 5),
        "conv3_b": 0.01 * jax.random.normal(ks[5], (32,), jnp.float32),
        "lin1_w": lin_w(ks[6], 128, 32 * 8),
        "lin1_b": 0.01 * jax.random.normal(ks[7], (128,), jnp.float32),
        "lin2_w": lin_w(ks[8], 2, 128),
        "lin2_b": 0.01 * jax.random.normal(ks[9], (2,), jnp.float32),
    }


def ref_forward(x, p):
    h = jnp.transpose(x, (0, 2, 1))                  # (B, C, L), like torch permute

    def conv(h, w, b, stride):
        y = jax.lax.conv_general_dilated(
            h, w, window_strides=(stride,), padding=[(2, 2)],
            dimension_numbers=("NCH", "OIH", "NCH"))
        return jax.nn.relu(y + b[None, :, None])

    h = conv(h, p["conv1_w"], p["conv1_b"], 1)
    h = conv(h, p["conv2_w"], p["conv2_b"], 2)
    h = conv(h, p["conv3_w"], p["conv3_b"], 2)
    h = h.reshape(h.shape[0], -1)                    # (B, 256), channel-major
    h = jax.nn.relu(h @ p["lin1_w"].T + p["lin1_b"])
    return h @ p["lin2_w"].T + p["lin2_b"]


if __name__ == "__main__":
    key = jax.random.PRNGKey(0)
    kx, kp = jax.random.split(key)

    B = 2                                            # seq length 31 fixed by linear1 = 32*8
    x = jax.random.normal(kx, (B, L_IN, C_IN), dtype=jnp.float32)
    params = init_params(kp)
    fused_params = prepare_params(params)            # one-time weight folding + bf16 cast

    out = jax.jit(kcrnet_forward)(x, fused_params)
    out = jax.block_until_ready(out)
    assert out.shape == (B, N_CLASSES) and out.dtype == jnp.float32

    ref = jax.block_until_ready(ref_forward(x, params))
    # Tolerance covers the bf16-weight / bf16-activation MXU path (f32 accum)
    # vs the pure-f32 XLA conv/dot reference.
    if not jnp.allclose(out, ref, atol=5e-2, rtol=5e-2):
        raise AssertionError(
            f"Pallas/ref mismatch, max abs err = {float(jnp.max(jnp.abs(out - ref)))}")

    print("KERNEL_OK")
</pallas_src>

<mosaic_0001>
module attributes {stable_mosaic.version = 11 : i64} {
  func.func @_kcrnet_kernel(%arg0: i32, %arg1: memref<8x768xbf16, #tpu.memory_space<vmem>>, %arg2: memref<768x1024xbf16, #tpu.memory_space<vmem>>, %arg3: memref<1x1024xf32, #tpu.memory_space<vmem>>, %arg4: memref<1024x512xbf16, #tpu.memory_space<vmem>>, %arg5: memref<1x512xf32, #tpu.memory_space<vmem>>, %arg6: memref<512x256xbf16, #tpu.memory_space<vmem>>, %arg7: memref<1x256xf32, #tpu.memory_space<vmem>>, %arg8: memref<256x128xbf16, #tpu.memory_space<vmem>>, %arg9: memref<1x128xf32, #tpu.memory_space<vmem>>, %arg10: memref<128x128xbf16, #tpu.memory_space<vmem>>, %arg11: memref<1x128xf32, #tpu.memory_space<vmem>>, %arg12: memref<8x128xf32, #tpu.memory_space<vmem>>) attributes {dimension_semantics = [#tpu.dimension_semantics<parallel>], iteration_bounds = array<i64: 2>, scalar_prefetch = 0 : i64, scratch_operands = 0 : i64, tpu.core_type = #tpu.core_type<tc>, window_params = [{transform_indices = @transform_0, window_bounds = array<i64: 8, 768>}, {pipeline_mode = #tpu.pipeline_mode<synchronous>, transform_indices = @transform_1, window_bounds = array<i64: 768, 1024>}, {pipeline_mode = #tpu.pipeline_mode<synchronous>, transform_indices = @transform_2, window_bounds = array<i64: 1, 1024>}, {pipeline_mode = #tpu.pipeline_mode<synchronous>, transform_indices = @transform_3, window_bounds = array<i64: 1024, 512>}, {pipeline_mode = #tpu.pipeline_mode<synchronous>, transform_indices = @transform_4, window_bounds = array<i64: 1, 512>}, {pipeline_mode = #tpu.pipeline_mode<synchronous>, transform_indices = @transform_5, window_bounds = array<i64: 512, 256>}, {pipeline_mode = #tpu.pipeline_mode<synchronous>, transform_indices = @transform_6, window_bounds = array<i64: 1, 256>}, {pipeline_mode = #tpu.pipeline_mode<synchronous>, transform_indices = @transform_7, window_bounds = array<i64: 256, 128>}, {pipeline_mode = #tpu.pipeline_mode<synchronous>, transform_indices = @transform_8, window_bounds = array<i64: 1, 128>}, {pipeline_mode = #tpu.pipeline_mode<synchronous>, transform_indices = @transform_9, window_bounds = array<i64: 128, 128>}, {pipeline_mode = #tpu.pipeline_mode<synchronous>, transform_indices = @transform_10, window_bounds = array<i64: 1, 128>}, {transform_indices = @transform_11, window_bounds = array<i64: 8, 128>}]} {
    %c0 = arith.constant 0 : index
    %c0_0 = arith.constant 0 : index
    %0 = vector.load %arg1[%c0, %c0_0] : memref<8x768xbf16, #tpu.memory_space<vmem>>, vector<8x768xbf16>
    %c0_1 = arith.constant 0 : index
    %c0_2 = arith.constant 0 : index
    %1 = vector.load %arg2[%c0_1, %c0_2] : memref<768x1024xbf16, #tpu.memory_space<vmem>>, vector<768x1024xbf16>
    %cst = arith.constant dense<0.000000e+00> : vector<8x1024xf32>
    %2 = tpu.matmul %0, %1, %cst {dimension_numbers = #tpu.dot_dimension_numbers<[1], [0], [0], [1], [0, 0, 1, 1], [], []>} : vector<8x768xbf16>, vector<768x1024xbf16>, vector<8x1024xf32> -> vector<8x1024xf32>
    %c0_3 = arith.constant 0 : index
    %c0_4 = arith.constant 0 : index
    %3 = vector.load %arg3[%c0_3, %c0_4] : memref<1x1024xf32, #tpu.memory_space<vmem>>, vector<1x1024xf32>
    %4 = vector.broadcast %3 : vector<1x1024xf32> to vector<8x1024xf32>
    %5 = arith.addf %2, %4 : vector<8x1024xf32>
    %cst_5 = arith.constant 0.000000e+00 : f32
    %6 = vector.broadcast %cst_5 : f32 to vector<8x1024xf32>
    %7 = arith.maximumf %5, %6 : vector<8x1024xf32>
    %8 = arith.truncf %7 : vector<8x1024xf32> to vector<8x1024xbf16>
    %c0_6 = arith.constant 0 : index
    %c0_7 = arith.constant 0 : index
    %9 = vector.load %arg4[%c0_6, %c0_7] : memref<1024x512xbf16, #tpu.memory_space<vmem>>, vector<1024x512xbf16>
    %cst_8 = arith.constant dense<0.000000e+00> : vector<8x512xf32>
    %10 = tpu.matmul %8, %9, %cst_8 {dimension_numbers = #tpu.dot_dimension_numbers<[1], [0], [0], [1], [0, 0, 1, 1], [], []>} : vector<8x1024xbf16>, vector<1024x512xbf16>, vector<8x512xf32> -> vector<8x512xf32>
    %c0_9 = arith.constant 0 : index
    %c0_10 = arith.constant 0 : index
    %11 = vector.load %arg5[%c0_9, %c0_10] : memref<1x512xf32, #tpu.memory_space<vmem>>, vector<1x512xf32>
    %12 = vector.broadcast %11 : vector<1x512xf32> to vector<8x512xf32>
    %13 = arith.addf %10, %12 : vector<8x512xf32>
    %cst_11 = arith.constant 0.000000e+00 : f32
    %14 = vector.broadcast %cst_11 : f32 to vector<8x512xf32>
    %15 = arith.maximumf %13, %14 : vector<8x512xf32>
    %16 = arith.truncf %15 : vector<8x512xf32> to vector<8x512xbf16>
    %c0_12 = arith.constant 0 : index
    %c0_13 = arith.constant 0 : index
    %17 = vector.load %arg6[%c0_12, %c0_13] : memref<512x256xbf16, #tpu.memory_space<vmem>>, vector<512x256xbf16>
    %cst_14 = arith.constant dense<0.000000e+00> : vector<8x256xf32>
    %18 = tpu.matmul %16, %17, %cst_14 {dimension_numbers = #tpu.dot_dimension_numbers<[1], [0], [0], [1], [0, 0, 1, 1], [], []>} : vector<8x512xbf16>, vector<512x256xbf16>, vector<8x256xf32> -> vector<8x256xf32>
    %c0_15 = arith.constant 0 : index
    %c0_16 = arith.constant 0 : index
    %19 = vector.load %arg7[%c0_15, %c0_16] : memref<1x256xf32, #tpu.memory_space<vmem>>, vector<1x256xf32>
    %20 = vector.broadcast %19 : vector<1x256xf32> to vector<8x256xf32>
    %21 = arith.addf %18, %20 : vector<8x256xf32>
    %cst_17 = arith.constant 0.000000e+00 : f32
    %22 = vector.broadcast %cst_17 : f32 to vector<8x256xf32>
    %23 = arith.maximumf %21, %22 : vector<8x256xf32>
    %24 = arith.truncf %23 : vector<8x256xf32> to vector<8x256xbf16>
    %c0_18 = arith.constant 0 : index
    %c0_19 = arith.constant 0 : index
    %25 = vector.load %arg8[%c0_18, %c0_19] : memref<256x128xbf16, #tpu.memory_space<vmem>>, vector<256x128xbf16>
    %cst_20 = arith.constant dense<0.000000e+00> : vector<8x128xf32>
    %26 = tpu.matmul %24, %25, %cst_20 {dimension_numbers = #tpu.dot_dimension_numbers<[1], [0], [0], [1], [0, 0, 1, 1], [], []>} : vector<8x256xbf16>, vector<256x128xbf16>, vector<8x128xf32> -> vector<8x128xf32>
    %c0_21 = arith.constant 0 : index
    %c0_22 = arith.constant 0 : index
    %27 = vector.load %arg9[%c0_21, %c0_22] : memref<1x128xf32, #tpu.memory_space<vmem>>, vector<1x128xf32>
    %28 = vector.broadcast %27 : vector<1x128xf32> to vector<8x128xf32>
    %29 = arith.addf %26, %28 : vector<8x128xf32>
    %cst_23 = arith.constant 0.000000e+00 : f32
    %30 = vector.broadcast %cst_23 : f32 to vector<8x128xf32>
    %31 = arith.maximumf %29, %30 : vector<8x128xf32>
    %32 = arith.truncf %31 : vector<8x128xf32> to vector<8x128xbf16>
    %c0_24 = arith.constant 0 : index
    %c0_25 = arith.constant 0 : index
    %33 = vector.load %arg10[%c0_24, %c0_25] : memref<128x128xbf16, #tpu.memory_space<vmem>>, vector<128x128xbf16>
    %cst_26 = arith.constant dense<0.000000e+00> : vector<8x128xf32>
    %34 = tpu.matmul %32, %33, %cst_26 {dimension_numbers = #tpu.dot_dimension_numbers<[1], [0], [0], [1], [0, 0, 1, 1], [], []>} : vector<8x128xbf16>, vector<128x128xbf16>, vector<8x128xf32> -> vector<8x128xf32>
    %c0_27 = arith.constant 0 : index
    %c0_28 = arith.constant 0 : index
    %35 = vector.load %arg11[%c0_27, %c0_28] : memref<1x128xf32, #tpu.memory_space<vmem>>, vector<1x128xf32>
    %36 = vector.broadcast %35 : vector<1x128xf32> to vector<8x128xf32>
    %37 = arith.addf %34, %36 : vector<8x128xf32>
    %c0_29 = arith.constant 0 : index
    %c0_30 = arith.constant 0 : index
    %38 = vector.load %arg12[%c0_29, %c0_30] : memref<8x128xf32, #tpu.memory_space<vmem>>, vector<8x128xf32>
    tpu.vector_store %arg12[%c0_29, %c0_30], %37 {strides = array<i32>} : memref<8x128xf32, #tpu.memory_space<vmem>>, vector<8x128xf32>,
    return
  }
  func.func @transform_0(%arg0: i32) -> (i32, i32) {
    %c0_i32 = arith.constant 0 : i32
    %c0_i32_0 = arith.constant 0 : i32
    return %arg0, %c0_i32 : i32, i32
  }
  func.func @transform_1(%arg0: i32) -> (i32, i32) {
    %c0_i32 = arith.constant 0 : i32
    %c0_i32_0 = arith.constant 0 : i32
    %c0_i32_1 = arith.constant 0 : i32
    return %c0_i32, %c0_i32_0 : i32, i32
  }
  func.func @transform_2(%arg0: i32) -> (i32, i32) {
    %c0_i32 = arith.constant 0 : i32
    %c0_i32_0 = arith.constant 0 : i32
    %c0_i32_1 = arith.constant 0 : i32
    return %c0_i32, %c0_i32_0 : i32, i32
  }
  func.func @transform_3(%arg0: i32) -> (i32, i32) {
    %c0_i32 = arith.constant 0 : i32
    %c0_i32_0 = arith.constant 0 : i32
    %c0_i32_1 = arith.constant 0 : i32
    return %c0_i32, %c0_i32_0 : i32, i32
  }
  func.func @transform_4(%arg0: i32) -> (i32, i32) {
    %c0_i32 = arith.constant 0 : i32
    %c0_i32_0 = arith.constant 0 : i32
    %c0_i32_1 = arith.constant 0 : i32
    return %c0_i32, %c0_i32_0 : i32, i32
  }
  func.func @transform_5(%arg0: i32) -> (i32, i32) {
    %c0_i32 = arith.constant 0 : i32
    %c0_i32_0 = arith.constant 0 : i32
    %c0_i32_1 = arith.constant 0 : i32
    return %c0_i32, %c0_i32_0 : i32, i32
  }
  func.func @transform_6(%arg0: i32) -> (i32, i32) {
    %c0_i32 = arith.constant 0 : i32
    %c0_i32_0 = arith.constant 0 : i32
    %c0_i32_1 = arith.constant 0 : i32
    return %c0_i32, %c0_i32_0 : i32, i32
  }
  func.func @transform_7(%arg0: i32) -> (i32, i32) {
    %c0_i32 = arith.constant 0 : i32
    %c0_i32_0 = arith.constant 0 : i32
    %c0_i32_1 = arith.constant 0 : i32
    return %c0_i32, %c0_i32_0 : i32, i32
  }
  func.func @transform_8(%arg0: i32) -> (i32, i32) {
    %c0_i32 = arith.constant 0 : i32
    %c0_i32_0 = arith.constant 0 : i32
    %c0_i32_1 = arith.constant 0 : i32
    return %c0_i32, %c0_i32_0 : i32, i32
  }
  func.func @transform_9(%arg0: i32) -> (i32, i32) {
    %c0_i32 = arith.constant 0 : i32
    %c0_i32_0 = arith.constant 0 : i32
    %c0_i32_1 = arith.constant 0 : i32
    return %c0_i32, %c0_i32_0 : i32, i32
  }
  func.func @transform_10(%arg0: i32) -> (i32, i32) {
    %c0_i32 = arith.constant 0 : i32
    %c0_i32_0 = arith.constant 0 : i32
    %c0_i32_1 = arith.constant 0 : i32
    return %c0_i32, %c0_i32_0 : i32, i32
  }
  func.func @transform_11(%arg0: i32) -> (i32, i32) {
    %c0_i32 = arith.constant 0 : i32
    %c0_i32_0 = arith.constant 0 : i32
    return %arg0, %c0_i32 : i32, i32
  }
}

</mosaic_0001>

<bundles_post_ra>
// kernel: kcrnet_forward.1
= control target key start
LH: loop header
LB: loop body
LE: loop exit
PB: predicated region body
PF: predicated region fallthrough
CT: control target
= control target key end

     0   :  { %16 = vsyncpa [#allocation3], 0  ;;  %s8381_s0 = inlined_call_operand.vmem [shape: bf16[16,768], index: 0, kind: input, shape index: {}]   ;;  %s8382_s1 = inlined_call_operand.hbm [shape: bf16[768,1024], index: 1, kind: input, shape index: {}]   ;;  %s8383_s2 = inlined_call_operand.hbm [shape: f32[1,1024], index: 2, kind: input, shape index: {}]   ;;  %s8384_s3 = inlined_call_operand.hbm [shape: bf16[1024,512], index: 3, kind: input, shape index: {}]   ;;  %s8385_s4 = inlined_call_operand.hbm [shape: f32[1,512], index: 4, kind: input, shape index: {}]   ;;  %s8386_s5 = inlined_call_operand.hbm [shape: bf16[512,256], index: 5, kind: input, shape index: {}]   ;;  %s8387_s6 = inlined_call_operand.hbm [shape: f32[1,256], index: 6, kind: input, shape index: {}]   ;;  %s8388_s7 = inlined_call_operand.hbm [shape: bf16[256,128], index: 7, kind: input, shape index: {}]   ;;  %s8389_s8 = inlined_call_operand.hbm [shape: f32[1,128], index: 8, kind: input, shape index: {}]   ;;  %s8390_s9 = inlined_call_operand.hbm [shape: bf16[128,128], index: 9, kind: input, shape index: {}]   ;;  %s8391_s10 = inlined_call_operand.hbm [shape: f32[1,128], index: 10, kind: input, shape index: {}]   ;;  %s8392_s11 = inlined_call_operand.vmem [shape: f32[16,128], index: 11, kind: output, shape index: {}]  }
   0x1   :  { %17 = vsyncpa [#allocation5], 0 }
   0x2   :  { %18 = vsyncpa [#allocation8], 0 }
   0x3   :  { %19 = vsyncpa [#allocation11], 0 }
   0x4   :  { %20 = vsyncpa [#allocation14], 0 }
   0x5   :  { %21 = vsyncpa [#allocation17], 0  ;;  %s8035_s17 = smov 0  }
   0x6 LB: > { %s7955_s18 = smov [#allocation4]   ;;  %s8041_s20 = sadd.s32 4294967295, %s7953_s17   ;;  %s7953_s17 = sphi %s8035_s17, %s27_s17  }
   0x7   : > { %s320_s19 = sshll.u32 %s7955_s18, 4  ;;  %p6218_p0 = scmp.ge.s32.totalorder %s7953_s17, 1  ;;  %s321_s19 = int_to_ptr.vmem [resolvable:$true] %s320_s19 }
   0x8   : > { %p294_p1 = scmp.lt.s32.totalorder %s7953_s17, 3  ;;  %p8393_p2 = scmp.eq.s32.totalorder %s8041_s20, 0 }
   0x9   : > { %s7956_s22 = smov [#allocation7]   ;;  %s7957_s24 = smov [#allocation10]  }
   0xa   : > { %p8046_p3 = pnand %p6218_p0, %p294_p1  ;;  %s344_s23 = sshll.u32 %s7956_s22, 4  ;;  %s345_s23 = int_to_ptr.vmem [resolvable:$true] %s344_s23 }
   0xb   : > { %s368_s25 = sshll.u32 %s7957_s24, 4  ;;  %s7958_s27 = smov [#allocation13]   ;;  %s8058_s25 = int_to_ptr.vmem [resolvable:$true] %s368_s25 }
   0xc   : > { %s8395_s21 = scalar_select %p8046_p3, 1, 0 }
   0xd   : > { %p7073_p4 = pneg %p8046_p3  ;;  %s392_s28 = sshll.u32 %s7958_s27, 4  ;;  %s8060_s28 = int_to_ptr.vmem [resolvable:$true] %s392_s28 }
   0xe   : > { %s7674_s30 = scalar_lea.vmem %s321_s19, 128  ;;  %p7682_p10 = scmp.lt.s32.totalorder %s321_s19, %s321_s19 }
   0xf   : > { %p8054_p5 = pnand %p8393_p2, %p7073_p4  ;;  %p7675_p7 = scmp.ne.s32.totalorder %s321_s19, %s7674_s30 }
  0x10   : > { %p7683_p11 = scmp.lt.s32.totalorder %s7674_s30, %s7674_s30 }
  0x11   : > { %p8064_p6 = pneg %p8054_p5 }
  0x12   : > { %p7684_p12 = por %p7683_p11, %p7682_p10 }
  0x13   : > { %p7677_p8 = pnand %p7675_p7, %p8064_p6 }
  0x15   : > { %p7678_p9 = pneg %p7677_p8 }
  0x17   : > { %p7685_p13 = pnand %p7684_p12, %p7678_p9 }
  0x19   : > { %7688 = shalt.err (!%p7685_p13)
}
  0x1a   : > { %7079 = dma.hbm_to_vmem [thread:$0]  (!%p8054_p5), %s8383_s2, 128, %s321_s19, [#allocation5]  }
  0x1b   : > { %s7700_s14 = scalar_lea.vmem %s345_s23, 64  ;;  %p7708_p2 = scmp.lt.s32.totalorder %s345_s23, %s345_s23 }
  0x1c   : > { %p7701_p0 = scmp.ne.s32.totalorder %s345_s23, %s7700_s14  ;;  %p7709_p7 = scmp.lt.s32.totalorder %s7700_s14, %s7700_s14 }
  0x1e   : > { %p7703_p1 = pnand %p7701_p0, %p8064_p6  ;;  %p7710_p8 = por %p7709_p7, %p7708_p2 }
  0x20   : > { %p7704_p4 = pneg %p7703_p1 }
  0x22   : > { %p7711_p3 = pnand %p7710_p8, %p7704_p4 }
  0x24   : > { %7714 = shalt.err (!%p7711_p3)
}
  0x25   : > { %7085 = dma.hbm_to_vmem [thread:$0]  (!%p8054_p5), %s8385_s4, 64, %s345_s23, [#allocation8]  }
  0x26   : > { %s7726_s18 = scalar_lea.vmem %s8058_s25, 32  ;;  %p7734_p12 = scmp.lt.s32.totalorder %s8058_s25, %s8058_s25 }
  0x27   : > { %p7727_p9 = scmp.ne.s32.totalorder %s8058_s25, %s7726_s18  ;;  %p7735_p2 = scmp.lt.s32.totalorder %s7726_s18, %s7726_s18 }
  0x29   : > { %p7729_p10 = pnand %p7727_p9, %p8064_p6  ;;  %p7736_p13 = por %p7735_p2, %p7734_p12 }
  0x2b   : > { %p7730_p11 = pneg %p7729_p10 }
  0x2d   : > { %p7737_p3 = pnand %p7736_p13, %p7730_p11 }
  0x2f   : > { %7740 = shalt.err (!%p7737_p3)
}
  0x30   : > { %7091 = dma.hbm_to_vmem [thread:$0]  (!%p8054_p5), %s8387_s6, 32, %s8058_s25, [#allocation11]  }
  0x31   : > { %s7752_s23 = scalar_lea.vmem %s8060_s28, 16  ;;  %s7759_s24 = scalar_lea.vmem %s8060_s28, 32 }
  0x32   : > { %p7753_p0 = scmp.ne.s32.totalorder %s8060_s28, %s7752_s23  ;;  %p7760_p7 = scmp.lt.s32.totalorder %s8060_s28, %s8060_s28 }
  0x33   : > { %p7761_p8 = scmp.lt.s32.totalorder %s7759_s24, %s7752_s23 }
  0x34   : > { %p7755_p1 = pnand %p7753_p0, %p8064_p6 }
  0x35   : > { %p7762_p9 = por %p7761_p8, %p7760_p7 }
  0x36   : > { %p7756_p4 = pneg %p7755_p1 }
  0x38   : > { %p7763_p10 = pnand %p7762_p9, %p7756_p4 }
  0x3a   : > { %7766 = shalt.err (!%p7763_p10)
}
  0x3b   : > { %7097 = dma.hbm_to_vmem [thread:$0]  (!%p8054_p5), %s8389_s8, 16, %s8060_s28, [#allocation14]  }
  0x3c   : > { %s7959_s25 = smov [#allocation2]  }
  0x3d   : > { %s306_s12 = sshll.u32 %s7959_s25, 4  ;;  %s307_s12 = int_to_ptr.vmem [resolvable:$true] %s306_s12 }
  0x3e   : > { %s7778_s13 = scalar_lea.vmem %s307_s12, 49152  ;;  %p7786_p13 = scmp.lt.s32.totalorder %s307_s12, %s307_s12 }
  0x3f   : > { %p7779_p11 = scmp.ne.s32.totalorder %s307_s12, %s7778_s13  ;;  %p7787_p3 = scmp.lt.s32.totalorder %s7778_s13, %s7778_s13 }
  0x41   : > { %p7781_p12 = pnand %p7779_p11, %p8064_p6  ;;  %p7788_p0 = por %p7787_p3, %p7786_p13 }
  0x43   : > { %p7782_p2 = pneg %p7781_p12 }
  0x45   : > { %p7789_p1 = pnand %p7788_p0, %p7782_p2 }
  0x47   : > { %7792 = shalt.err (!%p7789_p1)
}
  0x48   : > { %s7960_s14 = smov 512   ;;  %s7961_s15 = smov 32  }
  0x49   : > { %7076 = dma.hbm_to_vmem [thread:$0]  (!%p8054_p5), %s8382_s1, 49152, %s307_s12, [#allocation3], %s7960_s14, %s7960_s14, %s7961_s15  }
  0x4a   : > { %s7962_s18 = smov [#allocation6]  }
  0x4b   : > { %s330_s19 = sshll.u32 %s7962_s18, 4  ;;  %s331_s19 = int_to_ptr.vmem [resolvable:$true] %s330_s19 }
  0x4c   : > { %s7804_s22 = scalar_lea.vmem %s331_s19, 32768  ;;  %p7812_p9 = scmp.lt.s32.totalorder %s331_s19, %s331_s19 }
  0x4d   : > { %p7805_p4 = scmp.ne.s32.totalorder %s331_s19, %s7804_s22  ;;  %p7813_p10 = scmp.lt.s32.totalorder %s7804_s22, %s7804_s22 }
  0x4f   : > { %p7807_p7 = pnand %p7805_p4, %p8064_p6  ;;  %p7814_p11 = por %p7813_p10, %p7812_p9 }
  0x51   : > { %p7808_p8 = pneg %p7807_p7 }
  0x53   : > { %p7815_p12 = pnand %p7814_p11, %p7808_p8 }
  0x55   : > { %7818 = shalt.err (!%p7815_p12)
}
  0x56   : > { %s7963_s23 = smov 256   ;;  %s7964_s24 = smov 16  }
  0x57   : > { %7082 = dma.hbm_to_vmem [thread:$0]  (!%p8054_p5), %s8384_s3, 32768, %s331_s19, [#allocation5], %s7963_s23, %s7963_s23, %s7964_s24  }
  0x58   : > { %s7965_s25 = smov [#allocation9]  }
  0x59   : > { %s354_s12 = sshll.u32 %s7965_s25, 4  ;;  %s355_s12 = int_to_ptr.vmem [resolvable:$true] %s354_s12 }
  0x5a   : > { %s7830_s13 = scalar_lea.vmem %s355_s12, 8192  ;;  %p7838_p0 = scmp.lt.s32.totalorder %s355_s12, %s355_s12 }
  0x5b   : > { %p7831_p2 = scmp.ne.s32.totalorder %s355_s12, %s7830_s13  ;;  %p7839_p1 = scmp.lt.s32.totalorder %s7830_s13, %s7830_s13 }
  0x5d   : > { %p7833_p13 = pnand %p7831_p2, %p8064_p6  ;;  %p7840_p4 = por %p7839_p1, %p7838_p0 }
  0x5f   : > { %p7834_p3 = pneg %p7833_p13 }
  0x61   : > { %p7841_p7 = pnand %p7840_p4, %p7834_p3 }
  0x63   : > { %7844 = shalt.err (!%p7841_p7)
}
  0x64   : > { %s7966_s14 = smov 128   ;;  %s7967_s15 = smov 8  }
  0x65   : > { %7088 = dma.hbm_to_vmem [thread:$0]  (!%p8054_p5), %s8386_s5, 8192, %s355_s12, [#allocation8], %s7966_s14, %s7966_s14, %s7967_s15  }
  0x66   : > { %s7968_s18 = smov [#allocation12]  }
  0x67   : > { %s378_s19 = sshll.u32 %s7968_s18, 4  ;;  %s379_s19 = int_to_ptr.vmem [resolvable:$true] %s378_s19 }
  0x68   : > { %s7856_s22 = scalar_lea.vmem %s379_s19, 2048  ;;  %p7864_p11 = scmp.lt.s32.totalorder %s379_s19, %s379_s19 }
  0x69   : > { %p7857_p8 = scmp.ne.s32.totalorder %s379_s19, %s7856_s22  ;;  %p7865_p12 = scmp.lt.s32.totalorder %s7856_s22, %s7856_s22 }
  0x6b   : > { %p7859_p9 = pnand %p7857_p8, %p8064_p6  ;;  %p7866_p2 = por %p7865_p12, %p7864_p11 }
  0x6d   : > { %p7860_p10 = pneg %p7859_p9 }
  0x6f   : > { %p7867_p13 = pnand %p7866_p2, %p7860_p10 }
  0x71   : > { %7870 = shalt.err (!%p7867_p13)
}
  0x72   : > { %s7969_s23 = smov 64   ;;  %s7970_s24 = smov 4  }
  0x73   : > { %7094 = dma.hbm_to_vmem [thread:$0]  (!%p8054_p5), %s8388_s7, 2048, %s379_s19, [#allocation11], %s7969_s23, %s7969_s23, %s7970_s24  }
  0x74   : > { %s7971_s25 = smov [#allocation15]   ;;  %s7972_s13 = smov [#allocation16]  }
  0x75   : > { %s402_s12 = sshll.u32 %s7971_s25, 4  ;;  %s416_s14 = sshll.u32 %s7972_s13, 4  ;;  %s403_s12 = int_to_ptr.vmem [resolvable:$true] %s402_s12  ;;  %s417_s14 = int_to_ptr.vmem [resolvable:$true] %s416_s14 }
  0x76   : > { %s7882_s15 = scalar_lea.vmem %s403_s12, 1024  ;;  %p7890_p4 = scmp.lt.s32.totalorder %s403_s12, %s403_s12 }
  0x77   : > { %p7883_p3 = scmp.ne.s32.totalorder %s403_s12, %s7882_s15  ;;  %p7891_p7 = scmp.lt.s32.totalorder %s7882_s15, %s7882_s15 }
  0x79   : > { %p7885_p0 = pnand %p7883_p3, %p8064_p6  ;;  %p7892_p8 = por %p7891_p7, %p7890_p4 }
  0x7b   : > { %p7886_p1 = pneg %p7885_p0 }
  0x7d   : > { %p7893_p9 = pnand %p7892_p8, %p7886_p1 }
  0x7f   : > { %7896 = shalt.err (!%p7893_p9)
}
  0x80   : > { %7100 = dma.hbm_to_vmem [thread:$0]  (!%p8054_p5), %s8390_s9, 1024, %s403_s12, [#allocation14], %s7969_s23, %s7969_s23, %s7970_s24  }
  0x81   : > { %s7908_s18 = scalar_lea.vmem %s417_s14, 16  ;;  %s7915_s19 = scalar_lea.vmem %s417_s14, 32 }
  0x82   : > { %p7909_p10 = scmp.ne.s32.totalorder %s417_s14, %s7908_s18  ;;  %p7916_p2 = scmp.lt.s32.totalorder %s417_s14, %s417_s14 }
  0x83   : > { %p7917_p13 = scmp.lt.s32.totalorder %s7915_s19, %s7908_s18 }
  0x84   : > { %p7911_p11 = pnand %p7909_p10, %p8064_p6 }
  0x85   : > { %p7918_p3 = por %p7917_p13, %p7916_p2 }
  0x86   : > { %p7912_p12 = pneg %p7911_p11 }
  0x88   : > { %p7919_p0 = pnand %p7918_p3, %p7912_p12 }
  0x8a   : > { %7922 = shalt.err (!%p7919_p0)
}
  0x8b   : > { %7103 = dma.hbm_to_vmem [thread:$0]  (!%p8054_p5), %s8391_s10, 16, %s417_s14, [#allocation17]  }
  0x8c   : > { %p8398_p1 = scmp.ne.s32.totalorder %s8395_s21, 0 }
  0x8d   : > { %p8399_p4 = scmp.eq.s32.totalorder (!%p8398_p1), %s8041_s20, 0 }
  0x8e   : > { %437 = sbr.rel (%p8398_p1) target bundleno = 1693 (0x69d), region = 64 }
  0x93   : > { %7928 = dma.done.wait (%p8399_p4), [#allocation3], 49152   ;;  %p8400_p6 = pmov %p8399_p4 }
  0x94   : > { %p8401_p7 = pmov %p8399_p4 }
  0x95   : > { %7930 = vsyncadd (%p8400_p6), [#allocation3], 4294918144 }
  0x96   : > { %7932 = dma.done.wait (%p8401_p7), [#allocation5], 32896   ;;  %p8402_p8 = pmov %p8399_p4 }
  0x97   : > { %p8403_p9 = pmov %p8399_p4 }
  0x98   : > { %7934 = vsyncadd (%p8402_p8), [#allocation5], 4294934400 }
  0x99   : > { %7936 = dma.done.wait (%p8403_p9), [#allocation8], 8256   ;;  %p8404_p5 = pmov %p8399_p4 }
  0x9a   : > { %p8405_p10 = pmov %p8399_p4 }
  0x9b   : > { %7938 = vsyncadd (%p8404_p5), [#allocation8], 4294959040 }
  0x9c   : > { %7940 = dma.done.wait (%p8405_p10), [#allocation11], 2080   ;;  %p8406_p11 = pmov %p8399_p4 }
  0x9d   : > { %p8407_p12 = pmov %p8399_p4 }
  0x9e   : > { %7942 = vsyncadd (%p8406_p11), [#allocation11], 4294965216 }
  0x9f   : > { %7944 = dma.done.wait (%p8407_p12), [#allocation14], 1040   ;;  %p8408_p2 = pmov %p8399_p4 }
  0xa1   : > { %7946 = vsyncadd (%p8408_p2), [#allocation14], 4294966256  ;;  %p8409_p13 = pmov %p8408_p2 }
  0xa2   : > { %p8410_p3 = pmov %p8408_p2 }
  0xa3   : > { %7948 = dma.done.wait (%p8409_p13), [#allocation17], 16  }
  0xa4   : > { %7950 = vsyncadd (%p8410_p3), [#allocation17], 4294967280  ;;  %v581_v0 = vld [vmem:[#allocation2 + $0x1c0] sm:$0xff]  ;;  %p512_p0 = scmp.lt.s32.totalorder %s8041_s20, 1  ;;  %vm7974_vm0 = vmmov 0  }
  0xa5   : > { %v585_v1 = vld [vmem:[#allocation2 + $0x1e0] sm:$0xff] }
  0xa6   : > { %v709_v2 = vld [vmem:[#allocation2 + $0x5c0] sm:$0xff]  ;;  %v6306_v3 = vcombine.high %v581_v0, %v585_v1  ;;  %v6305_v5 = vcombine.low %v581_v0, %v585_v1  ;;  %s8412_s20 = smov (!%p512_p0, %s8041_s20), 1 }
  0xa7   : > { %v713_v4 = vld [vmem:[#allocation2 + $0x5e0] sm:$0xff]  ;;  %s7032_s21 = smul.u32 24, %s8412_s20  ;;  %s6242_s24 = sshll.u32 %s8412_s20, 3 }
  0xa8   : > { %v573_v6 = vld [vmem:[#allocation2 + $0x180] sm:$0xff]  ;;  %v6434_v8 = vcombine.high %v709_v2, %v713_v4  ;;  %v6433_v9 = vcombine.low %v709_v2, %v713_v4  ;;  %2892 = vmatprep.subr.bf16.mxu0 %v6306_v3  ;;  %s520_s12 = scalar_lea.vmem %s8392_s11, %s6242_s24 }
  0xa9   : > { %v577_v7 = vld [vmem:[#allocation2 + $0x1a0] sm:$0xff]  ;;  %2893 = vmatpush1.bf16.msra.mxu0 %v6305_v5  ;;  %s8183_s23 = scalar_lea.vmem %s8381_s0, %s7032_s21 }
  0xaa   : > { %v6298_v10 = vcombine.high %v573_v6, %v577_v7  ;;  %v701_v11 = vld [vmem:[#allocation2 + $0x580] sm:$0xff]  ;;  %2933 = vmatprep.subr.bf16.mxu1 %v6434_v8  ;;  %v6297_v18 = vcombine.low %v573_v6, %v577_v7  ;;  %v8189_v54 = vld [vmem:[%s8183_s23 + $0x8] sm:$0xff] }
  0xab   : > { %v705_v12 = vld [vmem:[#allocation2 + $0x5a0] sm:$0xff]  ;;  %2934 = vmatpush1.bf16.msra.mxu1 %v6433_v9  ;;  %v8197_v59 = vcombine.high %v8189_v54, %v8189_v54 }
  0xac   : > { %v565_v13 = vld [vmem:[#allocation2 + $0x140] sm:$0xff]  ;;  %v6426_v14 = vcombine.high %v701_v11, %v705_v12  ;;  %2894 = vmatprep.subr.bf16.mxu0 %v6298_v10  ;;  %v6425_v19 = vcombine.low %v701_v11, %v705_v12 }
  0xad   : > { %v569_v15 = vld [vmem:[#allocation2 + $0x160] sm:$0xff]  ;;  %2895 = vmatpush1.bf16.msra.mxu0 %v6297_v18  ;;  %2965 = vmatprep.mubr.bf16.mxu1 %v8197_v59 }
  0xae   : > { %v693_v16 = vld [vmem:[#allocation2 + $0x540] sm:$0xff]  ;;  %v6290_v20 = vcombine.high %v565_v13, %v569_v15  ;;  %2935 = vmatprep.subr.bf16.mxu1 %v6426_v14  ;;  %v6289_v26 = vcombine.low %v565_v13, %v569_v15 }
  0xaf   : > { %v697_v17 = vld [vmem:[#allocation2 + $0x560] sm:$0xff]  ;;  %2936 = vmatpush1.bf16.msra.mxu1 %v6425_v19 }
  0xb0   : > { %v6418_v21 = vcombine.high %v693_v16, %v697_v17  ;;  %v557_v22 = vld [vmem:[#allocation2 + $0x100] sm:$0xff]  ;;  %2896 = vmatprep.subr.bf16.mxu0 %v6290_v20  ;;  %v6417_v27 = vcombine.low %v693_v16, %v697_v17 }
  0xb1   : > { %v561_v23 = vld [vmem:[#allocation2 + $0x120] sm:$0xff]  ;;  %2897 = vmatpush1.bf16.msra.mxu0 %v6289_v26 }
  0xb2   : > { %v685_v24 = vld [vmem:[#allocation2 + $0x500] sm:$0xff]  ;;  %v6282_v28 = vcombine.high %v557_v22, %v561_v23  ;;  %2937 = vmatprep.subr.bf16.mxu1 %v6418_v21  ;;  %v6281_v34 = vcombine.low %v557_v22, %v561_v23 }
  0xb3   : > { %v689_v25 = vld [vmem:[#allocation2 + $0x520] sm:$0xff]  ;;  %2938 = vmatpush1.bf16.msra.mxu1 %v6417_v27 }
  0xb4   : > { %v6410_v29 = vcombine.high %v685_v24, %v689_v25  ;;  %v549_v30 = vld [vmem:[#allocation2 + $0xc0] sm:$0xff]  ;;  %2898 = vmatprep.subr.bf16.mxu0 %v6282_v28  ;;  %v6409_v35 = vcombine.low %v685_v24, %v689_v25 }
  0xb5   : > { %v553_v31 = vld [vmem:[#allocation2 + $0xe0] sm:$0xff]  ;;  %2899 = vmatpush1.bf16.msra.mxu0 %v6281_v34 }
  0xb6   : > { %v677_v32 = vld [vmem:[#allocation2 + $0x4c0] sm:$0xff]  ;;  %v6274_v36 = vcombine.high %v549_v30, %v553_v31  ;;  %2939 = vmatprep.subr.bf16.mxu1 %v6410_v29  ;;  %v6273_v42 = vcombine.low %v549_v30, %v553_v31 }
  0xb7   : > { %v681_v33 = vld [vmem:[#allocation2 + $0x4e0] sm:$0xff]  ;;  %2940 = vmatpush1.bf16.msra.mxu1 %v6409_v35 }
  0xb8   : > { %v6402_v37 = vcombine.high %v677_v32, %v681_v33  ;;  %v541_v38 = vld [vmem:[#allocation2 + $0x80] sm:$0xff]  ;;  %2900 = vmatprep.subr.bf16.mxu0 %v6274_v36  ;;  %v6401_v43 = vcombine.low %v677_v32, %v681_v33 }
  0xb9   : > { %v545_v39 = vld [vmem:[#allocation2 + $0xa0] sm:$0xff]  ;;  %2901 = vmatpush1.bf16.msra.mxu0 %v6273_v42 }
  0xba   : > { %v669_v40 = vld [vmem:[#allocation2 + $0x480] sm:$0xff]  ;;  %v6266_v44 = vcombine.high %v541_v38, %v545_v39  ;;  %2941 = vmatprep.subr.bf16.mxu1 %v6402_v37  ;;  %v6265_v50 = vcombine.low %v541_v38, %v545_v39 }
  0xbb   : > { %v673_v41 = vld [vmem:[#allocation2 + $0x4a0] sm:$0xff]  ;;  %2942 = vmatpush1.bf16.msra.mxu1 %v6401_v43 }
  0xbc   : > { %v6394_v45 = vcombine.high %v669_v40, %v673_v41  ;;  %v533_v46 = vld [vmem:[#allocation2 + $0x40] sm:$0xff]  ;;  %2902 = vmatprep.subr.bf16.mxu0 %v6266_v44  ;;  %v6393_v51 = vcombine.low %v669_v40, %v673_v41 }
  0xbd   : > { %v537_v47 = vld [vmem:[#allocation2 + $0x60] sm:$0xff]  ;;  %2903 = vmatpush1.bf16.msra.mxu0 %v6265_v50 }
  0xbe   : > { %v661_v48 = vld [vmem:[#allocation2 + $0x440] sm:$0xff]  ;;  %v6258_v52 = vcombine.high %v533_v46, %v537_v47  ;;  %2943 = vmatprep.subr.bf16.mxu1 %v6394_v45  ;;  %v6257_v62 = vcombine.low %v533_v46, %v537_v47 }
  0xbf   : > { %v665_v49 = vld [vmem:[#allocation2 + $0x460] sm:$0xff]  ;;  %2944 = vmatpush1.bf16.msra.mxu1 %v6393_v51 }
  0xc0   : > { %v8186_v53 = vld [vmem:[%s8183_s23] sm:$0xff]  ;;  %v6386_v55 = vcombine.high %v661_v48, %v665_v49  ;;  %2904 = vmatprep.subr.bf16.mxu0 %v6258_v52  ;;  %v6385_v63 = vcombine.low %v661_v48, %v665_v49 }
  0xc1   : > { %v525_v56 = vld [vmem:[#allocation2] sm:$0xff]  ;;  %v8193_v58 = vcombine.high %v8186_v53, %v8186_v53  ;;  %2905 = vmatpush1.bf16.msra.mxu0 %v6257_v62 }
  0xc2   : > { %v529_v57 = vld [vmem:[#allocation2 + $0x20] sm:$0xff]  ;;  %2945 = vmatprep.subr.bf16.mxu1 %v6386_v55 }
  0xc3   : > { %v653_v60 = vld [vmem:[#allocation2 + $0x400] sm:$0xff]  ;;  %2924 = vmatprep.mubr.bf16.mxu0 %v8193_v58  ;;  %v6250_v0 = vcombine.high %v525_v56, %v529_v57  ;;  %v6249_v6 = vcombine.low %v525_v56, %v529_v57  ;;  %2946 = vmatpush1.bf16.msra.mxu1 %v6385_v63 }
  0xc4   : > { %v657_v61 = vld [vmem:[#allocation2 + $0x420] sm:$0xff] }
  0xc5   : > { %v6378_v1 = vcombine.high %v653_v60, %v657_v61  ;;  %v645_v2 = vld [vmem:[#allocation2 + $0x3c0] sm:$0xff]  ;;  %2906 = vmatprep.subr.bf16.mxu0 %v6250_v0  ;;  %v6377_v7 = vcombine.low %v653_v60, %v657_v61 }
  0xc6   : > { %v649_v3 = vld [vmem:[#allocation2 + $0x3e0] sm:$0xff]  ;;  %2907 = vmatpush1.bf16.msra.mxu0 %v6249_v6 }
  0xc7   : > { %v773_v4 = vld [vmem:[#allocation2 + $0x7c0] sm:$0xff]  ;;  %v6370_v8 = vcombine.high %v645_v2, %v649_v3  ;;  %2947 = vmatprep.subr.bf16.mxu1 %v6378_v1  ;;  %v6369_v14 = vcombine.low %v645_v2, %v649_v3 }
  0xc8   : > { %v777_v5 = vld [vmem:[#allocation2 + $0x7e0] sm:$0xff]  ;;  %2948 = vmatpush1.bf16.msra.mxu1 %v6377_v7 }
  0xc9   : > { %v6498_v9 = vcombine.high %v773_v4, %v777_v5  ;;  %v637_v10 = vld [vmem:[#allocation2 + $0x380] sm:$0xff]  ;;  %2908 = vmatprep.subr.bf16.mxu0 %v6370_v8  ;;  %v6497_v15 = vcombine.low %v773_v4, %v777_v5  ;;  %v582_v8 = vld [vmem:[#allocation2 + $0x1c8] sm:$0xff] }
  0xca   : > { %v641_v11 = vld [vmem:[#allocation2 + $0x3a0] sm:$0xff]  ;;  %2909 = vmatpush2.bf16.msra.mxu0 %v6369_v14 }
  0xcb   : > { %v765_v12 = vld [vmem:[#allocation2 + $0x780] sm:$0xff]  ;;  %v6362_v16 = vcombine.high %v637_v10, %v641_v11  ;;  %2949 = vmatprep.subr.bf16.mxu1 %v6498_v9  ;;  %v6361_v22 = vcombine.low %v637_v10, %v641_v11  ;;  %v586_v9 = vld [vmem:[#allocation2 + $0x1e8] sm:$0xff] }
  0xcc   : > { %v769_v13 = vld [vmem:[#allocation2 + $0x7a0] sm:$0xff]  ;;  %2950 = vmatpush2.bf16.msra.mxu1 %v6497_v15 }
  0xcd   : > { %v6490_v17 = vcombine.high %v765_v12, %v769_v13  ;;  %v629_v18 = vld [vmem:[#allocation2 + $0x340] sm:$0xff]  ;;  %2910 = vmatprep.subr.bf16.mxu0 %v6362_v16  ;;  %v6489_v23 = vcombine.low %v765_v12, %v769_v13  ;;  %v6308_v13 = vcombine.high %v582_v8, %v586_v9  ;;  %v8203_v16 = vcombine.low %v8186_v53, %v8186_v53 }
  0xce   : > { %v633_v19 = vld [vmem:[#allocation2 + $0x360] sm:$0xff]  ;;  %2911 = vmatpush2.bf16.msra.mxu0 %v6361_v22  ;;  %v6307_v22 = vcombine.low %v582_v8, %v586_v9 }
  0xcf   : > { %v757_v20 = vld [vmem:[#allocation2 + $0x740] sm:$0xff]  ;;  %v6354_v24 = vcombine.high %v629_v18, %v633_v19  ;;  %2951 = vmatprep.subr.bf16.mxu1 %v6490_v17  ;;  %v6353_v30 = vcombine.low %v629_v18, %v633_v19  ;;  %v574_v17 = vld [vmem:[#allocation2 + $0x188] sm:$0xff]  ;;  %v8206_v19 = vld [vmem:[%s8183_s23 + $0x10] sm:$0xff] }
  0xd0   : > { %v761_v21 = vld [vmem:[#allocation2 + $0x760] sm:$0xff]  ;;  %2952 = vmatpush2.bf16.msra.mxu1 %v6489_v23  ;;  %v578_v18 = vld [vmem:[#allocation2 + $0x1a8] sm:$0xff] }
  0xd1   : > { %v6482_v25 = vcombine.high %v757_v20, %v761_v21  ;;  %v621_v26 = vld [vmem:[#allocation2 + $0x300] sm:$0xff]  ;;  %2912 = vmatprep.subr.bf16.mxu0 %v6354_v24  ;;  %v6481_v31 = vcombine.low %v757_v20, %v761_v21  ;;  %v8210_v20 = vcombine.low %v8189_v54, %v8189_v54  ;;  %v6300_v53 = vcombine.high %v574_v17, %v578_v18 }
  0xd2   : > { %v625_v27 = vld [vmem:[#allocation2 + $0x320] sm:$0xff]  ;;  %2913 = vmatpush2.bf16.msra.mxu0 %v6353_v30 }
  0xd3   : > { %v749_v28 = vld [vmem:[#allocation2 + $0x700] sm:$0xff]  ;;  %v6346_v32 = vcombine.high %v621_v26, %v625_v27  ;;  %2953 = vmatprep.subr.bf16.mxu1 %v6482_v25  ;;  %v6345_v38 = vcombine.low %v621_v26, %v625_v27  ;;  %v566_v26 = vld [vmem:[#allocation2 + $0x148] sm:$0xff] }
  0xd4   : > { %v753_v29 = vld [vmem:[#allocation2 + $0x720] sm:$0xff]  ;;  %2954 = vmatpush2.bf16.msra.mxu1 %v6481_v31  ;;  %v570_v27 = vld [vmem:[#allocation2 + $0x168] sm:$0xff] }
  0xd5   : > { %v6474_v33 = vcombine.high %v749_v28, %v753_v29  ;;  %v613_v34 = vld [vmem:[#allocation2 + $0x2c0] sm:$0xff]  ;;  %2914 = vmatprep.subr.bf16.mxu0 %v6346_v32  ;;  %v6473_v39 = vcombine.low %v749_v28, %v753_v29  ;;  %v8214_v28 = vcombine.high %v8206_v19, %v8206_v19  ;;  %v6299_v29 = vcombine.low %v574_v17, %v578_v18 }
  0xd6   : > { %v617_v35 = vld [vmem:[#allocation2 + $0x2e0] sm:$0xff]  ;;  %2915 = vmatpush2.bf16.msra.mxu0 %v6345_v38 }
  0xd7   : > { %v741_v36 = vld [vmem:[#allocation2 + $0x6c0] sm:$0xff]  ;;  %v6338_v40 = vcombine.high %v613_v34, %v617_v35  ;;  %2955 = vmatprep.subr.bf16.mxu1 %v6474_v33  ;;  %v6337_v46 = vcombine.low %v613_v34, %v617_v35  ;;  %v558_v33 = vld [vmem:[#allocation2 + $0x108] sm:$0xff]  ;;  %v6292_v34 = vcombine.high %v566_v26, %v570_v27 }
  0xd8   : > { %v745_v37 = vld [vmem:[#allocation2 + $0x6e0] sm:$0xff]  ;;  %2956 = vmatpush2.bf16.msra.mxu1 %v6473_v39  ;;  %v562_v35 = vld [vmem:[#allocation2 + $0x128] sm:$0xff] }
  0xd9   : > { %v6466_v41 = vcombine.high %v741_v36, %v745_v37  ;;  %v605_v42 = vld [vmem:[#allocation2 + $0x280] sm:$0xff]  ;;  %2916 = vmatprep.subr.bf16.mxu0 %v6338_v40  ;;  %v6465_v47 = vcombine.low %v741_v36, %v745_v37  ;;  %v6291_v37 = vcombine.low %v566_v26, %v570_v27  ;;  %v642_v26 = vld [vmem:[#allocation2 + $0x3a8] sm:$0xff] }
  0xda   : > { %v609_v43 = vld [vmem:[#allocation2 + $0x2a0] sm:$0xff]  ;;  %2917 = vmatpush2.bf16.msra.mxu0 %v6337_v46 }
  0xdb   : > { %v733_v44 = vld [vmem:[#allocation2 + $0x680] sm:$0xff]  ;;  %v6330_v48 = vcombine.high %v605_v42, %v609_v43  ;;  %2957 = vmatprep.subr.bf16.mxu1 %v6466_v41  ;;  %v6329_v56 = vcombine.low %v605_v42, %v609_v43  ;;  %v550_v41 = vld [vmem:[#allocation2 + $0xc8] sm:$0xff]  ;;  %v6284_v42 = vcombine.high %v558_v33, %v562_v35 }
  0xdc   : > { %v737_v45 = vld [vmem:[#allocation2 + $0x6a0] sm:$0xff]  ;;  %2958 = vmatpush2.bf16.msra.mxu1 %v6465_v47  ;;  %v554_v43 = vld [vmem:[#allocation2 + $0xe8] sm:$0xff] }
  0xdd   : > { %v6458_v49 = vcombine.high %v733_v44, %v737_v45  ;;  %v597_v50 = vld [vmem:[#allocation2 + $0x240] sm:$0xff]  ;;  %2918 = vmatprep.subr.bf16.mxu0 %v6330_v48  ;;  %v6457_v57 = vcombine.low %v733_v44, %v737_v45  ;;  %v6283_v45 = vcombine.low %v558_v33, %v562_v35  ;;  %v634_v33 = vld [vmem:[#allocation2 + $0x368] sm:$0xff] }
  0xde   : > { %v601_v51 = vld [vmem:[#allocation2 + $0x260] sm:$0xff]  ;;  %2919 = vmatpush2.bf16.msra.mxu0 %v6329_v56 }
  0xdf   : > { %v725_v52 = vld [vmem:[#allocation2 + $0x640] sm:$0xff]  ;;  %v6322_v60 = vcombine.high %v597_v50, %v601_v51  ;;  %2959 = vmatprep.subr.bf16.mxu1 %v6458_v49  ;;  %v6321_v2 = vcombine.low %v597_v50, %v601_v51  ;;  %v542_v49 = vld [vmem:[#allocation2 + $0x88] sm:$0xff]  ;;  %v6276_v50 = vcombine.high %v550_v41, %v554_v43 }
  0xe0   : > { %v729_v55 = vld [vmem:[#allocation2 + $0x660] sm:$0xff]  ;;  %2960 = vmatpush2.bf16.msra.mxu1 %v6457_v57  ;;  %v546_v51 = vld [vmem:[#allocation2 + $0xa8] sm:$0xff] }
  0xe1   : > { %v6450_v61 = vcombine.high %v725_v52, %v729_v55  ;;  %v589_v62 = vld [vmem:[#allocation2 + $0x200] sm:$0xff]  ;;  %2920 = vmatprep.subr.bf16.mxu0 %v6322_v60  ;;  %v6449_v3 = vcombine.low %v725_v52, %v729_v55  ;;  %v6275_v55 = vcombine.low %v550_v41, %v554_v43  ;;  %v626_v41 = vld [vmem:[#allocation2 + $0x328] sm:$0xff] }
  0xe2   : > { %v593_v63 = vld [vmem:[#allocation2 + $0x220] sm:$0xff]  ;;  %2921 = vmatpush2.bf16.msra.mxu0 %v6321_v2 }
  0xe3   : > { %v717_v0 = vld [vmem:[#allocation2 + $0x600] sm:$0xff]  ;;  %v6314_v4 = vcombine.high %v589_v62, %v593_v63  ;;  %2961 = vmatprep.subr.bf16.mxu1 %v6450_v61  ;;  %v6313_v10 = vcombine.low %v589_v62, %v593_v63  ;;  %v534_v61 = vld [vmem:[#allocation2 + $0x48] sm:$0xff]  ;;  %v6268_v62 = vcombine.high %v542_v49, %v546_v51 }
  0xe4   : > { %v721_v1 = vld [vmem:[#allocation2 + $0x620] sm:$0xff]  ;;  %2962 = vmatpush2.bf16.msra.mxu1 %v6449_v3  ;;  %v538_v63 = vld [vmem:[#allocation2 + $0x68] sm:$0xff] }
  0xe5   : > { %v6442_v5 = vcombine.high %v717_v0, %v721_v1  ;;  %v837_v6 = vld [vmem:[#allocation2 + $0x9c0] sm:$0xff]  ;;  %2922 = vmatprep.subr.bf16.mxu0 %v6314_v4  ;;  %v6441_v11 = vcombine.low %v717_v0, %v721_v1  ;;  %v6267_v1 = vcombine.low %v542_v49, %v546_v51  ;;  %v6259_v9 = vcombine.low %v534_v61, %v538_v63  ;;  %v618_v49 = vld [vmem:[#allocation2 + $0x2e8] sm:$0xff] }
  0xe6   : > { %v841_v7 = vld [vmem:[#allocation2 + $0x9e0] sm:$0xff]  ;;  %2923 = vmatpush2.bf16.msra.mxu0 %v6313_v10 }
  0xe7   : > { %v6562_v12 = vcombine.high %v837_v6, %v841_v7  ;;  %2963 = vmatprep.subr.bf16.mxu1 %v6442_v5  ;;  %v829_v14 = vld [vmem:[#allocation2 + $0x980] sm:$0xff]  ;;  %v6561_v21 = vcombine.low %v837_v6, %v841_v7  ;;  %v526_v5 = vld [vmem:[#allocation2 + $0x8] sm:$0xff]  ;;  %v6260_v6 = vcombine.high %v534_v61, %v538_v63 }
  0xe8   : > { %v833_v15 = vld [vmem:[#allocation2 + $0x9a0] sm:$0xff]  ;;  %2964 = vmatpush2.bf16.msra.mxu1 %v6441_v11  ;;  %v530_v7 = vld [vmem:[#allocation2 + $0x28] sm:$0xff] }
  0xe9   : > { %2974 = vmatprep.subr.bf16.mxu0 %v6562_v12  ;;  %v6554_v23 = vcombine.high %v829_v14, %v833_v15  ;;  %v821_v24 = vld [vmem:[#allocation2 + $0x940] sm:$0xff]  ;;  %3015 = vmatprep.subr.bf16.mxu1 %v6308_v13  ;;  %v6553_v54 = vcombine.low %v829_v14, %v833_v15  ;;  %v646_v13 = vld [vmem:[#allocation2 + $0x3c8] sm:$0xff]  ;;  %v6252_v14 = vcombine.high %v526_v5, %v530_v7 }
  0xea   : > { %v825_v25 = vld [vmem:[#allocation2 + $0x960] sm:$0xff]  ;;  %2925 = vmatmul.mubr.bf16.vlgmr.msra.gmra.mxu0 %v8203_v16  ;;  %v650_v15 = vld [vmem:[#allocation2 + $0x3e8] sm:$0xff]  ;;  %v6251_v18 = vcombine.low %v526_v5, %v530_v7 }
  0xeb   : > { %2966 = vmatmul.mubr.bf16.vlgmr.msra.gmra.mxu1 %v8210_v20  ;;  %2975 = vmatpush1.bf16.msra.mxu0 %v6561_v21  ;;  %v6546_v30 = vcombine.high %v821_v24, %v825_v25  ;;  %v813_v31 = vld [vmem:[#allocation2 + $0x900] sm:$0xff]  ;;  %v6545_v36 = vcombine.low %v821_v24, %v825_v25  ;;  %v638_v24 = vld [vmem:[#allocation2 + $0x388] sm:$0xff]  ;;  %v6372_v25 = vcombine.high %v646_v13, %v650_v15 }
  0xec   : > { %3016 = vmatpush1.bf16.msra.mxu1 %v6307_v22  ;;  %2976 = vmatprep.subr.bf16.mxu0 %v6554_v23  ;;  %v817_v32 = vld [vmem:[#allocation2 + $0x920] sm:$0xff]  ;;  %v6371_v27 = vcombine.low %v646_v13, %v650_v15  ;;  %v6363_v35 = vcombine.low %v638_v24, %v642_v26  ;;  %v610_v61 = vld [vmem:[#allocation2 + $0x2a8] sm:$0xff] }
  0xed   : > { %3017 = vmatprep.subr.bf16.mxu1 %v6300_v53  ;;  %3006 = vmatprep.mubr.bf16.mxu0 %v8214_v28  ;;  %v6538_v38 = vcombine.high %v813_v31, %v817_v32  ;;  %v805_v39 = vld [vmem:[#allocation2 + $0x8c0] sm:$0xff]  ;;  %v6537_v44 = vcombine.low %v813_v31, %v817_v32  ;;  %v630_v31 = vld [vmem:[#allocation2 + $0x348] sm:$0xff]  ;;  %v6364_v32 = vcombine.high %v638_v24, %v642_v26 }
  0xee   : > { %3047 = vmatprep.mubr.bf16.mxu1 %v8193_v58  ;;  %v809_v40 = vld [vmem:[#allocation2 + $0x8e0] sm:$0xff]  ;;  %v6355_v43 = vcombine.low %v630_v31, %v634_v33  ;;  %v602_v5 = vld [vmem:[#allocation2 + $0x268] sm:$0xff] }
  0xef   : > { %2977 = vmatpush1.bf16.msra.mxu0 %v6553_v54  ;;  %v6530_v46 = vcombine.high %v805_v39, %v809_v40  ;;  %v797_v47 = vld [vmem:[#allocation2 + $0x880] sm:$0xff]  ;;  %v6529_v52 = vcombine.low %v805_v39, %v809_v40  ;;  %v622_v39 = vld [vmem:[#allocation2 + $0x308] sm:$0xff]  ;;  %v6356_v40 = vcombine.high %v630_v31, %v634_v33 }
  0xf0   : > { %3018 = vmatpush1.bf16.msra.mxu1 %v6299_v29  ;;  %2978 = vmatprep.subr.bf16.mxu0 %v6546_v30  ;;  %v801_v48 = vld [vmem:[#allocation2 + $0x8a0] sm:$0xff]  ;;  %v6347_v51 = vcombine.low %v622_v39, %v626_v41  ;;  %v594_v13 = vld [vmem:[#allocation2 + $0x228] sm:$0xff] }
  0xf1   : > { %3019 = vmatprep.subr.bf16.mxu1 %v6292_v34  ;;  %v6522_v56 = vcombine.high %v797_v47, %v801_v48  ;;  %v789_v57 = vld [vmem:[#allocation2 + $0x840] sm:$0xff]  ;;  %v6521_v0 = vcombine.low %v797_v47, %v801_v48  ;;  %v614_v47 = vld [vmem:[#allocation2 + $0x2c8] sm:$0xff]  ;;  %v6348_v48 = vcombine.high %v622_v39, %v626_v41 }
  0xf2   : > { %v793_v60 = vld [vmem:[#allocation2 + $0x860] sm:$0xff]  ;;  %v6339_v63 = vcombine.low %v614_v47, %v618_v49  ;;  %v842_v24 = vld [vmem:[#allocation2 + $0x9e8] sm:$0xff] }
  0xf3   : > { %2979 = vmatpush1.bf16.msra.mxu0 %v6545_v36  ;;  %v6514_v2 = vcombine.high %v789_v57, %v793_v60  ;;  %v781_v3 = vld [vmem:[#allocation2 + $0x800] sm:$0xff]  ;;  %v6513_v8 = vcombine.low %v789_v57, %v793_v60  ;;  %v606_v57 = vld [vmem:[#allocation2 + $0x288] sm:$0xff]  ;;  %v6340_v60 = vcombine.high %v614_v47, %v618_v49 }
  0xf4   : > { %3020 = vmatpush1.bf16.msra.mxu1 %v6291_v37  ;;  %2980 = vmatprep.subr.bf16.mxu0 %v6538_v38  ;;  %v785_v4 = vld [vmem:[#allocation2 + $0x820] sm:$0xff]  ;;  %v6331_v7 = vcombine.low %v606_v57, %v610_v61  ;;  %v834_v31 = vld [vmem:[#allocation2 + $0x9a8] sm:$0xff] }
  0xf5   : > { %3021 = vmatprep.subr.bf16.mxu1 %v6284_v42  ;;  %v6506_v10 = vcombine.high %v781_v3, %v785_v4  ;;  %v901_v11 = vld [vmem:[#allocation2 + $0xbc0] sm:$0xff]  ;;  %v6505_v17 = vcombine.low %v781_v3, %v785_v4  ;;  %v598_v3 = vld [vmem:[#allocation2 + $0x248] sm:$0xff]  ;;  %v6332_v4 = vcombine.high %v606_v57, %v610_v61 }
  0xf6   : > { %v905_v12 = vld [vmem:[#allocation2 + $0xbe0] sm:$0xff]  ;;  %v6323_v15 = vcombine.low %v598_v3, %v602_v5  ;;  %v822_v39 = vld [vmem:[#allocation2 + $0x948] sm:$0xff] }
  0xf7   : > { %2981 = vmatpush1.bf16.msra.mxu0 %v6537_v44  ;;  %v6626_v21 = vcombine.high %v901_v11, %v905_v12  ;;  %v893_v22 = vld [vmem:[#allocation2 + $0xb80] sm:$0xff]  ;;  %v6625_v53 = vcombine.low %v901_v11, %v905_v12  ;;  %v590_v11 = vld [vmem:[#allocation2 + $0x208] sm:$0xff]  ;;  %v6324_v12 = vcombine.high %v598_v3, %v602_v5 }
  0xf8   : > { %3022 = vmatpush1.bf16.msra.mxu1 %v6283_v45  ;;  %2982 = vmatprep.subr.bf16.mxu0 %v6530_v46  ;;  %v897_v23 = vld [vmem:[#allocation2 + $0xba0] sm:$0xff]  ;;  %v6315_v26 = vcombine.low %v590_v11, %v594_v13  ;;  %v818_v47 = vld [vmem:[#allocation2 + $0x928] sm:$0xff] }
  0xf9   : > { %3023 = vmatprep.subr.bf16.mxu1 %v6276_v50  ;;  %v6618_v54 = vcombine.high %v893_v22, %v897_v23  ;;  %v885_v29 = vld [vmem:[#allocation2 + $0xb40] sm:$0xff]  ;;  %v6617_v34 = vcombine.low %v893_v22, %v897_v23  ;;  %v838_v22 = vld [vmem:[#allocation2 + $0x9c8] sm:$0xff]  ;;  %v6316_v23 = vcombine.high %v590_v11, %v594_v13 }
  0xfa   : > { %v889_v30 = vld [vmem:[#allocation2 + $0xb60] sm:$0xff]  ;;  %v810_v57 = vld [vmem:[#allocation2 + $0x8e8] sm:$0xff] }
  0xfb   : > { %2983 = vmatpush1.bf16.msra.mxu0 %v6529_v52  ;;  %v6610_v36 = vcombine.high %v885_v29, %v889_v30  ;;  %v877_v37 = vld [vmem:[#allocation2 + $0xb00] sm:$0xff]  ;;  %v6609_v42 = vcombine.low %v885_v29, %v889_v30  ;;  %v830_v29 = vld [vmem:[#allocation2 + $0x988] sm:$0xff]  ;;  %v6564_v30 = vcombine.high %v838_v22, %v842_v24 }
  0xfc   : > { %3024 = vmatpush1.bf16.msra.mxu1 %v6275_v55  ;;  %2984 = vmatprep.subr.bf16.mxu0 %v6522_v56  ;;  %v881_v38 = vld [vmem:[#allocation2 + $0xb20] sm:$0xff]  ;;  %v802_v3 = vld [vmem:[#allocation2 + $0x8a8] sm:$0xff] }
  0xfd   : > { %3025 = vmatprep.subr.bf16.mxu1 %v6268_v62  ;;  %v6602_v44 = vcombine.high %v877_v37, %v881_v38  ;;  %v869_v45 = vld [vmem:[#allocation2 + $0xac0] sm:$0xff]  ;;  %v6601_v50 = vcombine.low %v877_v37, %v881_v38  ;;  %v698_v37 = vld [vmem:[#allocation2 + $0x568] sm:$0xff]  ;;  %v6556_v38 = vcombine.high %v830_v29, %v834_v31 }
  0xfe   : > { %v873_v46 = vld [vmem:[#allocation2 + $0xae0] sm:$0xff]  ;;  %v794_v11 = vld [vmem:[#allocation2 + $0x868] sm:$0xff] }
  0xff   : > { %2985 = vmatpush1.bf16.msra.mxu0 %v6521_v0  ;;  %v6594_v52 = vcombine.high %v869_v45, %v873_v46  ;;  %v861_v55 = vld [vmem:[#allocation2 + $0xa80] sm:$0xff]  ;;  %v6593_v62 = vcombine.low %v869_v45, %v873_v46  ;;  %v814_v45 = vld [vmem:[#allocation2 + $0x908] sm:$0xff] }
 0x100   : > { %3026 = vmatpush1.bf16.msra.mxu1 %v6267_v1  ;;  %2986 = vmatprep.subr.bf16.mxu0 %v6514_v2  ;;  %v865_v56 = vld [vmem:[#allocation2 + $0xaa0] sm:$0xff]  ;;  %v6539_v61 = vcombine.low %v814_v45, %v818_v47 }
 0x101   : > { %3027 = vmatprep.subr.bf16.mxu1 %v6260_v6  ;;  %v6586_v0 = vcombine.high %v861_v55, %v865_v56  ;;  %v853_v1 = vld [vmem:[#allocation2 + $0xa40] sm:$0xff]  ;;  %v6585_v6 = vcombine.low %v861_v55, %v865_v56  ;;  %v806_v55 = vld [vmem:[#allocation2 + $0x8c8] sm:$0xff]  ;;  %v6540_v56 = vcombine.high %v814_v45, %v818_v47 }
 0x102   : > { %v857_v2 = vld [vmem:[#allocation2 + $0xa60] sm:$0xff]  ;;  %v6531_v5 = vcombine.low %v806_v55, %v810_v57  ;;  %v890_v45 = vld [vmem:[#allocation2 + $0xb68] sm:$0xff] }
 0x103   : > { %2987 = vmatpush1.bf16.msra.mxu0 %v6513_v8  ;;  %v6578_v8 = vcombine.high %v853_v1, %v857_v2 }
 0x104   : > { %3028 = vmatpush1.bf16.msra.mxu1 %v6259_v9  ;;  %2988 = vmatprep.subr.bf16.mxu0 %v6506_v10  ;;  %v845_v9 = vld [vmem:[#allocation2 + $0xa00] sm:$0xff] }
 0x105   : > { %3029 = vmatprep.subr.bf16.mxu1 %v6252_v14  ;;  %v849_v10 = vld [vmem:[#allocation2 + $0xa20] sm:$0xff]  ;;  %v6577_v14 = vcombine.low %v853_v1, %v857_v2  ;;  %v798_v1 = vld [vmem:[#allocation2 + $0x888] sm:$0xff]  ;;  %v6532_v2 = vcombine.high %v806_v55, %v810_v57 }
 0x106   : > { %v6523_v13 = vcombine.low %v798_v1, %v802_v3  ;;  %v882_v55 = vld [vmem:[#allocation2 + $0xb28] sm:$0xff] }
 0x107   : > { %2989 = vmatpush1.bf16.msra.mxu0 %v6505_v17  ;;  %v6570_v17 = vcombine.high %v845_v9, %v849_v10 }
 0x108   : > { %3030 = vmatpush1.bf16.msra.mxu1 %v6251_v18  ;;  %2990 = vmatprep.subr.bf16.mxu0 %v6626_v21  ;;  %v710_v18 = vld [vmem:[#allocation2 + $0x5c8] sm:$0xff] }
 0x109   : > { %3031 = vmatprep.subr.bf16.mxu1 %v6372_v25  ;;  %v714_v21 = vld [vmem:[#allocation2 + $0x5e8] sm:$0xff]  ;;  %v6569_v25 = vcombine.low %v845_v9, %v849_v10  ;;  %v6524_v10 = vcombine.high %v798_v1, %v802_v3 }
 0x10a   : > { %v6435_v33 = vcombine.low %v710_v18, %v714_v21  ;;  %v790_v9 = vld [vmem:[#allocation2 + $0x848] sm:$0xff] }
 0x10b   : > { %2991 = vmatpush2.bf16.msra.mxu0 %v6625_v53  ;;  %v6436_v53 = vcombine.high %v710_v18, %v714_v21  ;;  %v782_v18 = vld [vmem:[#allocation2 + $0x808] sm:$0xff]  ;;  %v6516_v21 = vcombine.high %v790_v9, %v794_v11 }
 0x10c   : > { %3032 = vmatpush2.bf16.msra.mxu1 %v6371_v27  ;;  %2992 = vmatprep.subr.bf16.mxu0 %v6618_v54  ;;  %v702_v27 = vld [vmem:[#allocation2 + $0x588] sm:$0xff] }
 0x10d   : > { %3033 = vmatprep.subr.bf16.mxu1 %v6364_v32  ;;  %v706_v54 = vld [vmem:[#allocation2 + $0x5a8] sm:$0xff]  ;;  %v8222_v32 = vcombine.low %v8206_v19, %v8206_v19  ;;  %v6555_v19 = vcombine.low %v830_v29, %v834_v31 }
 0x10e   : > { %v6427_v41 = vcombine.low %v702_v27, %v706_v54  ;;  %v906_v29 = vld [vmem:[#allocation2 + $0xbe8] sm:$0xff] }
 0x10f   : > { %2993 = vmatpush2.bf16.msra.mxu0 %v6617_v34  ;;  %v6563_v34 = vcombine.low %v838_v22, %v842_v24  ;;  %v786_v22 = vld [vmem:[#allocation2 + $0x828] sm:$0xff]  ;;  %v6515_v24 = vcombine.low %v790_v9, %v794_v11 }
 0x110   : > { %3034 = vmatpush2.bf16.msra.mxu1 %v6363_v35  ;;  %2994 = vmatprep.subr.bf16.mxu0 %v6610_v36  ;;  %v6428_v35 = vcombine.high %v702_v27, %v706_v54  ;;  %v694_v36 = vld [vmem:[#allocation2 + $0x548] sm:$0xff]  ;;  %v6508_v54 = vcombine.high %v782_v18, %v786_v22  ;;  %v6507_v31 = vcombine.low %v782_v18, %v786_v22 }
 0x111   : > { %3035 = vmatprep.subr.bf16.mxu1 %v6356_v40  ;;  %v826_v40 = vld [vmem:[#allocation2 + $0x968] sm:$0xff] }
 0x112   : > { %v6548_v46 = vcombine.high %v822_v39, %v826_v40  ;;  %v6547_v49 = vcombine.low %v822_v39, %v826_v40  ;;  %v902_v27 = vld [vmem:[#allocation2 + $0xbc8] sm:$0xff] }
 0x113   : > { %2995 = vmatpush2.bf16.msra.mxu0 %v6609_v42  ;;  %v6420_v42 = vcombine.high %v694_v36, %v698_v37  ;;  %v6627_v40 = vcombine.low %v902_v27, %v906_v29  ;;  %v874_v1 = vld [vmem:[#allocation2 + $0xae8] sm:$0xff] }
 0x114   : > { %3036 = vmatpush2.bf16.msra.mxu1 %v6355_v43  ;;  %2996 = vmatprep.subr.bf16.mxu0 %v6602_v44  ;;  %v686_v43 = vld [vmem:[#allocation2 + $0x508] sm:$0xff] }
 0x115   : > { %3037 = vmatprep.subr.bf16.mxu1 %v6348_v48  ;;  %v690_v44 = vld [vmem:[#allocation2 + $0x528] sm:$0xff]  ;;  %v6419_v48 = vcombine.low %v694_v36, %v698_v37  ;;  %v6628_v37 = vcombine.high %v902_v27, %v906_v29 }
 0x116   : > { %v894_v36 = vld [vmem:[#allocation2 + $0xb88] sm:$0xff] }
 0x117   : > { %2997 = vmatpush2.bf16.msra.mxu0 %v6601_v50  ;;  %v6412_v50 = vcombine.high %v686_v43, %v690_v44  ;;  %v866_v9 = vld [vmem:[#allocation2 + $0xaa8] sm:$0xff] }
 0x118   : > { %3038 = vmatpush2.bf16.msra.mxu1 %v6347_v51  ;;  %2998 = vmatprep.subr.bf16.mxu0 %v6594_v52  ;;  %v678_v51 = vld [vmem:[#allocation2 + $0x4c8] sm:$0xff] }
 0x119   : > { %3039 = vmatprep.subr.bf16.mxu1 %v6340_v60  ;;  %v682_v52 = vld [vmem:[#allocation2 + $0x4e8] sm:$0xff]  ;;  %v6411_v60 = vcombine.low %v686_v43, %v690_v44 }
 0x11a   : > { %v886_v43 = vld [vmem:[#allocation2 + $0xb48] sm:$0xff] }
 0x11b   : > { %2999 = vmatpush2.bf16.msra.mxu0 %v6593_v62  ;;  %v6404_v62 = vcombine.high %v678_v51, %v682_v52  ;;  %v6611_v57 = vcombine.low %v886_v43, %v890_v45  ;;  %v858_v18 = vld [vmem:[#allocation2 + $0xa68] sm:$0xff] }
 0x11c   : > { %3040 = vmatpush2.bf16.msra.mxu1 %v6339_v63  ;;  %3000 = vmatprep.subr.bf16.mxu0 %v6586_v0  ;;  %v670_v63 = vld [vmem:[#allocation2 + $0x488] sm:$0xff] }
 0x11d   : > { %3041 = vmatprep.subr.bf16.mxu1 %v6332_v4  ;;  %v674_v0 = vld [vmem:[#allocation2 + $0x4a8] sm:$0xff]  ;;  %v6403_v4 = vcombine.low %v678_v51, %v682_v52  ;;  %v6612_v52 = vcombine.high %v886_v43, %v890_v45  ;;  %v707_v43 = vld [vmem:[#allocation2 + $0x5b0] sm:$0xff] }
 0x11e   : > { %v878_v51 = vld [vmem:[#allocation2 + $0xb08] sm:$0xff] }
 0x11f   : > { %3001 = vmatpush2.bf16.msra.mxu0 %v6585_v6  ;;  %v6396_v6 = vcombine.high %v670_v63, %v674_v0  ;;  %v6603_v3 = vcombine.low %v878_v51, %v882_v55  ;;  %v850_v27 = vld [vmem:[#allocation2 + $0xa28] sm:$0xff] }
 0x120   : > { %3042 = vmatpush2.bf16.msra.mxu1 %v6331_v7  ;;  %3002 = vmatprep.subr.bf16.mxu0 %v6578_v8  ;;  %v662_v7 = vld [vmem:[#allocation2 + $0x448] sm:$0xff] }
 0x121   : > { %3043 = vmatprep.subr.bf16.mxu1 %v6324_v12  ;;  %v666_v8 = vld [vmem:[#allocation2 + $0x468] sm:$0xff]  ;;  %v6395_v12 = vcombine.low %v670_v63, %v674_v0  ;;  %v6604_v0 = vcombine.high %v878_v51, %v882_v55  ;;  %v699_v51 = vld [vmem:[#allocation2 + $0x570] sm:$0xff] }
 0x122   : > { %v870_v63 = vld [vmem:[#allocation2 + $0xac8] sm:$0xff] }
 0x123   : > { %3003 = vmatpush2.bf16.msra.mxu0 %v6577_v14  ;;  %v6388_v14 = vcombine.high %v662_v7, %v666_v8  ;;  %v6595_v11 = vcombine.low %v870_v63, %v874_v1 }
 0x124   : > { %3044 = vmatpush2.bf16.msra.mxu1 %v6323_v15  ;;  %3004 = vmatprep.subr.bf16.mxu0 %v6570_v17  ;;  %v654_v15 = vld [vmem:[#allocation2 + $0x408] sm:$0xff] }
 0x125   : > { %3045 = vmatprep.subr.bf16.mxu1 %v6316_v23  ;;  %v658_v17 = vld [vmem:[#allocation2 + $0x428] sm:$0xff]  ;;  %v6387_v23 = vcombine.low %v662_v7, %v666_v8  ;;  %v6596_v8 = vcombine.high %v870_v63, %v874_v1  ;;  %v691_v63 = vld [vmem:[#allocation2 + $0x530] sm:$0xff] }
 0x126   : > { %v862_v7 = vld [vmem:[#allocation2 + $0xa88] sm:$0xff] }
 0x127   : > { %3005 = vmatpush2.bf16.msra.mxu0 %v6569_v25  ;;  %v6380_v25 = vcombine.high %v654_v15, %v658_v17  ;;  %v6587_v22 = vcombine.low %v862_v7, %v866_v9 }
 0x128   : > { %3046 = vmatpush2.bf16.msra.mxu1 %v6315_v26  ;;  %3056 = vmatprep.subr.bf16.mxu0 %v6436_v53  ;;  %v774_v26 = vld [vmem:[#allocation2 + $0x7c8] sm:$0xff] }
 0x129   : > { %3097 = vmatprep.subr.bf16.mxu1 %v6564_v30  ;;  %v778_v53 = vld [vmem:[#allocation2 + $0x7e8] sm:$0xff]  ;;  %v6379_v30 = vcombine.low %v654_v15, %v658_v17  ;;  %v6588_v17 = vcombine.high %v862_v7, %v866_v9  ;;  %v683_v7 = vld [vmem:[#allocation2 + $0x4f0] sm:$0xff] }
 0x12a   : > { %3007 = vmatmul.mubr.bf16.vlgmr.msra.gmra.mxu0 %v8222_v32  ;;  %v6499_v39 = vcombine.low %v774_v26, %v778_v53  ;;  %v854_v15 = vld [vmem:[#allocation2 + $0xa48] sm:$0xff] }
 0x12b   : > { %3048 = vmatmul.mubr.bf16.vlgmr.msra.gmra.mxu1 %v8203_v16  ;;  %3057 = vmatpush1.bf16.msra.mxu0 %v6435_v33  ;;  %v6500_v33 = vcombine.high %v774_v26, %v778_v53  ;;  %v846_v26 = vld [vmem:[#allocation2 + $0xa08] sm:$0xff]  ;;  %v6580_v53 = vcombine.high %v854_v15, %v858_v18  ;;  %v6579_v29 = vcombine.low %v854_v15, %v858_v18  ;;  %v675_v15 = vld [vmem:[#allocation2 + $0x4b0] sm:$0xff] }
 0x12c   : > { %3098 = vmatpush1.bf16.msra.mxu1 %v6563_v34  ;;  %3058 = vmatprep.subr.bf16.mxu0 %v6428_v35  ;;  %v766_v34 = vld [vmem:[#allocation2 + $0x788] sm:$0xff] }
 0x12d   : > { %3099 = vmatprep.subr.bf16.mxu1 %v6556_v38  ;;  %3088 = vmatprep.mubr.bf16.mxu0 %v8197_v59  ;;  %v770_v35 = vld [vmem:[#allocation2 + $0x7a8] sm:$0xff] }
 0x12e   : > { %3129 = vmatprep.mubr.bf16.mxu1 %v8214_v28  ;;  %v898_v38 = vld [vmem:[#allocation2 + $0xba8] sm:$0xff] }
 0x12f   : > { %3059 = vmatpush1.bf16.msra.mxu0 %v6427_v41  ;;  %v6492_v41 = vcombine.high %v766_v34, %v770_v35  ;;  %v6620_v44 = vcombine.high %v894_v36, %v898_v38  ;;  %v6619_v47 = vcombine.low %v894_v36, %v898_v38  ;;  %v715_v36 = vld [vmem:[#allocation2 + $0x5f0] sm:$0xff]  ;;  %v6571_v38 = vcombine.low %v846_v26, %v850_v27 }
 0x130   : > { %3100 = vmatpush1.bf16.msra.mxu1 %v6555_v19  ;;  %3060 = vmatprep.subr.bf16.mxu0 %v6420_v42  ;;  %v758_v19 = vld [vmem:[#allocation2 + $0x748] sm:$0xff] }
 0x131   : > { %3101 = vmatprep.subr.bf16.mxu1 %v6548_v46  ;;  %v762_v42 = vld [vmem:[#allocation2 + $0x768] sm:$0xff]  ;;  %v6491_v46 = vcombine.low %v766_v34, %v770_v35  ;;  %v711_v34 = vld [vmem:[#allocation2 + $0x5d0] sm:$0xff]  ;;  %v6572_v35 = vcombine.high %v846_v26, %v850_v27 }
 0x132   : > { %v6437_v45 = vcombine.low %v711_v34, %v715_v36  ;;  %v667_v26 = vld [vmem:[#allocation2 + $0x470] sm:$0xff] }
 0x133   : > { %3061 = vmatpush1.bf16.msra.mxu0 %v6419_v48  ;;  %v6484_v48 = vcombine.high %v758_v19, %v762_v42 }
 0x134   : > { %3102 = vmatpush1.bf16.msra.mxu1 %v6547_v49  ;;  %3062 = vmatprep.subr.bf16.mxu0 %v6412_v50  ;;  %v750_v49 = vld [vmem:[#allocation2 + $0x708] sm:$0xff] }
 0x135   : > { %3103 = vmatprep.subr.bf16.mxu1 %v6540_v56  ;;  %v754_v50 = vld [vmem:[#allocation2 + $0x728] sm:$0xff]  ;;  %v6483_v56 = vcombine.low %v758_v19, %v762_v42  ;;  %v703_v19 = vld [vmem:[#allocation2 + $0x590] sm:$0xff]  ;;  %v6438_v42 = vcombine.high %v711_v34, %v715_v36 }
 0x136   : > { %v6429_v55 = vcombine.low %v703_v19, %v707_v43  ;;  %v659_v34 = vld [vmem:[#allocation2 + $0x430] sm:$0xff] }
 0x137   : > { %3063 = vmatpush1.bf16.msra.mxu0 %v6411_v60  ;;  %v6476_v60 = vcombine.high %v750_v49, %v754_v50 }
 0x138   : > { %3104 = vmatpush1.bf16.msra.mxu1 %v6539_v61  ;;  %3064 = vmatprep.subr.bf16.mxu0 %v6404_v62  ;;  %v742_v61 = vld [vmem:[#allocation2 + $0x6c8] sm:$0xff] }
 0x139   : > { %3105 = vmatprep.subr.bf16.mxu1 %v6532_v2  ;;  %v746_v62 = vld [vmem:[#allocation2 + $0x6e8] sm:$0xff]  ;;  %v6475_v2 = vcombine.low %v750_v49, %v754_v50  ;;  %v695_v49 = vld [vmem:[#allocation2 + $0x550] sm:$0xff]  ;;  %v6430_v50 = vcombine.high %v703_v19, %v707_v43 }
 0x13a   : > { %v6421_v1 = vcombine.low %v695_v49, %v699_v51  ;;  %v779_v19 = vld [vmem:[#allocation2 + $0x7f0] sm:$0xff] }
 0x13b   : > { %3065 = vmatpush1.bf16.msra.mxu0 %v6403_v4  ;;  %v6468_v4 = vcombine.high %v742_v61, %v746_v62 }
 0x13c   : > { %3106 = vmatpush1.bf16.msra.mxu1 %v6531_v5  ;;  %3066 = vmatprep.subr.bf16.mxu0 %v6396_v6  ;;  %v734_v5 = vld [vmem:[#allocation2 + $0x688] sm:$0xff] }
 0x13d   : > { %3107 = vmatprep.subr.bf16.mxu1 %v6524_v10  ;;  %v738_v6 = vld [vmem:[#allocation2 + $0x6a8] sm:$0xff]  ;;  %v6467_v10 = vcombine.low %v742_v61, %v746_v62  ;;  %v687_v61 = vld [vmem:[#allocation2 + $0x510] sm:$0xff]  ;;  %v6422_v62 = vcombine.high %v695_v49, %v699_v51 }
 0x13e   : > { %v6413_v9 = vcombine.low %v687_v61, %v691_v63  ;;  %v771_v49 = vld [vmem:[#allocation2 + $0x7b0] sm:$0xff] }
 0x13f   : > { %3067 = vmatpush1.bf16.msra.mxu0 %v6395_v12  ;;  %v6460_v12 = vcombine.high %v734_v5, %v738_v6 }
 0x140   : > { %3108 = vmatpush1.bf16.msra.mxu1 %v6523_v13  ;;  %3068 = vmatprep.subr.bf16.mxu0 %v6388_v14  ;;  %v726_v13 = vld [vmem:[#allocation2 + $0x648] sm:$0xff] }
 0x141   : > { %3109 = vmatprep.subr.bf16.mxu1 %v6516_v21  ;;  %v730_v14 = vld [vmem:[#allocation2 + $0x668] sm:$0xff]  ;;  %v6459_v21 = vcombine.low %v734_v5, %v738_v6  ;;  %v679_v5 = vld [vmem:[#allocation2 + $0x4d0] sm:$0xff]  ;;  %v6414_v6 = vcombine.high %v687_v61, %v691_v63 }
 0x142   : > { %v6405_v18 = vcombine.low %v679_v5, %v683_v7  ;;  %v763_v61 = vld [vmem:[#allocation2 + $0x770] sm:$0xff] }
 0x143   : > { %3069 = vmatpush1.bf16.msra.mxu0 %v6387_v23  ;;  %v6452_v23 = vcombine.high %v726_v13, %v730_v14 }
 0x144   : > { %3110 = vmatpush1.bf16.msra.mxu1 %v6515_v24  ;;  %3070 = vmatprep.subr.bf16.mxu0 %v6380_v25  ;;  %v718_v24 = vld [vmem:[#allocation2 + $0x608] sm:$0xff] }
 0x145   : > { %3111 = vmatprep.subr.bf16.mxu1 %v6508_v54  ;;  %v722_v25 = vld [vmem:[#allocation2 + $0x628] sm:$0xff]  ;;  %v6451_v54 = vcombine.low %v726_v13, %v730_v14  ;;  %v671_v13 = vld [vmem:[#allocation2 + $0x490] sm:$0xff]  ;;  %v6406_v14 = vcombine.high %v679_v5, %v683_v7 }
 0x146   : > { %v6397_v27 = vcombine.low %v671_v13, %v675_v15  ;;  %v755_v5 = vld [vmem:[#allocation2 + $0x730] sm:$0xff] }
 0x147   : > { %3071 = vmatpush1.bf16.msra.mxu0 %v6379_v30  ;;  %v6444_v30 = vcombine.high %v718_v24, %v722_v25 }
 0x148   : > { %3112 = vmatpush1.bf16.msra.mxu1 %v6507_v31  ;;  %3072 = vmatprep.subr.bf16.mxu0 %v6500_v33  ;;  %v583_v31 = vld [vmem:[#allocation2 + $0x1d0] sm:$0xff] }
 0x149   : > { %3113 = vmatprep.subr.bf16.mxu1 %v6628_v37  ;;  %v587_v33 = vld [vmem:[#allocation2 + $0x1f0] sm:$0xff]  ;;  %v6443_v37 = vcombine.low %v718_v24, %v722_v25  ;;  %v6398_v25 = vcombine.high %v671_v13, %v675_v15 }
 0x14a   : > { %v663_v24 = vld [vmem:[#allocation2 + $0x450] sm:$0xff] }
 0x14b   : > { %3073 = vmatpush2.bf16.msra.mxu0 %v6499_v39  ;;  %v6310_v39 = vcombine.high %v583_v31, %v587_v33  ;;  %v6389_v36 = vcombine.low %v663_v24, %v667_v26  ;;  %v747_v13 = vld [vmem:[#allocation2 + $0x6f0] sm:$0xff] }
 0x14c   : > { %3114 = vmatpush2.bf16.msra.mxu1 %v6627_v40  ;;  %3074 = vmatprep.subr.bf16.mxu0 %v6492_v41  ;;  %v575_v40 = vld [vmem:[#allocation2 + $0x190] sm:$0xff] }
 0x14d   : > { %3115 = vmatprep.subr.bf16.mxu1 %v6620_v44  ;;  %v579_v41 = vld [vmem:[#allocation2 + $0x1b0] sm:$0xff]  ;;  %v6309_v44 = vcombine.low %v583_v31, %v587_v33  ;;  %v6390_v33 = vcombine.high %v663_v24, %v667_v26 }
 0x14e   : > { %v655_v31 = vld [vmem:[#allocation2 + $0x410] sm:$0xff] }
 0x14f   : > { %3075 = vmatpush2.bf16.msra.mxu0 %v6491_v46  ;;  %v6302_v46 = vcombine.high %v575_v40, %v579_v41  ;;  %v6381_v43 = vcombine.low %v655_v31, %v659_v34  ;;  %v739_v24 = vld [vmem:[#allocation2 + $0x6b0] sm:$0xff] }
 0x150   : > { %3116 = vmatpush2.bf16.msra.mxu1 %v6619_v47  ;;  %3076 = vmatprep.subr.bf16.mxu0 %v6484_v48  ;;  %v567_v47 = vld [vmem:[#allocation2 + $0x150] sm:$0xff] }
 0x151   : > { %3117 = vmatprep.subr.bf16.mxu1 %v6612_v52  ;;  %v571_v48 = vld [vmem:[#allocation2 + $0x170] sm:$0xff]  ;;  %v6301_v52 = vcombine.low %v575_v40, %v579_v41  ;;  %v6382_v41 = vcombine.high %v655_v31, %v659_v34 }
 0x152   : > { %v775_v40 = vld [vmem:[#allocation2 + $0x7d0] sm:$0xff] }
 0x153   : > { %3077 = vmatpush2.bf16.msra.mxu0 %v6483_v56  ;;  %v6294_v56 = vcombine.high %v567_v47, %v571_v48  ;;  %v6501_v51 = vcombine.low %v775_v40, %v779_v19  ;;  %v731_v31 = vld [vmem:[#allocation2 + $0x670] sm:$0xff] }
 0x154   : > { %3118 = vmatpush2.bf16.msra.mxu1 %v6611_v57  ;;  %3078 = vmatprep.subr.bf16.mxu0 %v6476_v60  ;;  %v559_v57 = vld [vmem:[#allocation2 + $0x110] sm:$0xff] }
 0x155   : > { %3119 = vmatprep.subr.bf16.mxu1 %v6604_v0  ;;  %v563_v60 = vld [vmem:[#allocation2 + $0x130] sm:$0xff]  ;;  %v6293_v0 = vcombine.low %v567_v47, %v571_v48  ;;  %v6502_v48 = vcombine.high %v775_v40, %v779_v19 }
 0x156   : > { %v767_v47 = vld [vmem:[#allocation2 + $0x790] sm:$0xff] }
 0x157   : > { %3079 = vmatpush2.bf16.msra.mxu0 %v6475_v2  ;;  %v6286_v2 = vcombine.high %v559_v57, %v563_v60  ;;  %v6493_v63 = vcombine.low %v767_v47, %v771_v49 }
 0x158   : > { %3120 = vmatpush2.bf16.msra.mxu1 %v6603_v3  ;;  %3080 = vmatprep.subr.bf16.mxu0 %v6468_v4  ;;  %v551_v3 = vld [vmem:[#allocation2 + $0xd0] sm:$0xff] }
 0x159   : > { %3121 = vmatprep.subr.bf16.mxu1 %v6596_v8  ;;  %v555_v4 = vld [vmem:[#allocation2 + $0xf0] sm:$0xff]  ;;  %v6285_v8 = vcombine.low %v559_v57, %v563_v60  ;;  %v6494_v60 = vcombine.high %v767_v47, %v771_v49  ;;  %v588_v49 = vld [vmem:[#allocation2 + $0x1f8] sm:$0xff] }
 0x15a   : > { %v759_v57 = vld [vmem:[#allocation2 + $0x750] sm:$0xff] }
 0x15b   : > { %3081 = vmatpush2.bf16.msra.mxu0 %v6467_v10  ;;  %v6278_v10 = vcombine.high %v551_v3, %v555_v4  ;;  %v6485_v7 = vcombine.low %v759_v57, %v763_v61  ;;  %v843_v47 = vld [vmem:[#allocation2 + $0x9f0] sm:$0xff] }
 0x15c   : > { %3122 = vmatpush2.bf16.msra.mxu1 %v6595_v11  ;;  %3082 = vmatprep.subr.bf16.mxu0 %v6460_v12  ;;  %v543_v11 = vld [vmem:[#allocation2 + $0x90] sm:$0xff] }
 0x15d   : > { %3123 = vmatprep.subr.bf16.mxu1 %v6588_v17  ;;  %v547_v12 = vld [vmem:[#allocation2 + $0xb0] sm:$0xff]  ;;  %v6277_v17 = vcombine.low %v551_v3, %v555_v4  ;;  %v6486_v4 = vcombine.high %v759_v57, %v763_v61 }
 0x15e   : > { %v751_v3 = vld [vmem:[#allocation2 + $0x710] sm:$0xff] }
 0x15f   : > { %3083 = vmatpush2.bf16.msra.mxu0 %v6459_v21  ;;  %v6270_v21 = vcombine.high %v543_v11, %v547_v12  ;;  %v6477_v15 = vcombine.low %v751_v3, %v755_v5  ;;  %v831_v61 = vld [vmem:[#allocation2 + $0x990] sm:$0xff] }
 0x160   : > { %3124 = vmatpush2.bf16.msra.mxu1 %v6587_v22  ;;  %3084 = vmatprep.subr.bf16.mxu0 %v6452_v23  ;;  %v535_v22 = vld [vmem:[#allocation2 + $0x50] sm:$0xff] }
 0x161   : > { %3125 = vmatprep.subr.bf16.mxu1 %v6580_v53  ;;  %v539_v23 = vld [vmem:[#allocation2 + $0x70] sm:$0xff]  ;;  %v6269_v53 = vcombine.low %v543_v11, %v547_v12  ;;  %v6478_v12 = vcombine.high %v751_v3, %v755_v5 }
 0x162   : > { %v743_v11 = vld [vmem:[#allocation2 + $0x6d0] sm:$0xff] }
 0x163   : > { %3085 = vmatpush2.bf16.msra.mxu0 %v6451_v54  ;;  %v6262_v54 = vcombine.high %v535_v22, %v539_v23  ;;  %v6469_v26 = vcombine.low %v743_v11, %v747_v13 }
 0x164   : > { %3126 = vmatpush2.bf16.msra.mxu1 %v6579_v29  ;;  %3086 = vmatprep.subr.bf16.mxu0 %v6444_v30  ;;  %v527_v29 = vld [vmem:[#allocation2 + $0x10] sm:$0xff] }
 0x165   : > { %3127 = vmatprep.subr.bf16.mxu1 %v6572_v35  ;;  %v531_v30 = vld [vmem:[#allocation2 + $0x30] sm:$0xff]  ;;  %v6261_v35 = vcombine.low %v535_v22, %v539_v23  ;;  %v6470_v23 = vcombine.high %v743_v11, %v747_v13  ;;  %v572_v11 = vld [vmem:[#allocation2 + $0x178] sm:$0xff] }
 0x166   : > { %v735_v22 = vld [vmem:[#allocation2 + $0x690] sm:$0xff] }
 0x167   : > { %3087 = vmatpush2.bf16.msra.mxu0 %v6443_v37  ;;  %v6254_v37 = vcombine.high %v527_v29, %v531_v30 }
 0x168   : > { %3128 = vmatpush2.bf16.msra.mxu1 %v6571_v38  ;;  %3138 = vmatprep.subr.bf16.mxu0 %v6310_v39  ;;  %v647_v38 = vld [vmem:[#allocation2 + $0x3d0] sm:$0xff] }
 0x169   : > { %3179 = vmatprep.subr.bf16.mxu1 %v6438_v42  ;;  %v651_v39 = vld [vmem:[#allocation2 + $0x3f0] sm:$0xff]  ;;  %v6253_v42 = vcombine.low %v527_v29, %v531_v30  ;;  %v6462_v30 = vcombine.high %v735_v22, %v739_v24 }
 0x16a   : > { %3089 = vmatmul.mubr.bf16.vlgmr.msra.gmra.mxu0 %v8210_v20  ;;  %v727_v29 = vld [vmem:[#allocation2 + $0x650] sm:$0xff] }
 0x16b   : > { %3130 = vmatmul.mubr.bf16.vlgmr.msra.gmra.mxu1 %v8222_v32  ;;  %3139 = vmatpush1.bf16.msra.mxu0 %v6309_v44  ;;  %v6374_v44 = vcombine.high %v647_v38, %v651_v39  ;;  %v6454_v40 = vcombine.high %v727_v29, %v731_v31 }
 0x16c   : > { %3180 = vmatpush1.bf16.msra.mxu1 %v6437_v45  ;;  %3140 = vmatprep.subr.bf16.mxu0 %v6302_v46  ;;  %v639_v45 = vld [vmem:[#allocation2 + $0x390] sm:$0xff] }
 0x16d   : > { %3181 = vmatprep.subr.bf16.mxu1 %v6430_v50  ;;  %3170 = vmatprep.mubr.bf16.mxu0 %v8193_v58  ;;  %v643_v46 = vld [vmem:[#allocation2 + $0x3b0] sm:$0xff]  ;;  %v6373_v50 = vcombine.low %v647_v38, %v651_v39 }
 0x16e   : > { %3211 = vmatprep.mubr.bf16.mxu1 %v8197_v59  ;;  %v595_v38 = vld [vmem:[#allocation2 + $0x230] sm:$0xff] }
 0x16f   : > { %3141 = vmatpush1.bf16.msra.mxu0 %v6301_v52  ;;  %v6366_v52 = vcombine.high %v639_v45, %v643_v46  ;;  %v719_v39 = vld [vmem:[#allocation2 + $0x610] sm:$0xff] }
 0x170   : > { %3182 = vmatpush1.bf16.msra.mxu1 %v6429_v55  ;;  %3142 = vmatprep.subr.bf16.mxu0 %v6294_v56  ;;  %v631_v55 = vld [vmem:[#allocation2 + $0x350] sm:$0xff] }
 0x171   : > { %3183 = vmatprep.subr.bf16.mxu1 %v6422_v62  ;;  %v635_v56 = vld [vmem:[#allocation2 + $0x370] sm:$0xff]  ;;  %v6365_v62 = vcombine.low %v639_v45, %v643_v46 }
 0x172   : > { %v839_v46 = vld [vmem:[#allocation2 + $0x9d0] sm:$0xff] }
 0x173   : > { %3143 = vmatpush1.bf16.msra.mxu0 %v6293_v0  ;;  %v6358_v0 = vcombine.high %v631_v55, %v635_v56 }
 0x174   : > { %3184 = vmatpush1.bf16.msra.mxu1 %v6421_v1  ;;  %3144 = vmatprep.subr.bf16.mxu0 %v6286_v2  ;;  %v623_v1 = vld [vmem:[#allocation2 + $0x310] sm:$0xff] }
 0x175   : > { %3185 = vmatprep.subr.bf16.mxu1 %v6414_v6  ;;  %v627_v2 = vld [vmem:[#allocation2 + $0x330] sm:$0xff]  ;;  %v6357_v6 = vcombine.low %v631_v55, %v635_v56  ;;  %v8237_v55 = vld [vmem:[#allocation4] sm:$0xff]  ;;  %v6566_v56 = vcombine.high %v839_v46, %v843_v47 }
 0x177   : > { %3145 = vmatpush1.bf16.msra.mxu0 %v6285_v8  ;;  %v6350_v8 = vcombine.high %v623_v1, %v627_v2 }
 0x178   : > { %3186 = vmatpush1.bf16.msra.mxu1 %v6413_v9  ;;  %3146 = vmatprep.subr.bf16.mxu0 %v6278_v10  ;;  %v615_v9 = vld [vmem:[#allocation2 + $0x2d0] sm:$0xff] }
 0x179   : > { %3187 = vmatprep.subr.bf16.mxu1 %v6406_v14  ;;  %v619_v10 = vld [vmem:[#allocation2 + $0x2f0] sm:$0xff]  ;;  %v6349_v14 = vcombine.low %v623_v1, %v627_v2  ;;  %v6565_v2 = vcombine.low %v839_v46, %v843_v47  ;;  %v544_v47 = vld [vmem:[#allocation2 + $0x98] sm:$0xff] }
 0x17a   : > { %v803_v46 = vld [vmem:[#allocation2 + $0x8b0] sm:$0xff] }
 0x17b   : > { %3147 = vmatpush1.bf16.msra.mxu0 %v6277_v17  ;;  %v6342_v17 = vcombine.high %v615_v9, %v619_v10 }
 0x17c   : > { %3188 = vmatpush1.bf16.msra.mxu1 %v6405_v18  ;;  %3148 = vmatprep.subr.bf16.mxu0 %v6270_v21  ;;  %v607_v18 = vld [vmem:[#allocation2 + $0x290] sm:$0xff] }
 0x17d   : > { %3189 = vmatprep.subr.bf16.mxu1 %v6398_v25  ;;  %v611_v21 = vld [vmem:[#allocation2 + $0x2b0] sm:$0xff]  ;;  %v6341_v25 = vcombine.low %v615_v9, %v619_v10  ;;  %v568_v10 = vld [vmem:[#allocation2 + $0x158] sm:$0xff] }
 0x17e   : > { %v6333_v34 = vcombine.low %v607_v18, %v611_v21 }
 0x17f   : > { %3149 = vmatpush1.bf16.msra.mxu0 %v6269_v53  ;;  %v6334_v53 = vcombine.high %v607_v18, %v611_v21 }
 0x180   : > { %3190 = vmatpush1.bf16.msra.mxu1 %v6397_v27  ;;  %3150 = vmatprep.subr.bf16.mxu0 %v6262_v54  ;;  %v599_v27 = vld [vmem:[#allocation2 + $0x250] sm:$0xff] }
 0x181   : > { %3191 = vmatprep.subr.bf16.mxu1 %v6390_v33  ;;  %v603_v54 = vld [vmem:[#allocation2 + $0x270] sm:$0xff]  ;;  %v911_v33 = vlaneseq }
 0x183   : > { %3151 = vmatpush1.bf16.msra.mxu0 %v6261_v35  ;;  %v6461_v35 = vcombine.low %v735_v22, %v739_v24  ;;  %v8232_v19 = vshrl.u32 %v911_v33, 7  ;;  %v6296_v24 = vcombine.high %v568_v10, %v572_v11 }
 0x184   : > { %3192 = vmatpush1.bf16.msra.mxu1 %v6389_v36  ;;  %3152 = vmatprep.subr.bf16.mxu0 %v6254_v37  ;;  %v6326_v36 = vcombine.high %v599_v27, %v603_v54  ;;  %v591_v37 = vld [vmem:[#allocation2 + $0x210] sm:$0xff] }
 0x185   : > { %3193 = vmatprep.subr.bf16.mxu1 %v6382_v41  ;;  %v723_v41 = vld [vmem:[#allocation2 + $0x630] sm:$0xff] }
 0x186   : > { %v6446_v45 = vcombine.high %v719_v39, %v723_v41 }
 0x187   : > { %3153 = vmatpush1.bf16.msra.mxu0 %v6253_v42  ;;  %v6325_v42 = vcombine.low %v599_v27, %v603_v54  ;;  %v560_v27 = vld [vmem:[#allocation2 + $0x118] sm:$0xff] }
 0x188   : > { %3194 = vmatpush1.bf16.msra.mxu1 %v6381_v43  ;;  %3154 = vmatprep.subr.bf16.mxu0 %v6374_v44  ;;  %v6453_v43 = vcombine.low %v727_v29, %v731_v31  ;;  %v6318_v44 = vcombine.high %v591_v37, %v595_v38  ;;  %v564_v54 = vld [vmem:[#allocation2 + $0x138] sm:$0xff] }
 0x189   : > { %3195 = vmatprep.subr.bf16.mxu1 %v6502_v48  ;;  %v584_v48 = vld [vmem:[#allocation2 + $0x1d8] sm:$0xff] }
 0x18a   : > { %v6312_v57 = vcombine.high %v584_v48, %v588_v49  ;;  %v6311_v3 = vcombine.low %v584_v48, %v588_v49  ;;  %v548_v48 = vld [vmem:[#allocation2 + $0xb8] sm:$0xff] }
 0x18b   : > { %3155 = vmatpush2.bf16.msra.mxu0 %v6373_v50  ;;  %v6317_v50 = vcombine.low %v591_v37, %v595_v38  ;;  %v6288_v37 = vcombine.high %v560_v27, %v564_v54  ;;  %v807_v38 = vld [vmem:[#allocation2 + $0x8d0] sm:$0xff] }
 0x18c   : > { %3196 = vmatpush2.bf16.msra.mxu1 %v6501_v51  ;;  %3156 = vmatprep.subr.bf16.mxu0 %v6366_v52  ;;  %v8235_v51 = vsub.s32 0, %v8232_v19  ;;  %v6445_v52 = vcombine.low %v719_v39, %v723_v41  ;;  %v811_v39 = vld [vmem:[#allocation2 + $0x8f0] sm:$0xff]  ;;  %v556_v41 = vld [vmem:[#allocation2 + $0xf8] sm:$0xff] }
 0x18d   : > { %3197 = vmatprep.subr.bf16.mxu1 %v6494_v60  ;;  %v8240_v60 = vsub.s32 1, %v8232_v19  ;;  %v6533_v49 = vcombine.low %v807_v38, %v811_v39 }
 0x18e   : > { %v914_v1 = vrot.slane %v8237_v55, %v8235_v51 }
 0x18f   : > { %3157 = vmatpush2.bf16.msra.mxu0 %v6365_v62  ;;  %v835_v62 = vld [vmem:[#allocation2 + $0x9b0] sm:$0xff]  ;;  %v918_v5 = vrot.slane %v8237_v55, %v8240_v60 }
 0x190   : > { %3198 = vmatpush2.bf16.msra.mxu1 %v6493_v63  ;;  %3158 = vmatprep.subr.bf16.mxu0 %v6358_v0  ;;  %v576_v63 = vld [vmem:[#allocation2 + $0x198] sm:$0xff] }
 0x191   : > { %3199 = vmatprep.subr.bf16.mxu1 %v6486_v4  ;;  %v580_v0 = vld [vmem:[#allocation2 + $0x1b8] sm:$0xff]  ;;  %v6558_v4 = vcombine.high %v831_v61, %v835_v62 }
 0x193   : > { %3159 = vmatpush2.bf16.msra.mxu0 %v6357_v6  ;;  %v6304_v6 = vcombine.high %v576_v63, %v580_v0 }
 0x194   : > { %3200 = vmatpush2.bf16.msra.mxu1 %v6485_v7  ;;  %3160 = vmatprep.subr.bf16.mxu0 %v6350_v8  ;;  %v823_v7 = vld [vmem:[#allocation2 + $0x950] sm:$0xff] }
 0x195   : > { %3201 = vmatprep.subr.bf16.mxu1 %v6478_v12  ;;  %v827_v8 = vld [vmem:[#allocation2 + $0x970] sm:$0xff] }
 0x196   : > { %v6550_v18 = vcombine.high %v823_v7, %v827_v8  ;;  %v6549_v31 = vcombine.low %v823_v7, %v827_v8  ;;  %v532_v7 = vld [vmem:[#allocation2 + $0x38] sm:$0xff] }
 0x197   : > { %3161 = vmatpush2.bf16.msra.mxu0 %v6349_v14  ;;  %v6557_v14 = vcombine.low %v831_v61, %v835_v62  ;;  %v795_v61 = vld [vmem:[#allocation2 + $0x870] sm:$0xff]  ;;  %v536_v62 = vld [vmem:[#allocation2 + $0x58] sm:$0xff] }
 0x198   : > { %3202 = vmatpush2.bf16.msra.mxu1 %v6477_v15  ;;  %3162 = vmatprep.subr.bf16.mxu0 %v6342_v17  ;;  %v6303_v17 = vcombine.low %v576_v63, %v580_v0  ;;  %v540_v63 = vld [vmem:[#allocation2 + $0x78] sm:$0xff] }
 0x199   : > { %3203 = vmatprep.subr.bf16.mxu1 %v6470_v23 }
 0x19b   : > { %3163 = vmatpush2.bf16.msra.mxu0 %v6341_v25  ;;  %v815_v25 = vld [vmem:[#allocation2 + $0x910] sm:$0xff] }
 0x19c   : > { %3204 = vmatpush2.bf16.msra.mxu1 %v6469_v26  ;;  %3164 = vmatprep.subr.bf16.mxu0 %v6334_v53  ;;  %v819_v26 = vld [vmem:[#allocation2 + $0x930] sm:$0xff] }
 0x19d   : > { %3205 = vmatprep.subr.bf16.mxu1 %v6462_v30 }
 0x19f   : > { %3165 = vmatpush2.bf16.msra.mxu0 %v6333_v34  ;;  %v6295_v34 = vcombine.low %v568_v10, %v572_v11 }
 0x1a0   : > { %3206 = vmatpush2.bf16.msra.mxu1 %v6461_v35  ;;  %3166 = vmatprep.subr.bf16.mxu0 %v6326_v36  ;;  %v6542_v35 = vcombine.high %v815_v25, %v819_v26 }
 0x1a1   : > { %3207 = vmatprep.subr.bf16.mxu1 %v6454_v40  ;;  %v552_v40 = vld [vmem:[#allocation2 + $0xd8] sm:$0xff] }
 0x1a3   : > { %3167 = vmatpush2.bf16.msra.mxu0 %v6325_v42  ;;  %v6541_v42 = vcombine.low %v815_v25, %v819_v26  ;;  %v899_v25 = vld [vmem:[#allocation2 + $0xbb0] sm:$0xff]  ;;  %v640_v26 = vld [vmem:[#allocation2 + $0x398] sm:$0xff] }
 0x1a4   : > { %3208 = vmatpush2.bf16.msra.mxu1 %v6453_v43  ;;  %3168 = vmatprep.subr.bf16.mxu0 %v6318_v44  ;;  %v6534_v43 = vcombine.high %v807_v38, %v811_v39  ;;  %v6280_v44 = vcombine.high %v552_v40, %v556_v41 }
 0x1a5   : > { %3209 = vmatprep.subr.bf16.mxu1 %v6446_v45  ;;  %v799_v45 = vld [vmem:[#allocation2 + $0x890] sm:$0xff] }
 0x1a6   : > { %v6525_v0 = vcombine.low %v799_v45, %v803_v46 }
 0x1a7   : > { %3169 = vmatpush2.bf16.msra.mxu0 %v6317_v50  ;;  %v6279_v50 = vcombine.low %v552_v40, %v556_v41  ;;  %v879_v41 = vld [vmem:[#allocation2 + $0xb10] sm:$0xff] }
 0x1a8   : > { %3210 = vmatpush2.bf16.msra.mxu1 %v6445_v52  ;;  %3220 = vmatprep.subr.bf16.mxu0 %v6566_v56  ;;  %v6526_v52 = vcombine.high %v799_v45, %v803_v46  ;;  %v6272_v56 = vcombine.high %v544_v47, %v548_v48 }
 0x1a9   : > { %3261 = vmatprep.subr.bf16.mxu1 %v6312_v57  ;;  %v791_v57 = vld [vmem:[#allocation2 + $0x850] sm:$0xff] }
 0x1aa   : > { %v2926_v9 = vpop.f32.mrf.mxu0  ;;  %3171 = vmatmul.mubr.bf16.vlgmr.msra.gmra.mxu0 %v8203_v16  ;;  %v6517_v8 = vcombine.low %v791_v57, %v795_v61 }
 0x1ab   : > { %v2927_v12 = vadd.f32 %v2926_v9, %v914_v1  ;;  %v2967_v13 = vpop.f32.mrf.mxu1  ;;  %3212 = vmatmul.mubr.bf16.vlgmr.msra.gmra.mxu1 %v8210_v20  ;;  %3221 = vmatpush1.bf16.msra.mxu0 %v6565_v2  ;;  %v6271_v1 = vcombine.low %v544_v47, %v548_v48  ;;  %v6518_v2 = vcombine.high %v791_v57, %v795_v61  ;;  %v871_v48 = vld [vmem:[#allocation2 + $0xad0] sm:$0xff] }
 0x1ac   : > { %3262 = vmatpush1.bf16.msra.mxu1 %v6311_v3  ;;  %v2928_v15 = vpop.f32.mrf.mxu0  ;;  %3222 = vmatprep.subr.bf16.mxu0 %v6558_v4  ;;  %v6264_v3 = vcombine.high %v536_v62, %v540_v63  ;;  %v783_v4 = vld [vmem:[#allocation2 + $0x810] sm:$0xff]  ;;  %v6263_v9 = vcombine.low %v536_v62, %v540_v63 }
 0x1ad   : > { %v8248_v21 = vadd.f32 %v2967_v13, %v2927_v12  ;;  %v2929_v22 = vadd.f32 %v2928_v15, %v918_v5  ;;  %v2969_v23 = vpop.f32.mrf.mxu1  ;;  %3263 = vmatprep.subr.bf16.mxu1 %v6304_v6  ;;  %3252 = vmatprep.mubr.bf16.mxu0 %v8214_v28  ;;  %v787_v5 = vld [vmem:[#allocation2 + $0x830] sm:$0xff]  ;;  %v528_v6 = vld [vmem:[#allocation2 + $0x18] sm:$0xff] }
 0x1ae   : > { %v2930_v53 = vpop.f32.mrf.mxu0  ;;  %3293 = vmatprep.mubr.bf16.mxu1 %v8193_v58  ;;  %v6287_v58 = vcombine.low %v560_v27, %v564_v54  ;;  %v6510_v10 = vcombine.high %v783_v4, %v787_v5  ;;  %v6256_v11 = vcombine.high %v528_v6, %v532_v7  ;;  %v903_v12 = vld [vmem:[#allocation2 + $0xbd0] sm:$0xff]  ;;  %v652_v15 = vld [vmem:[#allocation2 + $0x3f8] sm:$0xff] }
 0x1af   : > { %v8252_v29 = vadd.f32 %v2969_v23, %v2929_v22  ;;  %v2971_v30 = vpop.f32.mrf.mxu1  ;;  %3223 = vmatpush1.bf16.msra.mxu0 %v6557_v14  ;;  %v907_v13 = vld [vmem:[#allocation2 + $0xbf0] sm:$0xff]  ;;  %v648_v14 = vld [vmem:[#allocation2 + $0x3d8] sm:$0xff] }
 0x1b0   : > { %3264 = vmatpush1.bf16.msra.mxu1 %v6303_v17  ;;  %v2931_v33 = vpop.f32.mrf.mxu0  ;;  %3224 = vmatprep.subr.bf16.mxu0 %v6550_v18  ;;  %v6509_v17 = vcombine.low %v783_v4, %v787_v5  ;;  %v6255_v18 = vcombine.low %v528_v6, %v532_v7  ;;  %v6630_v22 = vcombine.high %v903_v12, %v907_v13  ;;  %v644_v53 = vld [vmem:[#allocation2 + $0x3b8] sm:$0xff]  ;;  %v863_v63 = vld [vmem:[#allocation2 + $0xa90] sm:$0xff] }
 0x1b1   : > { %v2972_v36 = vpop.f32.mrf.mxu1  ;;  %3265 = vmatprep.subr.bf16.mxu1 %v6296_v24  ;;  %v6376_v23 = vcombine.high %v648_v14, %v652_v15  ;;  %v895_v24 = vld [vmem:[#allocation2 + $0xb90] sm:$0xff]  ;;  %v6629_v27 = vcombine.low %v903_v12, %v907_v13  ;;  %v6375_v54 = vcombine.low %v648_v14, %v652_v15  ;;  %v6367_v38 = vcombine.low %v640_v26, %v644_v53 }
 0x1b2   : > { %v6622_v30 = vcombine.high %v895_v24, %v899_v25  ;;  %v887_v33 = vld [vmem:[#allocation2 + $0xb50] sm:$0xff]  ;;  %v636_v36 = vld [vmem:[#allocation2 + $0x378] sm:$0xff] }
 0x1b3   : > { %3225 = vmatpush1.bf16.msra.mxu0 %v6549_v31  ;;  %v6368_v31 = vcombine.high %v640_v26, %v644_v53  ;;  %v855_v7 = vld [vmem:[#allocation2 + $0xa50] sm:$0xff]  ;;  %v712_v53 = vld [vmem:[#allocation2 + $0x5d8] sm:$0xff] }
 0x1b4   : > { %3266 = vmatpush1.bf16.msra.mxu1 %v6295_v34  ;;  %3226 = vmatprep.subr.bf16.mxu0 %v6542_v35  ;;  %v891_v34 = vld [vmem:[#allocation2 + $0xb70] sm:$0xff]  ;;  %v632_v35 = vld [vmem:[#allocation2 + $0x358] sm:$0xff] }
 0x1b5   : > { %3267 = vmatprep.subr.bf16.mxu1 %v6288_v37  ;;  %v6621_v37 = vcombine.low %v895_v24, %v899_v25  ;;  %v6614_v39 = vcombine.high %v887_v33, %v891_v34  ;;  %v6360_v40 = vcombine.high %v632_v35, %v636_v36  ;;  %v6359_v45 = vcombine.low %v632_v35, %v636_v36  ;;  %v847_v15 = vld [vmem:[#allocation2 + $0xa10] sm:$0xff]  ;;  %v704_v36 = vld [vmem:[#allocation2 + $0x598] sm:$0xff] }
 0x1b7   : > { %3227 = vmatpush1.bf16.msra.mxu0 %v6541_v42  ;;  %v883_v42 = vld [vmem:[#allocation2 + $0xb30] sm:$0xff] }
 0x1b8   : > { %3268 = vmatpush1.bf16.msra.mxu1 %v6287_v58  ;;  %3228 = vmatprep.subr.bf16.mxu0 %v6534_v43  ;;  %v624_v58 = vld [vmem:[#allocation2 + $0x318] sm:$0xff]  ;;  %v6606_v46 = vcombine.high %v879_v41, %v883_v42 }
 0x1b9   : > { %3269 = vmatprep.subr.bf16.mxu1 %v6280_v44  ;;  %v628_v43 = vld [vmem:[#allocation2 + $0x338] sm:$0xff]  ;;  %v6613_v44 = vcombine.low %v887_v33, %v891_v34 }
 0x1ba   : > { %v6352_v47 = vcombine.high %v624_v58, %v628_v43  ;;  %v6351_v57 = vcombine.low %v624_v58, %v628_v43  ;;  %v696_v43 = vld [vmem:[#allocation2 + $0x558] sm:$0xff] }
 0x1bb   : > { %3229 = vmatpush1.bf16.msra.mxu0 %v6533_v49  ;;  %v875_v49 = vld [vmem:[#allocation2 + $0xaf0] sm:$0xff] }
 0x1bc   : > { %3270 = vmatpush1.bf16.msra.mxu1 %v6279_v50  ;;  %3230 = vmatprep.subr.bf16.mxu0 %v6526_v52  ;;  %v616_v50 = vld [vmem:[#allocation2 + $0x2d8] sm:$0xff]  ;;  %v6598_v61 = vcombine.high %v871_v48, %v875_v49 }
 0x1bd   : > { %3271 = vmatprep.subr.bf16.mxu1 %v6272_v56  ;;  %v620_v52 = vld [vmem:[#allocation2 + $0x2f8] sm:$0xff]  ;;  %v6605_v56 = vcombine.low %v879_v41, %v883_v42 }
 0x1be   : > { %v6344_v62 = vcombine.high %v616_v50, %v620_v52  ;;  %v6343_v4 = vcombine.low %v616_v50, %v620_v52 }
 0x1bf   : > { %3231 = vmatpush1.bf16.msra.mxu0 %v6525_v0  ;;  %v867_v0 = vld [vmem:[#allocation2 + $0xab0] sm:$0xff] }
 0x1c0   : > { %3272 = vmatpush1.bf16.msra.mxu1 %v6271_v1  ;;  %3232 = vmatprep.subr.bf16.mxu0 %v6518_v2  ;;  %v608_v1 = vld [vmem:[#allocation2 + $0x298] sm:$0xff]  ;;  %v6590_v5 = vcombine.high %v863_v63, %v867_v0 }
 0x1c1   : > { %3273 = vmatprep.subr.bf16.mxu1 %v6264_v3  ;;  %v612_v2 = vld [vmem:[#allocation2 + $0x2b8] sm:$0xff]  ;;  %v6597_v3 = vcombine.low %v871_v48, %v875_v49 }
 0x1c2   : > { %v6336_v6 = vcombine.high %v608_v1, %v612_v2  ;;  %v6335_v12 = vcombine.low %v608_v1, %v612_v2  ;;  %v816_v1 = vld [vmem:[#allocation2 + $0x918] sm:$0xff] }
 0x1c3   : > { %3233 = vmatpush1.bf16.msra.mxu0 %v6517_v8  ;;  %v859_v8 = vld [vmem:[#allocation2 + $0xa70] sm:$0xff]  ;;  %v820_v2 = vld [vmem:[#allocation2 + $0x938] sm:$0xff] }
 0x1c4   : > { %3274 = vmatpush1.bf16.msra.mxu1 %v6263_v9  ;;  %3234 = vmatprep.subr.bf16.mxu0 %v6510_v10  ;;  %v600_v9 = vld [vmem:[#allocation2 + $0x258] sm:$0xff]  ;;  %v6582_v13 = vcombine.high %v855_v7, %v859_v8 }
 0x1c5   : > { %3275 = vmatprep.subr.bf16.mxu1 %v6256_v11  ;;  %v604_v10 = vld [vmem:[#allocation2 + $0x278] sm:$0xff]  ;;  %v6589_v11 = vcombine.low %v863_v63, %v867_v0 }
 0x1c6   : > { %v6328_v14 = vcombine.high %v600_v9, %v604_v10  ;;  %v6327_v24 = vcombine.low %v600_v9, %v604_v10  ;;  %v688_v63 = vld [vmem:[#allocation2 + $0x518] sm:$0xff] }
 0x1c7   : > { %3235 = vmatpush1.bf16.msra.mxu0 %v6509_v17  ;;  %v851_v17 = vld [vmem:[#allocation2 + $0xa30] sm:$0xff]  ;;  %v692_v0 = vld [vmem:[#allocation2 + $0x538] sm:$0xff] }
 0x1c8   : > { %3276 = vmatpush1.bf16.msra.mxu1 %v6255_v18  ;;  %3236 = vmatprep.subr.bf16.mxu0 %v6630_v22  ;;  %v592_v18 = vld [vmem:[#allocation2 + $0x218] sm:$0xff]  ;;  %v6574_v25 = vcombine.high %v847_v15, %v851_v17 }
 0x1c9   : > { %3277 = vmatprep.subr.bf16.mxu1 %v6376_v23  ;;  %v596_v22 = vld [vmem:[#allocation2 + $0x238] sm:$0xff]  ;;  %v6581_v23 = vcombine.low %v855_v7, %v859_v8  ;;  %v6544_v8 = vcombine.high %v816_v1, %v820_v2 }
 0x1ca   : > { %v6320_v26 = vcombine.high %v592_v18, %v596_v22  ;;  %v6319_v33 = vcombine.low %v592_v18, %v596_v22  ;;  %v680_v9 = vld [vmem:[#allocation2 + $0x4d8] sm:$0xff] }
 0x1cb   : > { %3237 = vmatpush2.bf16.msra.mxu0 %v6629_v27  ;;  %v716_v27 = vld [vmem:[#allocation2 + $0x5f8] sm:$0xff] }
 0x1cc   : > { %3278 = vmatpush2.bf16.msra.mxu1 %v6375_v54  ;;  %3238 = vmatprep.subr.bf16.mxu0 %v6622_v30  ;;  %v840_v54 = vld [vmem:[#allocation2 + $0x9d8] sm:$0xff]  ;;  %v6440_v34 = vcombine.high %v712_v53, %v716_v27 }
 0x1cd   : > { %3279 = vmatprep.subr.bf16.mxu1 %v6368_v31  ;;  %v844_v30 = vld [vmem:[#allocation2 + $0x9f8] sm:$0xff]  ;;  %v6573_v31 = vcombine.low %v847_v15, %v851_v17 }
 0x1ce   : > { %v6568_v35 = vcombine.high %v840_v54, %v844_v30  ;;  %v6567_v41 = vcombine.low %v840_v54, %v844_v30  ;;  %v684_v10 = vld [vmem:[#allocation2 + $0x4f8] sm:$0xff] }
 0x1cf   : > { %3239 = vmatpush2.bf16.msra.mxu0 %v6621_v37  ;;  %v708_v37 = vld [vmem:[#allocation2 + $0x5b8] sm:$0xff] }
 0x1d0   : > { %3280 = vmatpush2.bf16.msra.mxu1 %v6367_v38  ;;  %3240 = vmatprep.subr.bf16.mxu0 %v6614_v39  ;;  %v832_v38 = vld [vmem:[#allocation2 + $0x998] sm:$0xff]  ;;  %v6432_v42 = vcombine.high %v704_v36, %v708_v37  ;;  %v6431_v50 = vcombine.low %v704_v36, %v708_v37 }
 0x1d1   : > { %3281 = vmatprep.subr.bf16.mxu1 %v6360_v40  ;;  %v836_v39 = vld [vmem:[#allocation2 + $0x9b8] sm:$0xff]  ;;  %v6439_v40 = vcombine.low %v712_v53, %v716_v27 }
 0x1d2   : > { %v6560_v58 = vcombine.high %v832_v38, %v836_v39  ;;  %v672_v15 = vld [vmem:[#allocation2 + $0x498] sm:$0xff] }
 0x1d3   : > { %3241 = vmatpush2.bf16.msra.mxu0 %v6613_v44  ;;  %v700_v44 = vld [vmem:[#allocation2 + $0x578] sm:$0xff] }
 0x1d4   : > { %3282 = vmatpush2.bf16.msra.mxu1 %v6359_v45  ;;  %3242 = vmatprep.subr.bf16.mxu0 %v6606_v46  ;;  %v824_v46 = vld [vmem:[#allocation2 + $0x958] sm:$0xff] }
 0x1d5   : > { %3283 = vmatprep.subr.bf16.mxu1 %v6352_v47  ;;  %v828_v47 = vld [vmem:[#allocation2 + $0x978] sm:$0xff] }
 0x1d6   : > { %v676_v17 = vld [vmem:[#allocation2 + $0x4b8] sm:$0xff] }
 0x1d7   : > { %3243 = vmatpush2.bf16.msra.mxu0 %v6605_v56  ;;  %v6559_v56 = vcombine.low %v832_v38, %v836_v39  ;;  %v800_v18 = vld [vmem:[#allocation2 + $0x898] sm:$0xff] }
 0x1d8   : > { %3284 = vmatpush2.bf16.msra.mxu1 %v6351_v57  ;;  %3244 = vmatprep.subr.bf16.mxu0 %v6598_v61  ;;  %v6424_v57 = vcombine.high %v696_v43, %v700_v44  ;;  %v804_v22 = vld [vmem:[#allocation2 + $0x8b8] sm:$0xff] }
 0x1d9   : > { %3285 = vmatprep.subr.bf16.mxu1 %v6344_v62  ;;  %v6552_v62 = vcombine.high %v824_v46, %v828_v47  ;;  %v664_v53 = vld [vmem:[#allocation2 + $0x458] sm:$0xff] }
 0x1da   : > { %v668_v27 = vld [vmem:[#allocation2 + $0x478] sm:$0xff] }
 0x1db   : > { %3245 = vmatpush2.bf16.msra.mxu0 %v6597_v3  ;;  %v6423_v3 = vcombine.low %v696_v43, %v700_v44  ;;  %v792_v54 = vld [vmem:[#allocation2 + $0x858] sm:$0xff] }
 0x1dc   : > { %3286 = vmatpush2.bf16.msra.mxu1 %v6343_v4  ;;  %3246 = vmatprep.subr.bf16.mxu0 %v6590_v5  ;;  %v6551_v5 = vcombine.low %v824_v46, %v828_v47  ;;  %v796_v30 = vld [vmem:[#allocation2 + $0x878] sm:$0xff] }
 0x1dd   : > { %3287 = vmatprep.subr.bf16.mxu1 %v6336_v6  ;;  %v6416_v6 = vcombine.high %v688_v63, %v692_v0  ;;  %v656_v36 = vld [vmem:[#allocation2 + $0x418] sm:$0xff] }
 0x1de   : > { %v660_v37 = vld [vmem:[#allocation2 + $0x438] sm:$0xff] }
 0x1df   : > { %3247 = vmatpush2.bf16.msra.mxu0 %v6589_v11  ;;  %v808_v11 = vld [vmem:[#allocation2 + $0x8d8] sm:$0xff]  ;;  %v6383_v47 = vcombine.low %v656_v36, %v660_v37 }
 0x1e0   : > { %3288 = vmatpush2.bf16.msra.mxu1 %v6335_v12  ;;  %3248 = vmatprep.subr.bf16.mxu0 %v6582_v13  ;;  %v6415_v12 = vcombine.low %v688_v63, %v692_v0  ;;  %v6408_v13 = vcombine.high %v680_v9, %v684_v10  ;;  %v784_v38 = vld [vmem:[#allocation2 + $0x818] sm:$0xff] }
 0x1e1   : > { %3289 = vmatprep.subr.bf16.mxu1 %v6328_v14  ;;  %v788_v39 = vld [vmem:[#allocation2 + $0x838] sm:$0xff] }
 0x1e2   : > { %v776_v43 = vld [vmem:[#allocation2 + $0x7d8] sm:$0xff] }
 0x1e3   : > { %3249 = vmatpush2.bf16.msra.mxu0 %v6581_v23  ;;  %v6407_v23 = vcombine.low %v680_v9, %v684_v10  ;;  %v780_v44 = vld [vmem:[#allocation2 + $0x7f8] sm:$0xff] }
 0x1e4   : > { %3290 = vmatpush2.bf16.msra.mxu1 %v6327_v24  ;;  %3250 = vmatprep.subr.bf16.mxu0 %v6574_v25  ;;  %v6400_v25 = vcombine.high %v672_v15, %v676_v17  ;;  %v908_v46 = vld [vmem:[#allocation2 + $0xbf8] sm:$0xff] }
 0x1e5   : > { %3291 = vmatprep.subr.bf16.mxu1 %v6320_v26  ;;  %v6528_v26 = vcombine.high %v800_v18, %v804_v22  ;;  %v772_v63 = vld [vmem:[#allocation2 + $0x7b8] sm:$0xff] }
 0x1e6   : > { %v896_v0 = vld [vmem:[#allocation2 + $0xb98] sm:$0xff] }
 0x1e7   : > { %3251 = vmatpush2.bf16.msra.mxu0 %v6573_v31  ;;  %v6399_v31 = vcombine.low %v672_v15, %v676_v17 }
 0x1e8   : > { %3292 = vmatpush2.bf16.msra.mxu1 %v6319_v33  ;;  %3302 = vmatprep.subr.bf16.mxu0 %v6440_v34  ;;  %v6527_v33 = vcombine.low %v800_v18, %v804_v22  ;;  %v6392_v34 = vcombine.high %v664_v53, %v668_v27  ;;  %v744_v22 = vld [vmem:[#allocation2 + $0x6d8] sm:$0xff] }
 0x1e9   : > { %3343 = vmatprep.subr.bf16.mxu1 %v6568_v35  ;;  %v6520_v35 = vcombine.high %v792_v54, %v796_v30 }
 0x1ea   : > { %v3008_v45 = vpop.f32.mrf.mxu0  ;;  %3253 = vmatmul.mubr.bf16.vlgmr.msra.gmra.mxu0 %v8222_v32 }
 0x1eb   : > { %v8256_v48 = vadd.f32 %v3008_v45, %v8248_v21  ;;  %v8258_v49 = vpop.f32.mrf.mxu1  ;;  %3294 = vmatmul.mubr.bf16.vlgmr.msra.gmra.mxu1 %v8203_v16  ;;  %3303 = vmatpush1.bf16.msra.mxu0 %v6439_v40  ;;  %v6391_v40 = vcombine.low %v664_v53, %v668_v27  ;;  %v904_v45 = vld [vmem:[#allocation2 + $0xbd8] sm:$0xff] }
 0x1ec   : > { %3344 = vmatpush1.bf16.msra.mxu1 %v6567_v41  ;;  %v8261_v52 = vpop.f32.mrf.mxu0  ;;  %3304 = vmatprep.subr.bf16.mxu0 %v6432_v42  ;;  %v6519_v41 = vcombine.low %v792_v54, %v796_v30  ;;  %v6384_v42 = vcombine.high %v656_v36, %v660_v37  ;;  %v736_v30 = vld [vmem:[#allocation2 + $0x698] sm:$0xff] }
 0x1ed   : > { %v8263_v61 = vpop.f32.mrf.mxu1  ;;  %3345 = vmatprep.subr.bf16.mxu1 %v6560_v58  ;;  %3334 = vmatprep.mubr.bf16.mxu0 %v8197_v59  ;;  %v812_v59 = vld [vmem:[#allocation2 + $0x8f8] sm:$0xff]  ;;  %v6512_v58 = vcombine.high %v784_v38, %v788_v39 }
 0x1ee   : > { %v3012_v21 = vpop.f32.mrf.mxu0  ;;  %3375 = vmatprep.mubr.bf16.mxu1 %v8214_v28  ;;  %v6543_v28 = vcombine.low %v816_v1, %v820_v2  ;;  %v6536_v14 = vcombine.high %v808_v11, %v812_v59  ;;  %v6535_v24 = vcombine.low %v808_v11, %v812_v59  ;;  %v6503_v1 = vcombine.low %v776_v43, %v780_v44  ;;  %v752_v59 = vld [vmem:[#allocation2 + $0x718] sm:$0xff] }
 0x1ef   : > { %v3053_v16 = vpop.f32.mrf.mxu1  ;;  %3305 = vmatpush1.bf16.msra.mxu0 %v6431_v50  ;;  %v6511_v50 = vcombine.low %v784_v38, %v788_v39  ;;  %v900_v21 = vld [vmem:[#allocation2 + $0xbb8] sm:$0xff]  ;;  %v6631_v2 = vcombine.low %v904_v45, %v908_v46 }
 0x1f0   : > { %3346 = vmatpush1.bf16.msra.mxu1 %v6559_v56  ;;  %v3013_v4 = vpop.f32.mrf.mxu0  ;;  %3306 = vmatprep.subr.bf16.mxu0 %v6424_v57  ;;  %v6504_v56 = vcombine.high %v776_v43, %v780_v44  ;;  %v6632_v57 = vcombine.high %v904_v45, %v908_v46  ;;  %v6623_v9 = vcombine.low %v896_v0, %v900_v21  ;;  %v728_v39 = vld [vmem:[#allocation2 + $0x658] sm:$0xff] }
 0x1f1   : > { %v3054_v7 = vpop.f32.mrf.mxu1  ;;  %3347 = vmatprep.subr.bf16.mxu1 %v6552_v62  ;;  %v768_v62 = vld [vmem:[#allocation2 + $0x798] sm:$0xff] }
 0x1f2   : > { %v6496_v16 = vcombine.high %v768_v62, %v772_v63  ;;  %v760_v4 = vld [vmem:[#allocation2 + $0x758] sm:$0xff] }
 0x1f3   : > { %3307 = vmatpush1.bf16.msra.mxu0 %v6423_v3  ;;  %v6624_v3 = vcombine.high %v896_v0, %v900_v21  ;;  %v892_v7 = vld [vmem:[#allocation2 + $0xb78] sm:$0xff]  ;;  %v3011_v21 = vadd.f32 %v8261_v52, %v8252_v29 }
 0x1f4   : > { %3348 = vmatpush1.bf16.msra.mxu1 %v6551_v5  ;;  %3308 = vmatprep.subr.bf16.mxu0 %v6416_v6  ;;  %v764_v5 = vld [vmem:[#allocation2 + $0x778] sm:$0xff] }
 0x1f5   : > { %3349 = vmatprep.subr.bf16.mxu1 %v6544_v8  ;;  %v888_v6 = vld [vmem:[#allocation2 + $0xb58] sm:$0xff]  ;;  %v6495_v8 = vcombine.low %v768_v62, %v772_v63  ;;  %v6488_v10 = vcombine.high %v760_v4, %v764_v5 }
 0x1f6   : > { %v6616_v11 = vcombine.high %v888_v6, %v892_v7  ;;  %v6615_v15 = vcombine.low %v888_v6, %v892_v7  ;;  %v720_v46 = vld [vmem:[#allocation2 + $0x618] sm:$0xff] }
 0x1f7   : > { %3309 = vmatpush1.bf16.msra.mxu0 %v6415_v12  ;;  %v756_v12 = vld [vmem:[#allocation2 + $0x738] sm:$0xff] }
 0x1f8   : > { %3350 = vmatpush1.bf16.msra.mxu1 %v6543_v28  ;;  %3310 = vmatprep.subr.bf16.mxu0 %v6408_v13  ;;  %v880_v28 = vld [vmem:[#allocation2 + $0xb18] sm:$0xff]  ;;  %v6480_v17 = vcombine.high %v752_v59, %v756_v12 }
 0x1f9   : > { %3351 = vmatprep.subr.bf16.mxu1 %v6536_v14  ;;  %v884_v13 = vld [vmem:[#allocation2 + $0xb38] sm:$0xff]  ;;  %v6487_v14 = vcombine.low %v760_v4, %v764_v5  ;;  %v3385_v5 = vmax.f32 %v3011_v21, 0.0 }
 0x1fa   : > { %v6608_v18 = vcombine.high %v880_v28, %v884_v13  ;;  %v6607_v53 = vcombine.low %v880_v28, %v884_v13  ;;  %v7163_v4 = vld [vmem:[#allocation6 + $0x2e4] ss:$16 sps:$4 sm:$0xff]   ;;  %v7158_v7 = vld [vmem:[#allocation6 + $0xe0] ss:$16 sps:$4 sm:$0xff]  }
 0x1fb   : > { %3311 = vmatpush1.bf16.msra.mxu0 %v6407_v23  ;;  %v748_v23 = vld [vmem:[#allocation2 + $0x6f8] sm:$0xff] }
 0x1fc   : > { %3352 = vmatpush1.bf16.msra.mxu1 %v6535_v24  ;;  %3312 = vmatprep.subr.bf16.mxu0 %v6400_v25  ;;  %v872_v24 = vld [vmem:[#allocation2 + $0xad8] sm:$0xff]  ;;  %v6472_v27 = vcombine.high %v744_v22, %v748_v23 }
 0x1fd   : > { %3353 = vmatprep.subr.bf16.mxu1 %v6528_v26  ;;  %v876_v25 = vld [vmem:[#allocation2 + $0xaf8] sm:$0xff]  ;;  %v6479_v26 = vcombine.low %v752_v59, %v756_v12 }
 0x1fe   : > { %v6600_v54 = vcombine.high %v872_v24, %v876_v25  ;;  %v6599_v36 = vcombine.low %v872_v24, %v876_v25  ;;  %v7161_v29 = vld [vmem:[#allocation6 + $0x2e0] ss:$16 sps:$4 sm:$0xff]   ;;  %v7166_v52 = vld [vmem:[#allocation6 + $0xc4] ss:$16 sps:$4 sm:$0xff]  }
 0x1ff   : > { %3313 = vmatpush1.bf16.msra.mxu0 %v6399_v31  ;;  %v740_v31 = vld [vmem:[#allocation2 + $0x6b8] sm:$0xff] }
 0x200   : > { %3354 = vmatpush1.bf16.msra.mxu1 %v6527_v33  ;;  %3314 = vmatprep.subr.bf16.mxu0 %v6392_v34  ;;  %v864_v33 = vld [vmem:[#allocation2 + $0xa98] sm:$0xff]  ;;  %v6464_v37 = vcombine.high %v736_v30, %v740_v31 }
 0x201   : > { %3355 = vmatprep.subr.bf16.mxu1 %v6520_v35  ;;  %v868_v34 = vld [vmem:[#allocation2 + $0xab8] sm:$0xff]  ;;  %v6471_v35 = vcombine.low %v744_v22, %v748_v23 }
 0x202   : > { %v6592_v38 = vcombine.high %v864_v33, %v868_v34  ;;  %v6591_v43 = vcombine.low %v864_v33, %v868_v34  ;;  %v7167_v28 = vld [vmem:[#allocation6 + $0x2c0] ss:$16 sps:$4 sm:$0xff]   ;;  %v7172_v13 = vld [vmem:[#allocation6 + $0xa4] ss:$16 sps:$4 sm:$0xff]  }
 0x203   : > { %3315 = vmatpush1.bf16.msra.mxu0 %v6391_v40  ;;  %v732_v40 = vld [vmem:[#allocation2 + $0x678] sm:$0xff] }
 0x204   : > { %3356 = vmatpush1.bf16.msra.mxu1 %v6519_v41  ;;  %3316 = vmatprep.subr.bf16.mxu0 %v6384_v42  ;;  %v856_v41 = vld [vmem:[#allocation2 + $0xa58] sm:$0xff]  ;;  %v6456_v44 = vcombine.high %v728_v39, %v732_v40 }
 0x205   : > { %3357 = vmatprep.subr.bf16.mxu1 %v6512_v58  ;;  %v860_v42 = vld [vmem:[#allocation2 + $0xa78] sm:$0xff]  ;;  %v6463_v58 = vcombine.low %v736_v30, %v740_v31 }
 0x206   : > { %v6584_v45 = vcombine.high %v856_v41, %v860_v42  ;;  %v6583_v62 = vcombine.low %v856_v41, %v860_v42  ;;  %v7170_v22 = vld [vmem:[#allocation6 + $0xa0] ss:$16 sps:$4 sm:$0xff]   ;;  %v7178_v24 = vld [vmem:[#allocation6 + $0x84] ss:$16 sps:$4 sm:$0xff]  }
 0x207   : > { %3317 = vmatpush1.bf16.msra.mxu0 %v6383_v47  ;;  %v724_v47 = vld [vmem:[#allocation2 + $0x638] sm:$0xff] }
 0x208   : > { %3358 = vmatpush1.bf16.msra.mxu1 %v6511_v50  ;;  %3318 = vmatprep.subr.bf16.mxu0 %v6504_v56  ;;  %v848_v50 = vld [vmem:[#allocation2 + $0xa18] sm:$0xff]  ;;  %v6448_v63 = vcombine.high %v720_v46, %v724_v47 }
 0x209   : > { %3359 = vmatprep.subr.bf16.mxu1 %v6632_v57  ;;  %v852_v56 = vld [vmem:[#allocation2 + $0xa38] sm:$0xff]  ;;  %v6455_v57 = vcombine.low %v728_v39, %v732_v40 }
 0x20a   : > { %v6576_v0 = vcombine.high %v848_v50, %v852_v56  ;;  %v7173_v23 = vld [vmem:[#allocation6 + $0x2a0] ss:$16 sps:$4 sm:$0xff]   ;;  %v7184_v31 = vld [vmem:[#allocation6 + $0x64] ss:$16 sps:$4 sm:$0xff]  }
 0x20b   : > { %3319 = vmatpush2.bf16.msra.mxu0 %v6503_v1  ;;  %v925_v1 = vsub.s32 3, %v8232_v19  ;;  %v7179_v30 = vld [vmem:[#allocation6 + $0x280] ss:$16 sps:$4 sm:$0xff]   ;;  %v7187_v33 = vld [vmem:[#allocation6 + $0x264] ss:$16 sps:$4 sm:$0xff]  }
 0x20c   : > { %3360 = vmatpush2.bf16.msra.mxu1 %v6631_v2  ;;  %3320 = vmatprep.subr.bf16.mxu0 %v6496_v16  ;;  %v6447_v2 = vcombine.low %v720_v46, %v724_v47  ;;  %v6575_v16 = vcombine.low %v848_v50, %v852_v56  ;;  %v7182_v34 = vld [vmem:[#allocation6 + $0x60] ss:$16 sps:$4 sm:$0xff]   ;;  %v7196_v40 = vld [vmem:[#allocation6 + $0x24] ss:$16 sps:$4 sm:$0xff]  }
 0x20d   : > { %3361 = vmatprep.subr.bf16.mxu1 %v6624_v3  ;;  %v7160_v3 = vld [vmem:[#allocation6 + $0xe4] ss:$16 sps:$4 sm:$0xff]   ;;  %v926_v6 = vrot.slane %v8237_v55, %v925_v1  ;;  %v7164_v55 = vld [vmem:[#allocation6 + $0xc0] ss:$16 sps:$4 sm:$0xff]  }
 0x20e   : > { %v7191_v39 = vld [vmem:[#allocation6 + $0x240] ss:$16 sps:$4 sm:$0xff]   ;;  %v7199_v41 = vld [vmem:[#allocation6 + $0x224] ss:$16 sps:$4 sm:$0xff]  }
 0x20f   : > { %3321 = vmatpush2.bf16.msra.mxu0 %v6495_v8  ;;  %v7169_v8 = vld [vmem:[#allocation6 + $0x2c4] ss:$16 sps:$4 sm:$0xff]   ;;  %v7194_v42 = vld [vmem:[#allocation6 + $0x20] ss:$16 sps:$4 sm:$0xff]  }
 0x210   : > { %3362 = vmatpush2.bf16.msra.mxu1 %v6623_v9  ;;  %3322 = vmatprep.subr.bf16.mxu0 %v6488_v10  ;;  %v8273_v9 = vpack.c.bf16 %v3385_v5, %v3385_v5  ;;  %v7203_v46 = vld [vmem:[#allocation6 + $0x200] ss:$16 sps:$4 sm:$0xff]   ;;  %v7208_v47 = vld [vmem:[#allocation6 + $0x1e4] ss:$16 sps:$4 sm:$0xff]  }
 0x211   : > { %3363 = vmatprep.subr.bf16.mxu1 %v6616_v11  ;;  %v3052_v11 = vadd.f32 %v8263_v61, %v926_v6  ;;  %v7211_v50 = vld [vmem:[#allocation6 + $0x3e4] ss:$16 sps:$4 sm:$0xff]   ;;  %v7206_v56 = vld [vmem:[#allocation6 + $0x1e0] ss:$16 sps:$4 sm:$0xff]  }
 0x212   : > { %v7215_v21 = vld [vmem:[#allocation6 + $0x3c0] ss:$16 sps:$4 sm:$0xff]   ;;  %v7226_v5 = vld [vmem:[#allocation6 + $0x184] ss:$16 sps:$4 sm:$0xff]  }
 0x213   : > { %3323 = vmatpush2.bf16.msra.mxu0 %v6487_v14  ;;  %v7229_v6 = vld [vmem:[#allocation6 + $0x384] ss:$16 sps:$4 sm:$0xff]  }
 0x214   : > { %3364 = vmatpush2.bf16.msra.mxu1 %v6615_v15  ;;  %3324 = vmatprep.subr.bf16.mxu0 %v6480_v17  ;;  %v7175_v17 = vld [vmem:[#allocation6 + $0x2a4] ss:$16 sps:$4 sm:$0xff]  }
 0x215   : > { %3365 = vmatprep.subr.bf16.mxu1 %v6608_v18 }
 0x217   : > { %3325 = vmatpush2.bf16.msra.mxu0 %v6479_v26 }
 0x218   : > { %3366 = vmatpush2.bf16.msra.mxu1 %v6607_v53  ;;  %3326 = vmatprep.subr.bf16.mxu0 %v6472_v27  ;;  %v7181_v53 = vld [vmem:[#allocation6 + $0x284] ss:$16 sps:$4 sm:$0xff]  }
 0x219   : > { %3367 = vmatprep.subr.bf16.mxu1 %v6600_v54  ;;  %v7176_v54 = vld [vmem:[#allocation6 + $0x80] ss:$16 sps:$4 sm:$0xff]  }
 0x21b   : > { %3327 = vmatpush2.bf16.msra.mxu0 %v6471_v35  ;;  %v7185_v35 = vld [vmem:[#allocation6 + $0x260] ss:$16 sps:$4 sm:$0xff]  }
 0x21c   : > { %3368 = vmatpush2.bf16.msra.mxu1 %v6599_v36  ;;  %3328 = vmatprep.subr.bf16.mxu0 %v6464_v37  ;;  %v7190_v36 = vld [vmem:[#allocation6 + $0x44] ss:$16 sps:$4 sm:$0xff]  }
 0x21d   : > { %3369 = vmatprep.subr.bf16.mxu1 %v6592_v38  ;;  %v7193_v37 = vld [vmem:[#allocation6 + $0x244] ss:$16 sps:$4 sm:$0xff]   ;;  %v7188_v38 = vld [vmem:[#allocation6 + $0x40] ss:$16 sps:$4 sm:$0xff]  }
 0x21f   : > { %3329 = vmatpush2.bf16.msra.mxu0 %v6463_v58  ;;  %v7197_v58 = vld [vmem:[#allocation6 + $0x220] ss:$16 sps:$4 sm:$0xff]  }
 0x220   : > { %3370 = vmatpush2.bf16.msra.mxu1 %v6591_v43  ;;  %3330 = vmatprep.subr.bf16.mxu0 %v6456_v44  ;;  %v7202_v43 = vld [vmem:[#allocation6 + $0x4] ss:$16 sps:$4 sm:$0xff]  }
 0x221   : > { %3371 = vmatprep.subr.bf16.mxu1 %v6584_v45  ;;  %v7205_v44 = vld [vmem:[#allocation6 + $0x204] ss:$16 sps:$4 sm:$0xff]   ;;  %v7200_v45 = vld [vmem:[#allocation6] ss:$16 sps:$4 sm:$0xff]  }
 0x223   : > { %3331 = vmatpush2.bf16.msra.mxu0 %v6455_v57  ;;  %v7209_v57 = vld [vmem:[#allocation6 + $0x3e0] ss:$16 sps:$4 sm:$0xff]  }
 0x224   : > { %3372 = vmatpush2.bf16.msra.mxu1 %v6583_v62  ;;  %3332 = vmatprep.subr.bf16.mxu0 %v6448_v63  ;;  %v7214_v62 = vld [vmem:[#allocation6 + $0x1c4] ss:$16 sps:$4 sm:$0xff]  }
 0x225   : > { %3373 = vmatprep.subr.bf16.mxu1 %v6576_v0  ;;  %v7217_v63 = vld [vmem:[#allocation6 + $0x3c4] ss:$16 sps:$4 sm:$0xff]   ;;  %v7212_v0 = vld [vmem:[#allocation6 + $0x1c0] ss:$16 sps:$4 sm:$0xff]  }
 0x227   : > { %3333 = vmatpush2.bf16.msra.mxu0 %v6447_v2  ;;  %v7220_v2 = vld [vmem:[#allocation6 + $0x1a4] ss:$16 sps:$4 sm:$0xff]  }
 0x228   : > { %3374 = vmatpush2.bf16.msra.mxu1 %v6575_v16  ;;  %4958 = vmatprep.subr.bf16.mxu0 %v7160_v3  ;;  %v7223_v16 = vld [vmem:[#allocation6 + $0x3a4] ss:$16 sps:$4 sm:$0xff]   ;;  %v7218_v3 = vld [vmem:[#allocation6 + $0x1a0] ss:$16 sps:$4 sm:$0xff]  }
 0x229   : > { %4999 = vmatprep.subr.bf16.mxu1 %v7163_v4  ;;  %v7221_v4 = vld [vmem:[#allocation6 + $0x3a0] ss:$16 sps:$4 sm:$0xff]  }
 0x22a   : > { %v8275_v10 = vpop.f32.mrf.mxu0  ;;  %3335 = vmatmul.mubr.bf16.vlgmr.msra.gmra.mxu0 %v8210_v20 }
 0x22b   : > { %v8279_v59 = vpop.f32.mrf.mxu1  ;;  %3376 = vmatmul.mubr.bf16.vlgmr.msra.gmra.mxu1 %v8222_v32  ;;  %4959 = vmatpush1.bf16.msra.mxu0 %v7158_v7  ;;  %v921_v7 = vsub.s32 2, %v8232_v19 }
 0x22c   : > { %4990 = vmatprep.mubr.bf16.mxu0 %v8273_v9  ;;  %5000 = vmatpush1.bf16.msra.mxu1 %v7161_v29  ;;  %v3092_v12 = vpop.f32.mrf.mxu0  ;;  %v7224_v29 = vld [vmem:[#allocation6 + $0x180] ss:$16 sps:$4 sm:$0xff]  }
 0x22d   : > { %v3093_v14 = vadd.f32 %v3092_v12, %v3052_v11  ;;  %v3133_v15 = vpop.f32.mrf.mxu1  ;;  %4960 = vmatprep.subr.bf16.mxu0 %v7166_v52  ;;  %5001 = vmatprep.subr.bf16.mxu1 %v7169_v8  ;;  %v7227_v52 = vld [vmem:[#allocation6 + $0x380] ss:$16 sps:$4 sm:$0xff]   ;;  %v7232_v8 = vld [vmem:[#allocation6 + $0x164] ss:$16 sps:$4 sm:$0xff]  }
 0x22e   : > { %v3094_v20 = vpop.f32.mrf.mxu0  ;;  %v7235_v11 = vld [vmem:[#allocation6 + $0x364] ss:$16 sps:$4 sm:$0xff]  }
 0x22f   : > { %v3134_v18 = vadd.f32 %v3133_v15, %v3093_v14  ;;  %v3135_v61 = vpop.f32.mrf.mxu1  ;;  %4961 = vmatpush1.bf16.msra.mxu0 %v7164_v55  ;;  %v8287_v55 = vld [vmem:[#allocation4] sm:$0xff]  ;;  %v7238_v14 = vld [vmem:[#allocation6 + $0x144] ss:$16 sps:$4 sm:$0xff]   ;;  %v7236_v20 = vld [vmem:[#allocation6 + $0x140] ss:$16 sps:$4 sm:$0xff]  }
 0x230   : > { %5002 = vmatpush1.bf16.msra.mxu1 %v7167_v28  ;;  %v3095_v32 = vpop.f32.mrf.mxu0  ;;  %4962 = vmatprep.subr.bf16.mxu0 %v7172_v13  ;;  %v922_v12 = vrot.slane %v8287_v55, %v921_v7  ;;  %v7230_v28 = vld [vmem:[#allocation6 + $0x160] ss:$16 sps:$4 sm:$0xff]   ;;  %v7241_v15 = vld [vmem:[#allocation6 + $0x344] ss:$16 sps:$4 sm:$0xff]  }
 0x231   : > { %v3387_v25 = vmax.f32 %v3134_v18, 0.0  ;;  %v3136_v26 = vpop.f32.mrf.mxu1  ;;  %5003 = vmatprep.subr.bf16.mxu1 %v7175_v17  ;;  %v7233_v13 = vld [vmem:[#allocation6 + $0x360] ss:$16 sps:$4 sm:$0xff]   ;;  %v7244_v61 = vld [vmem:[#allocation6 + $0x124] ss:$16 sps:$4 sm:$0xff]  }
 0x232   : > { %v3050_v17 = vadd.f32 %v8258_v49, %v922_v12  ;;  %v7239_v18 = vld [vmem:[#allocation6 + $0x340] ss:$16 sps:$4 sm:$0xff]   ;;  %v7247_v32 = vld [vmem:[#allocation6 + $0x324] ss:$16 sps:$4 sm:$0xff]  }
 0x233   : > { %v8283_v27 = vpack.c.bf16 %v3387_v25, %v3387_v25  ;;  %4963 = vmatpush1.bf16.msra.mxu0 %v7170_v22  ;;  %v7250_v25 = vld [vmem:[#allocation6 + $0x104] ss:$16 sps:$4 sm:$0xff]   ;;  %v7272_v12 = vld [vmem:[#allocation6 + $0x420] ss:$16 sps:$4 sm:$0xff]  }
 0x234   : > { %5004 = vmatpush1.bf16.msra.mxu1 %v7173_v23  ;;  %4964 = vmatprep.subr.bf16.mxu0 %v7178_v24  ;;  %v3091_v22 = vadd.f32 %v8275_v10, %v3050_v17  ;;  %v7242_v23 = vld [vmem:[#allocation6 + $0x120] ss:$16 sps:$4 sm:$0xff]   ;;  %v7253_v49 = vld [vmem:[#allocation6 + $0x304] ss:$16 sps:$4 sm:$0xff]  }
 0x235   : > { %5031 = vmatprep.mubr.bf16.mxu1 %v8283_v27  ;;  %5005 = vmatprep.subr.bf16.mxu1 %v7181_v53  ;;  %v7245_v24 = vld [vmem:[#allocation6 + $0x320] ss:$16 sps:$4 sm:$0xff]   ;;  %v7256_v10 = vld [vmem:[#allocation6 + $0x4e4] ss:$16 sps:$4 sm:$0xff]  }
 0x236   : > { %v3132_v26 = vadd.f32 %v8279_v59, %v3091_v22  ;;  %v7248_v53 = vld [vmem:[#allocation6 + $0x100] ss:$16 sps:$4 sm:$0xff]   ;;  %v7259_v59 = vld [vmem:[#allocation6 + $0x4c4] ss:$16 sps:$4 sm:$0xff]  }
 0x237   : > { %4965 = vmatpush1.bf16.msra.mxu0 %v7176_v54  ;;  %v3384_v54 = vmax.f32 %v8256_v48, 0.0  ;;  %v7280_v17 = vld [vmem:[#allocation6 + $0x5e4] ss:$16 sps:$4 sm:$0xff]  }
 0x238   : > { %5006 = vmatpush1.bf16.msra.mxu1 %v7179_v30  ;;  %4966 = vmatprep.subr.bf16.mxu0 %v7184_v31  ;;  %v7251_v30 = vld [vmem:[#allocation6 + $0x300] ss:$16 sps:$4 sm:$0xff]   ;;  %v3386_v31 = vmax.f32 %v3132_v26, 0.0  ;;  %v7283_v22 = vld [vmem:[#allocation6 + $0x5c4] ss:$16 sps:$4 sm:$0xff]  }
 0x239   : > { %5007 = vmatprep.subr.bf16.mxu1 %v7187_v33  ;;  %v7307_v33 = vld [vmem:[#allocation6 + $0x6e4] ss:$16 sps:$4 sm:$0xff]   ;;  %v7359_v26 = vld [vmem:[#allocation6 + $0x7c0] ss:$16 sps:$4 sm:$0xff]  }
 0x23b   : > { %4967 = vmatpush1.bf16.msra.mxu0 %v7182_v34  ;;  %v7254_v34 = vld [vmem:[#allocation6 + $0x4e0] ss:$16 sps:$4 sm:$0xff]  }
 0x23c   : > { %5008 = vmatpush1.bf16.msra.mxu1 %v7185_v35  ;;  %4968 = vmatprep.subr.bf16.mxu0 %v7190_v36  ;;  %v8296_v35 = vpack.c.bf16 %v3384_v54, %v3384_v54  ;;  %v7305_v36 = vld [vmem:[#allocation6 + $0x6e0] ss:$16 sps:$4 sm:$0xff]   ;;  %v7289_v54 = vld [vmem:[#allocation6 + $0x584] ss:$16 sps:$4 sm:$0xff]  }
 0x23d   : > { %5009 = vmatprep.subr.bf16.mxu1 %v7193_v37  ;;  %v8298_v37 = vpack.c.bf16 %v3386_v31, %v3386_v31  ;;  %v7287_v31 = vld [vmem:[#allocation6 + $0x580] ss:$16 sps:$4 sm:$0xff]  }
 0x23f   : > { %4969 = vmatpush1.bf16.msra.mxu0 %v7188_v38  ;;  %v7313_v38 = vld [vmem:[#allocation6 + $0x6c4] ss:$16 sps:$4 sm:$0xff]  }
 0x240   : > { %5010 = vmatpush1.bf16.msra.mxu1 %v7191_v39  ;;  %4970 = vmatprep.subr.bf16.mxu0 %v7196_v40  ;;  %v7257_v40 = vld [vmem:[#allocation6 + $0x4c0] ss:$16 sps:$4 sm:$0xff]  }
 0x241   : > { %5011 = vmatprep.subr.bf16.mxu1 %v7199_v41 }
 0x243   : > { %4971 = vmatpush1.bf16.msra.mxu0 %v7194_v42  ;;  %v7262_v42 = vld [vmem:[#allocation6 + $0x4a4] ss:$16 sps:$4 sm:$0xff]  }
 0x244   : > { %5012 = vmatpush1.bf16.msra.mxu1 %v7197_v58  ;;  %4972 = vmatprep.subr.bf16.mxu0 %v7202_v43  ;;  %v7311_v58 = vld [vmem:[#allocation6 + $0x6c0] ss:$16 sps:$4 sm:$0xff]  }
 0x245   : > { %5013 = vmatprep.subr.bf16.mxu1 %v7205_v44  ;;  %v7319_v44 = vld [vmem:[#allocation6 + $0x6a4] ss:$16 sps:$4 sm:$0xff]  }
 0x247   : > { %4973 = vmatpush1.bf16.msra.mxu0 %v7200_v45 }
 0x248   : > { %5014 = vmatpush1.bf16.msra.mxu1 %v7203_v46  ;;  %4974 = vmatprep.subr.bf16.mxu0 %v7208_v47  ;;  %v7260_v47 = vld [vmem:[#allocation6 + $0x4a0] ss:$16 sps:$4 sm:$0xff]  }
 0x249   : > { %5015 = vmatprep.subr.bf16.mxu1 %v7211_v50 }
 0x24b   : > { %4975 = vmatpush2.bf16.msra.mxu0 %v7206_v56  ;;  %v7265_v56 = vld [vmem:[#allocation6 + $0x484] ss:$16 sps:$4 sm:$0xff]  }
 0x24c   : > { %5016 = vmatpush2.bf16.msra.mxu1 %v7209_v57  ;;  %4976 = vmatprep.subr.bf16.mxu0 %v7214_v62  ;;  %v7317_v57 = vld [vmem:[#allocation6 + $0x6a0] ss:$16 sps:$4 sm:$0xff]  }
 0x24d   : > { %5017 = vmatprep.subr.bf16.mxu1 %v7217_v63  ;;  %v7325_v63 = vld [vmem:[#allocation6 + $0x684] ss:$16 sps:$4 sm:$0xff]  }
 0x24f   : > { %4977 = vmatpush2.bf16.msra.mxu0 %v7212_v0  ;;  %v7263_v0 = vld [vmem:[#allocation6 + $0x480] ss:$16 sps:$4 sm:$0xff]  }
 0x250   : > { %5018 = vmatpush2.bf16.msra.mxu1 %v7215_v21  ;;  %4978 = vmatprep.subr.bf16.mxu0 %v7220_v2  ;;  %v7268_v21 = vld [vmem:[#allocation6 + $0x464] ss:$16 sps:$4 sm:$0xff]   ;;  %v7323_v2 = vld [vmem:[#allocation6 + $0x680] ss:$16 sps:$4 sm:$0xff]  }
 0x251   : > { %5019 = vmatprep.subr.bf16.mxu1 %v7223_v16  ;;  %v7331_v16 = vld [vmem:[#allocation6 + $0x664] ss:$16 sps:$4 sm:$0xff]  }
 0x253   : > { %4979 = vmatpush2.bf16.msra.mxu0 %v7218_v3  ;;  %v7266_v3 = vld [vmem:[#allocation6 + $0x460] ss:$16 sps:$4 sm:$0xff]  }
 0x254   : > { %5020 = vmatpush2.bf16.msra.mxu1 %v7221_v4  ;;  %4980 = vmatprep.subr.bf16.mxu0 %v7226_v5  ;;  %v7271_v4 = vld [vmem:[#allocation6 + $0x444] ss:$16 sps:$4 sm:$0xff]   ;;  %v7329_v5 = vld [vmem:[#allocation6 + $0x660] ss:$16 sps:$4 sm:$0xff]  }
 0x255   : > { %5021 = vmatprep.subr.bf16.mxu1 %v7229_v6  ;;  %v7337_v6 = vld [vmem:[#allocation6 + $0x644] ss:$16 sps:$4 sm:$0xff]  }
 0x257   : > { %4981 = vmatpush2.bf16.msra.mxu0 %v7224_v29  ;;  %v7269_v29 = vld [vmem:[#allocation6 + $0x440] ss:$16 sps:$4 sm:$0xff]  }
 0x258   : > { %5022 = vmatpush2.bf16.msra.mxu1 %v7227_v52  ;;  %4982 = vmatprep.subr.bf16.mxu0 %v7232_v8  ;;  %v7274_v52 = vld [vmem:[#allocation6 + $0x424] ss:$16 sps:$4 sm:$0xff]   ;;  %v7335_v8 = vld [vmem:[#allocation6 + $0x640] ss:$16 sps:$4 sm:$0xff]  }
 0x259   : > { %5023 = vmatprep.subr.bf16.mxu1 %v7235_v11  ;;  %v7343_v11 = vld [vmem:[#allocation6 + $0x624] ss:$16 sps:$4 sm:$0xff]  }
 0x25b   : > { %4983 = vmatpush2.bf16.msra.mxu0 %v7230_v28  ;;  %v7277_v28 = vld [vmem:[#allocation6 + $0x404] ss:$16 sps:$4 sm:$0xff]  }
 0x25c   : > { %5024 = vmatpush2.bf16.msra.mxu1 %v7233_v13  ;;  %4984 = vmatprep.subr.bf16.mxu0 %v7238_v14  ;;  %v7341_v13 = vld [vmem:[#allocation6 + $0x620] ss:$16 sps:$4 sm:$0xff]   ;;  %v7349_v14 = vld [vmem:[#allocation6 + $0x604] ss:$16 sps:$4 sm:$0xff]  }
 0x25d   : > { %5025 = vmatprep.subr.bf16.mxu1 %v7241_v15  ;;  %v7275_v15 = vld [vmem:[#allocation6 + $0x400] ss:$16 sps:$4 sm:$0xff]  }
 0x25f   : > { %4985 = vmatpush2.bf16.msra.mxu0 %v7236_v20  ;;  %v7347_v20 = vld [vmem:[#allocation6 + $0x600] ss:$16 sps:$4 sm:$0xff]  }
 0x260   : > { %5026 = vmatpush2.bf16.msra.mxu1 %v7239_v18  ;;  %4986 = vmatprep.subr.bf16.mxu0 %v7244_v61  ;;  %v7355_v18 = vld [vmem:[#allocation6 + $0x7e4] ss:$16 sps:$4 sm:$0xff]   ;;  %v7278_v61 = vld [vmem:[#allocation6 + $0x5e0] ss:$16 sps:$4 sm:$0xff]  }
 0x261   : > { %5027 = vmatprep.subr.bf16.mxu1 %v7247_v32  ;;  %v7353_v32 = vld [vmem:[#allocation6 + $0x7e0] ss:$16 sps:$4 sm:$0xff]  }
 0x263   : > { %4987 = vmatpush2.bf16.msra.mxu0 %v7242_v23  ;;  %v7361_v23 = vld [vmem:[#allocation6 + $0x7c4] ss:$16 sps:$4 sm:$0xff]  }
 0x264   : > { %5028 = vmatpush2.bf16.msra.mxu1 %v7245_v24  ;;  %4988 = vmatprep.subr.bf16.mxu0 %v7250_v25  ;;  %v7281_v24 = vld [vmem:[#allocation6 + $0x5c0] ss:$16 sps:$4 sm:$0xff]   ;;  %v7286_v25 = vld [vmem:[#allocation6 + $0x5a4] ss:$16 sps:$4 sm:$0xff]  }
 0x265   : > { %5029 = vmatprep.subr.bf16.mxu1 %v7253_v49  ;;  %v7367_v49 = vld [vmem:[#allocation6 + $0x7a4] ss:$16 sps:$4 sm:$0xff]  }
 0x267   : > { %4989 = vmatpush2.bf16.msra.mxu0 %v7248_v53  ;;  %v7284_v53 = vld [vmem:[#allocation6 + $0x5a0] ss:$16 sps:$4 sm:$0xff]  }
 0x268   : > { %5030 = vmatpush2.bf16.msra.mxu1 %v7251_v30  ;;  %5040 = vmatprep.subr.bf16.mxu0 %v7256_v10  ;;  %v7365_v30 = vld [vmem:[#allocation6 + $0x7a0] ss:$16 sps:$4 sm:$0xff]   ;;  %v7373_v10 = vld [vmem:[#allocation6 + $0x784] ss:$16 sps:$4 sm:$0xff]  }
 0x269   : > { %5081 = vmatprep.subr.bf16.mxu1 %v7307_v33  ;;  %v7292_v33 = vld [vmem:[#allocation6 + $0x564] ss:$16 sps:$4 sm:$0xff]  }
 0x26a   : > { %v8300_v48 = vpop.f32.mrf.mxu0  ;;  %4991 = vmatmul.mubr.bf16.vlgmr.msra.gmra.mxu0 %v8296_v35 }
 0x26b   : > { %v8303_v39 = vpop.f32.mrf.mxu1  ;;  %5032 = vmatmul.mubr.bf16.vlgmr.msra.gmra.mxu1 %v8298_v37  ;;  %5041 = vmatpush1.bf16.msra.mxu0 %v7254_v34  ;;  %v7371_v34 = vld [vmem:[#allocation6 + $0x780] ss:$16 sps:$4 sm:$0xff]  }
 0x26c   : > { %v8306_v41 = vpop.f32.mrf.mxu0  ;;  %5042 = vmatprep.subr.bf16.mxu0 %v7259_v59  ;;  %5082 = vmatpush1.bf16.msra.mxu1 %v7305_v36  ;;  %v7379_v59 = vld [vmem:[#allocation6 + $0x764] ss:$16 sps:$4 sm:$0xff]   ;;  %v7290_v36 = vld [vmem:[#allocation6 + $0x560] ss:$16 sps:$4 sm:$0xff]  }
 0x26d   : > { %v8308_v43 = vpop.f32.mrf.mxu1  ;;  %5083 = vmatprep.subr.bf16.mxu1 %v7313_v38  ;;  %v7295_v38 = vld [vmem:[#allocation6 + $0x544] ss:$16 sps:$4 sm:$0xff]  }
 0x26e   : > { %v3176_v45 = vpop.f32.mrf.mxu0 }
 0x26f   : > { %v3217_v46 = vpop.f32.mrf.mxu1  ;;  %5043 = vmatpush1.bf16.msra.mxu0 %v7257_v40  ;;  %v7377_v40 = vld [vmem:[#allocation6 + $0x760] ss:$16 sps:$4 sm:$0xff]  }
 0x270   : > { %v3177_v50 = vpop.f32.mrf.mxu0  ;;  %5044 = vmatprep.subr.bf16.mxu0 %v7262_v42  ;;  %5084 = vmatpush1.bf16.msra.mxu1 %v7311_v58  ;;  %v7385_v42 = vld [vmem:[#allocation6 + $0x744] ss:$16 sps:$4 sm:$0xff]   ;;  %v7293_v58 = vld [vmem:[#allocation6 + $0x540] ss:$16 sps:$4 sm:$0xff]   ;;  %v929_v46 = vsub.s32 4, %v8232_v19 }
 0x271   : > { %v3218_v62 = vpop.f32.mrf.mxu1  ;;  %5085 = vmatprep.subr.bf16.mxu1 %v7319_v44  ;;  %v7298_v44 = vld [vmem:[#allocation6 + $0x524] ss:$16 sps:$4 sm:$0xff]   ;;  %v7383_v45 = vld [vmem:[#allocation6 + $0x740] ss:$16 sps:$4 sm:$0xff]   ;;  %v933_v50 = vsub.s32 5, %v8232_v19 }
 0x272   : > { %v7389_v62 = vld [vmem:[#allocation6 + $0x720] ss:$16 sps:$4 sm:$0xff]  }
 0x273   : > { %5045 = vmatpush1.bf16.msra.mxu0 %v7260_v47  ;;  %v7391_v47 = vld [vmem:[#allocation6 + $0x724] ss:$16 sps:$4 sm:$0xff]  }
 0x274   : > { %5046 = vmatprep.subr.bf16.mxu0 %v7265_v56  ;;  %5086 = vmatpush1.bf16.msra.mxu1 %v7317_v57  ;;  %v7296_v56 = vld [vmem:[#allocation6 + $0x520] ss:$16 sps:$4 sm:$0xff]   ;;  %v7301_v57 = vld [vmem:[#allocation6 + $0x504] ss:$16 sps:$4 sm:$0xff]  }
 0x275   : > { %5087 = vmatprep.subr.bf16.mxu1 %v7325_v63  ;;  %v930_v63 = vrot.slane %v8287_v55, %v929_v46  ;;  %v937_v46 = vsub.s32 6, %v8232_v19 }
 0x277   : > { %5047 = vmatpush1.bf16.msra.mxu0 %v7263_v0  ;;  %v7397_v0 = vld [vmem:[#allocation6 + $0x704] ss:$16 sps:$4 sm:$0xff]  }
 0x278   : > { %5048 = vmatprep.subr.bf16.mxu0 %v7268_v21  ;;  %5088 = vmatpush1.bf16.msra.mxu1 %v7323_v2  ;;  %v934_v21 = vrot.slane %v8287_v55, %v933_v50  ;;  %v7299_v2 = vld [vmem:[#allocation6 + $0x500] ss:$16 sps:$4 sm:$0xff]   ;;  %v7382_v50 = vld [vmem:[#allocation6 + $0x14c] ss:$16 sps:$4 sm:$0xff]  }
 0x279   : > { %5089 = vmatprep.subr.bf16.mxu1 %v7331_v16  ;;  %v7304_v16 = vld [vmem:[#allocation6 + $0xec] ss:$16 sps:$4 sm:$0xff]  }
 0x27b   : > { %5049 = vmatpush1.bf16.msra.mxu0 %v7266_v3  ;;  %v7395_v3 = vld [vmem:[#allocation6 + $0x700] ss:$16 sps:$4 sm:$0xff]  }
 0x27c   : > { %5050 = vmatprep.subr.bf16.mxu0 %v7271_v4  ;;  %5090 = vmatpush1.bf16.msra.mxu1 %v7329_v5  ;;  %v3173_v4 = vadd.f32 %v8300_v48, %v930_v63  ;;  %v7403_v5 = vld [vmem:[#allocation6 + $0x2ec] ss:$16 sps:$4 sm:$0xff]  }
 0x27d   : > { %5091 = vmatprep.subr.bf16.mxu1 %v7337_v6  ;;  %v3175_v6 = vadd.f32 %v8306_v41, %v934_v21  ;;  %v7388_v63 = vld [vmem:[#allocation6 + $0x12c] ss:$16 sps:$4 sm:$0xff]  }
 0x27f   : > { %5051 = vmatpush1.bf16.msra.mxu0 %v7269_v29  ;;  %v3214_v29 = vadd.f32 %v8303_v39, %v3173_v4  ;;  %v7302_v39 = vld [vmem:[#allocation6 + $0xe8] ss:$16 sps:$4 sm:$0xff]  }
 0x280   : > { %5052 = vmatprep.subr.bf16.mxu0 %v7274_v52  ;;  %5092 = vmatpush1.bf16.msra.mxu1 %v7335_v8  ;;  %v3216_v8 = vadd.f32 %v8308_v43, %v3175_v6  ;;  %v7308_v43 = vld [vmem:[#allocation6 + $0xc8] ss:$16 sps:$4 sm:$0xff]  }
 0x281   : > { %5093 = vmatprep.subr.bf16.mxu1 %v7343_v11 }
 0x283   : > { %5053 = vmatpush1.bf16.msra.mxu0 %v7272_v12 }
 0x284   : > { %5054 = vmatprep.subr.bf16.mxu0 %v7277_v28  ;;  %5094 = vmatpush1.bf16.msra.mxu1 %v7341_v13 }
 0x285   : > { %5095 = vmatprep.subr.bf16.mxu1 %v7349_v14 }
 0x287   : > { %5055 = vmatpush1.bf16.msra.mxu0 %v7275_v15 }
 0x288   : > { %5056 = vmatprep.subr.bf16.mxu0 %v7280_v17  ;;  %5096 = vmatpush1.bf16.msra.mxu1 %v7347_v20 }
 0x289   : > { %5097 = vmatprep.subr.bf16.mxu1 %v7355_v18 }
 0x28b   : > { %5057 = vmatpush2.bf16.msra.mxu0 %v7278_v61 }
 0x28c   : > { %5058 = vmatprep.subr.bf16.mxu0 %v7283_v22  ;;  %5098 = vmatpush2.bf16.msra.mxu1 %v7353_v32  ;;  %v7310_v32 = vld [vmem:[#allocation6 + $0xcc] ss:$16 sps:$4 sm:$0xff]  }
 0x28d   : > { %5099 = vmatprep.subr.bf16.mxu1 %v7361_v23  ;;  %v7316_v23 = vld [vmem:[#allocation6 + $0xac] ss:$16 sps:$4 sm:$0xff]  }
 0x28f   : > { %5059 = vmatpush2.bf16.msra.mxu0 %v7281_v24  ;;  %v7314_v24 = vld [vmem:[#allocation6 + $0xa8] ss:$16 sps:$4 sm:$0xff]  }
 0x290   : > { %5060 = vmatprep.subr.bf16.mxu0 %v7286_v25  ;;  %5100 = vmatpush2.bf16.msra.mxu1 %v7359_v26  ;;  %v7322_v25 = vld [vmem:[#allocation6 + $0x8c] ss:$16 sps:$4 sm:$0xff]   ;;  %v7320_v26 = vld [vmem:[#allocation6 + $0x88] ss:$16 sps:$4 sm:$0xff]  }
 0x291   : > { %5101 = vmatprep.subr.bf16.mxu1 %v7367_v49  ;;  %v7328_v49 = vld [vmem:[#allocation6 + $0x6c] ss:$16 sps:$4 sm:$0xff]  }
 0x293   : > { %5061 = vmatpush2.bf16.msra.mxu0 %v7284_v53  ;;  %v7326_v53 = vld [vmem:[#allocation6 + $0x68] ss:$16 sps:$4 sm:$0xff]  }
 0x294   : > { %5062 = vmatprep.subr.bf16.mxu0 %v7289_v54  ;;  %5102 = vmatpush2.bf16.msra.mxu1 %v7365_v30  ;;  %v7334_v54 = vld [vmem:[#allocation6 + $0x4c] ss:$16 sps:$4 sm:$0xff]   ;;  %v7332_v30 = vld [vmem:[#allocation6 + $0x48] ss:$16 sps:$4 sm:$0xff]  }
 0x295   : > { %5103 = vmatprep.subr.bf16.mxu1 %v7373_v10  ;;  %v7340_v10 = vld [vmem:[#allocation6 + $0x2c] ss:$16 sps:$4 sm:$0xff]  }
 0x297   : > { %5063 = vmatpush2.bf16.msra.mxu0 %v7287_v31  ;;  %v7346_v31 = vld [vmem:[#allocation6 + $0xc] ss:$16 sps:$4 sm:$0xff]  }
 0x298   : > { %5064 = vmatprep.subr.bf16.mxu0 %v7292_v33  ;;  %5104 = vmatpush2.bf16.msra.mxu1 %v7371_v34  ;;  %v7344_v33 = vld [vmem:[#allocation6 + $0x8] ss:$16 sps:$4 sm:$0xff]   ;;  %v7352_v34 = vld [vmem:[#allocation6 + $0x1ec] ss:$16 sps:$4 sm:$0xff]  }
 0x299   : > { %5105 = vmatprep.subr.bf16.mxu1 %v7379_v59  ;;  %v7350_v59 = vld [vmem:[#allocation6 + $0x1e8] ss:$16 sps:$4 sm:$0xff]  }
 0x29b   : > { %5065 = vmatpush2.bf16.msra.mxu0 %v7290_v36  ;;  %v7358_v36 = vld [vmem:[#allocation6 + $0x1cc] ss:$16 sps:$4 sm:$0xff]  }
 0x29c   : > { %5066 = vmatprep.subr.bf16.mxu0 %v7295_v38  ;;  %5106 = vmatpush2.bf16.msra.mxu1 %v7377_v40  ;;  %v7356_v38 = vld [vmem:[#allocation6 + $0x1c8] ss:$16 sps:$4 sm:$0xff]   ;;  %v7364_v40 = vld [vmem:[#allocation6 + $0x1ac] ss:$16 sps:$4 sm:$0xff]  }
 0x29d   : > { %5107 = vmatprep.subr.bf16.mxu1 %v7385_v42  ;;  %v7362_v42 = vld [vmem:[#allocation6 + $0x1a8] ss:$16 sps:$4 sm:$0xff]  }
 0x29f   : > { %5067 = vmatpush2.bf16.msra.mxu0 %v7293_v58  ;;  %v7370_v58 = vld [vmem:[#allocation6 + $0x18c] ss:$16 sps:$4 sm:$0xff]  }
 0x2a0   : > { %5068 = vmatprep.subr.bf16.mxu0 %v7298_v44  ;;  %5108 = vmatpush2.bf16.msra.mxu1 %v7383_v45  ;;  %v7368_v44 = vld [vmem:[#allocation6 + $0x188] ss:$16 sps:$4 sm:$0xff]   ;;  %v7376_v45 = vld [vmem:[#allocation6 + $0x16c] ss:$16 sps:$4 sm:$0xff]  }
 0x2a1   : > { %5109 = vmatprep.subr.bf16.mxu1 %v7391_v47  ;;  %v7374_v47 = vld [vmem:[#allocation6 + $0x168] ss:$16 sps:$4 sm:$0xff]  }
 0x2a3   : > { %5069 = vmatpush2.bf16.msra.mxu0 %v7296_v56  ;;  %v941_v56 = vsub.s32 7, %v8232_v19  ;;  %v7641_v19 = vld [vmem:[#allocation12 + $0x30] sm:$0xff]  }
 0x2a4   : > { %5070 = vmatprep.subr.bf16.mxu0 %v7301_v57  ;;  %5110 = vmatpush2.bf16.msra.mxu1 %v7389_v62  ;;  %v938_v57 = vrot.slane %v8287_v55, %v937_v46  ;;  %v7380_v62 = vld [vmem:[#allocation6 + $0x148] ss:$16 sps:$4 sm:$0xff]  }
 0x2a5   : > { %5111 = vmatprep.subr.bf16.mxu1 %v7397_v0  ;;  %v942_v0 = vrot.slane %v8287_v55, %v941_v56  ;;  %v7400_v55 = vld [vmem:[#allocation6 + $0x4ec] ss:$16 sps:$4 sm:$0xff]   ;;  %v7440_v46 = vld [vmem:[#allocation6 + $0x408] ss:$16 sps:$4 sm:$0xff]  }
 0x2a6   : > { %v7443_v56 = vld [vmem:[#allocation6 + $0x208] ss:$16 sps:$4 sm:$0xff]  }
 0x2a7   : > { %5071 = vmatpush2.bf16.msra.mxu0 %v7299_v2  ;;  %v7386_v2 = vld [vmem:[#allocation6 + $0x128] ss:$16 sps:$4 sm:$0xff]  }
 0x2a8   : > { %5122 = vmatprep.subr.bf16.mxu0 %v7304_v16  ;;  %5112 = vmatpush2.bf16.msra.mxu1 %v7395_v3  ;;  %v7394_v3 = vld [vmem:[#allocation6 + $0x10c] ss:$16 sps:$4 sm:$0xff]  }
 0x2a9   : > { %5163 = vmatprep.subr.bf16.mxu1 %v7403_v5 }
 0x2aa   : > { %v3254_v52 = vpop.f32.mrf.mxu0 }
 0x2ab   : > { %v3255_v11 = vadd.f32 %v3254_v52, %v3214_v29  ;;  %v8318_v12 = vpop.f32.mrf.mxu1 }
 0x2ac   : > { %v3256_v28 = vpop.f32.mrf.mxu0  ;;  %v3296_v21 = vadd.f32 %v8318_v12, %v938_v57  ;;  %v7446_v57 = vld [vmem:[#allocation6 + $0x5e8] ss:$16 sps:$4 sm:$0xff]  }
 0x2ad   : > { %v3257_v13 = vadd.f32 %v3256_v28, %v3216_v8  ;;  %v8320_v14 = vpop.f32.mrf.mxu1  ;;  %v3388_v48 = vmax.f32 %v3255_v11, 0.0  ;;  %v7392_v28 = vld [vmem:[#allocation6 + $0x108] ss:$16 sps:$4 sm:$0xff]  }
 0x2ae   : > { %v3258_v15 = vpop.f32.mrf.mxu0  ;;  %v3298_v4 = vadd.f32 %v8320_v14, %v942_v0  ;;  %v7406_v14 = vld [vmem:[#allocation6 + $0x4cc] ss:$16 sps:$4 sm:$0xff]   ;;  %v7449_v0 = vld [vmem:[#allocation6 + $0x3e8] ss:$16 sps:$4 sm:$0xff]  }
 0x2af   : > { %v3389_v17 = vmax.f32 %v3257_v13, 0.0  ;;  %v3299_v41 = vpop.f32.mrf.mxu1  ;;  %v8324_v22 = vpack.c.bf16 %v3388_v48, %v3388_v48 }
 0x2b0   : > { %v3259_v20 = vpop.f32.mrf.mxu0 }
 0x2b1   : > { %v8322_v18 = vpack.c.bf16 %v3389_v17, %v3389_v17  ;;  %v3300_v61 = vpop.f32.mrf.mxu1 }
 0x2b2   : > { %v7398_v61 = vld [vmem:[#allocation6 + $0x4e8] ss:$16 sps:$4 sm:$0xff]  }
 0x2b3   : > { %5072 = vmatprep.mubr.bf16.mxu0 %v8322_v18 }
 0x2b4   : > { %5073 = vmatmul.mubr.bf16.vlgmr.msra.gmra.mxu0 %v8324_v22 }
 0x2b5   : > { %5123 = vmatpush1.bf16.msra.mxu0 %v7302_v39  ;;  %5154 = vmatprep.mubr.bf16.mxu0 %v8273_v9  ;;  %v7338_v9 = vld [vmem:[#allocation6 + $0x28] ss:$16 sps:$4 sm:$0xff]  }
 0x2b6   : > { %5124 = vmatprep.subr.bf16.mxu0 %v7310_v32  ;;  %v7401_v32 = vld [vmem:[#allocation6 + $0x2e8] ss:$16 sps:$4 sm:$0xff]  }
 0x2b9   : > { %5125 = vmatpush1.bf16.msra.mxu0 %v7308_v43 }
 0x2ba   : > { %5126 = vmatprep.subr.bf16.mxu0 %v7316_v23  ;;  %v7404_v23 = vld [vmem:[#allocation6 + $0x4c8] ss:$16 sps:$4 sm:$0xff]  }
 0x2bd   : > { %5127 = vmatpush1.bf16.msra.mxu0 %v7314_v24  ;;  %v7409_v24 = vld [vmem:[#allocation6 + $0x2cc] ss:$16 sps:$4 sm:$0xff]  }
 0x2be   : > { %5128 = vmatprep.subr.bf16.mxu0 %v7322_v25  ;;  %v7412_v25 = vld [vmem:[#allocation6 + $0x4ac] ss:$16 sps:$4 sm:$0xff]  }
 0x2c1   : > { %5129 = vmatpush1.bf16.msra.mxu0 %v7320_v26  ;;  %v7407_v26 = vld [vmem:[#allocation6 + $0x2c8] ss:$16 sps:$4 sm:$0xff]  }
 0x2c2   : > { %5130 = vmatprep.subr.bf16.mxu0 %v7328_v49  ;;  %v7415_v49 = vld [vmem:[#allocation6 + $0x2ac] ss:$16 sps:$4 sm:$0xff]  }
 0x2c5   : > { %5131 = vmatpush1.bf16.msra.mxu0 %v7326_v53  ;;  %v7418_v53 = vld [vmem:[#allocation6 + $0x48c] ss:$16 sps:$4 sm:$0xff]  }
 0x2c6   : > { %5132 = vmatprep.subr.bf16.mxu0 %v7334_v54  ;;  %v7416_v54 = vld [vmem:[#allocation6 + $0x488] ss:$16 sps:$4 sm:$0xff]  }
 0x2c9   : > { %5133 = vmatpush1.bf16.msra.mxu0 %v7332_v30  ;;  %v7421_v30 = vld [vmem:[#allocation6 + $0x28c] ss:$16 sps:$4 sm:$0xff]  }
 0x2ca   : > { %5134 = vmatprep.subr.bf16.mxu0 %v7340_v10  ;;  %v7424_v10 = vld [vmem:[#allocation6 + $0x46c] ss:$16 sps:$4 sm:$0xff]  }
 0x2cd   : > { %5135 = vmatpush1.bf16.msra.mxu0 %v7338_v9  ;;  %v7419_v9 = vld [vmem:[#allocation6 + $0x288] ss:$16 sps:$4 sm:$0xff]  }
 0x2ce   : > { %5136 = vmatprep.subr.bf16.mxu0 %v7346_v31  ;;  %v7427_v31 = vld [vmem:[#allocation6 + $0x26c] ss:$16 sps:$4 sm:$0xff]  }
 0x2d1   : > { %5137 = vmatpush1.bf16.msra.mxu0 %v7344_v33  ;;  %v7430_v33 = vld [vmem:[#allocation6 + $0x44c] ss:$16 sps:$4 sm:$0xff]  }
 0x2d2   : > { %5138 = vmatprep.subr.bf16.mxu0 %v7352_v34  ;;  %v7425_v34 = vld [vmem:[#allocation6 + $0x268] ss:$16 sps:$4 sm:$0xff]  }
 0x2d5   : > { %5139 = vmatpush2.bf16.msra.mxu0 %v7350_v59  ;;  %v7428_v59 = vld [vmem:[#allocation6 + $0x448] ss:$16 sps:$4 sm:$0xff]  }
 0x2d6   : > { %5140 = vmatprep.subr.bf16.mxu0 %v7358_v36  ;;  %v7433_v36 = vld [vmem:[#allocation6 + $0x24c] ss:$16 sps:$4 sm:$0xff]  }
 0x2d9   : > { %5141 = vmatpush2.bf16.msra.mxu0 %v7356_v38  ;;  %v7436_v38 = vld [vmem:[#allocation6 + $0x42c] ss:$16 sps:$4 sm:$0xff]  }
 0x2da   : > { %5142 = vmatprep.subr.bf16.mxu0 %v7364_v40  ;;  %v7431_v40 = vld [vmem:[#allocation6 + $0x248] ss:$16 sps:$4 sm:$0xff]  }
 0x2dd   : > { %5143 = vmatpush2.bf16.msra.mxu0 %v7362_v42  ;;  %v7434_v42 = vld [vmem:[#allocation6 + $0x428] ss:$16 sps:$4 sm:$0xff]  }
 0x2de   : > { %5144 = vmatprep.subr.bf16.mxu0 %v7370_v58  ;;  %v7439_v58 = vld [vmem:[#allocation6 + $0x22c] ss:$16 sps:$4 sm:$0xff]  }
 0x2e1   : > { %5145 = vmatpush2.bf16.msra.mxu0 %v7368_v44  ;;  %v7442_v44 = vld [vmem:[#allocation6 + $0x40c] ss:$16 sps:$4 sm:$0xff]  }
 0x2e2   : > { %5146 = vmatprep.subr.bf16.mxu0 %v7376_v45  ;;  %v7437_v45 = vld [vmem:[#allocation6 + $0x228] ss:$16 sps:$4 sm:$0xff]  }
 0x2e5   : > { %5147 = vmatpush2.bf16.msra.mxu0 %v7374_v47  ;;  %v7445_v47 = vld [vmem:[#allocation6 + $0x20c] ss:$16 sps:$4 sm:$0xff]  }
 0x2e6   : > { %5148 = vmatprep.subr.bf16.mxu0 %v7382_v50  ;;  %v7448_v50 = vld [vmem:[#allocation6 + $0x5ec] ss:$16 sps:$4 sm:$0xff]  }
 0x2e9   : > { %5149 = vmatpush2.bf16.msra.mxu0 %v7380_v62  ;;  %v7451_v62 = vld [vmem:[#allocation6 + $0x3ec] ss:$16 sps:$4 sm:$0xff]  }
 0x2ea   : > { %v3336_v16 = vpop.f32.mrf.mxu0  ;;  %5150 = vmatprep.subr.bf16.mxu0 %v7388_v63  ;;  %v7454_v63 = vld [vmem:[#allocation6 + $0x5cc] ss:$16 sps:$4 sm:$0xff]  }
 0x2eb   : > { %v3337_v5 = vadd.f32 %v3336_v16, %v3296_v21  ;;  %v3377_v6 = vpop.f32.mrf.mxu1  ;;  %v7452_v21 = vld [vmem:[#allocation6 + $0x5c8] ss:$16 sps:$4 sm:$0xff]   ;;  %v7460_v16 = vld [vmem:[#allocation6 + $0x5ac] ss:$16 sps:$4 sm:$0xff]  }
 0x2ec   : > { %v3338_v29 = vpop.f32.mrf.mxu0 }
 0x2ed   : > { %v3378_v52 = vadd.f32 %v3377_v6, %v3337_v5  ;;  %v3339_v8 = vadd.f32 %v3338_v29, %v3298_v4  ;;  %v3379_v11 = vpop.f32.mrf.mxu1  ;;  %5151 = vmatpush2.bf16.msra.mxu0 %v7386_v2  ;;  %v7457_v2 = vld [vmem:[#allocation6 + $0x3cc] ss:$16 sps:$4 sm:$0xff]   ;;  %v7458_v4 = vld [vmem:[#allocation6 + $0x5a8] ss:$16 sps:$4 sm:$0xff]  }
 0x2ee   : > { %v3340_v13 = vpop.f32.mrf.mxu0  ;;  %5152 = vmatprep.subr.bf16.mxu0 %v7394_v3  ;;  %v7455_v3 = vld [vmem:[#allocation6 + $0x3c8] ss:$16 sps:$4 sm:$0xff]   ;;  %v7463_v5 = vld [vmem:[#allocation6 + $0x3ac] ss:$16 sps:$4 sm:$0xff]  }
 0x2ef   : > { %v3380_v48 = vadd.f32 %v3379_v11, %v3339_v8  ;;  %v3381_v12 = vpop.f32.mrf.mxu1  ;;  %v3390_v17 = vmax.f32 %v3378_v52, 0.0  ;;  %v7466_v6 = vld [vmem:[#allocation6 + $0x58c] ss:$16 sps:$4 sm:$0xff]   ;;  %v7461_v29 = vld [vmem:[#allocation6 + $0x3a8] ss:$16 sps:$4 sm:$0xff]  }
 0x2f0   : > { %v3341_v15 = vpop.f32.mrf.mxu0  ;;  %v7464_v52 = vld [vmem:[#allocation6 + $0x588] ss:$16 sps:$4 sm:$0xff]   ;;  %v7469_v8 = vld [vmem:[#allocation6 + $0x38c] ss:$16 sps:$4 sm:$0xff]  }
 0x2f1   : > { %v3391_v41 = vmax.f32 %v3380_v48, 0.0  ;;  %v3382_v20 = vpop.f32.mrf.mxu1  ;;  %5153 = vmatpush2.bf16.msra.mxu0 %v7392_v28  ;;  %v8338_v43 = vpack.c.bf16 %v3390_v17, %v3390_v17  ;;  %v7472_v11 = vld [vmem:[#allocation6 + $0x56c] ss:$16 sps:$4 sm:$0xff]   ;;  %v7467_v28 = vld [vmem:[#allocation6 + $0x388] ss:$16 sps:$4 sm:$0xff]  }
 0x2f2   : > { %5204 = vmatprep.subr.bf16.mxu0 %v7400_v55  ;;  %v7470_v13 = vld [vmem:[#allocation6 + $0x568] ss:$16 sps:$4 sm:$0xff]   ;;  %v7475_v55 = vld [vmem:[#allocation6 + $0x36c] ss:$16 sps:$4 sm:$0xff]   ;;  %v8344_v15 = vld [vmem:[#allocation7] sm:$0xf] }
 0x2f3   : > { %v8335_v39 = vpack.c.bf16 %v3391_v41, %v3391_v41  ;;  %v7478_v48 = vld [vmem:[#allocation6 + $0x54c] ss:$16 sps:$4 sm:$0xff]   ;;  %v7473_v12 = vld [vmem:[#allocation6 + $0x368] ss:$16 sps:$4 sm:$0xff]  }
 0x2f4   : > { %5155 = vmatmul.mubr.bf16.vlgmr.msra.gmra.mxu0 %v8296_v35  ;;  %v7410_v35 = vld [vmem:[#allocation6 + $0x4a8] ss:$16 sps:$4 sm:$0xff]   ;;  %v7481_v41 = vld [vmem:[#allocation6 + $0x34c] ss:$16 sps:$4 sm:$0xff]  }
 0x2f5   : > { %5205 = vmatpush1.bf16.msra.mxu0 %v7398_v61  ;;  %5236 = vmatprep.mubr.bf16.mxu0 %v8322_v18  ;;  %v7413_v18 = vld [vmem:[#allocation6 + $0x2a8] ss:$16 sps:$4 sm:$0xff]   ;;  %v7484_v20 = vld [vmem:[#allocation6 + $0x52c] ss:$16 sps:$4 sm:$0xff]   ;;  %v3661_v61 = vrot.slane %v8344_v15, %v8235_v51 }
 0x2f6   : > { %5113 = vmatprep.mubr.bf16.mxu1 %v8335_v39  ;;  %5206 = vmatprep.subr.bf16.mxu0 %v7406_v14  ;;  %v7476_v17 = vld [vmem:[#allocation6 + $0x548] ss:$16 sps:$4 sm:$0xff]  }
 0x2f7   : > { %5114 = vmatmul.mubr.bf16.vlgmr.msra.gmra.mxu1 %v8338_v43  ;;  %v7479_v14 = vld [vmem:[#allocation6 + $0x348] ss:$16 sps:$4 sm:$0xff]  }
 0x2f8   : > { %5164 = vmatpush1.bf16.msra.mxu1 %v7401_v32  ;;  %5195 = vmatprep.mubr.bf16.mxu1 %v8283_v27  ;;  %v7422_v27 = vld [vmem:[#allocation6 + $0x468] ss:$16 sps:$4 sm:$0xff]  }
 0x2f9   : > { %5207 = vmatpush1.bf16.msra.mxu0 %v7404_v23  ;;  %5165 = vmatprep.subr.bf16.mxu1 %v7409_v24  ;;  %v7482_v32 = vld [vmem:[#allocation6 + $0x528] ss:$16 sps:$4 sm:$0xff]   ;;  %v3665_v23 = vrot.slane %v8344_v15, %v8240_v60  ;;  %v7487_v24 = vld [vmem:[#allocation6 + $0x32c] ss:$16 sps:$4 sm:$0xff]  }
 0x2fa   : > { %5208 = vmatprep.subr.bf16.mxu0 %v7412_v25 }
 0x2fc   : > { %5166 = vmatpush1.bf16.msra.mxu1 %v7407_v26  ;;  %v7490_v26 = vld [vmem:[#allocation6 + $0x50c] ss:$16 sps:$4 sm:$0xff]  }
 0x2fd   : > { %5209 = vmatpush1.bf16.msra.mxu0 %v7410_v35  ;;  %5167 = vmatprep.subr.bf16.mxu1 %v7415_v49 }
 0x2fe   : > { %5210 = vmatprep.subr.bf16.mxu0 %v7418_v53 }
 0x300   : > { %5168 = vmatpush1.bf16.msra.mxu1 %v7413_v18  ;;  %v7485_v18 = vld [vmem:[#allocation6 + $0x328] ss:$16 sps:$4 sm:$0xff]  }
 0x301   : > { %5211 = vmatpush1.bf16.msra.mxu0 %v7416_v54  ;;  %5169 = vmatprep.subr.bf16.mxu1 %v7421_v30 }
 0x302   : > { %5212 = vmatprep.subr.bf16.mxu0 %v7424_v10 }
 0x304   : > { %5170 = vmatpush1.bf16.msra.mxu1 %v7419_v9  ;;  %v7488_v9 = vld [vmem:[#allocation6 + $0x508] ss:$16 sps:$4 sm:$0xff]  }
 0x305   : > { %5213 = vmatpush1.bf16.msra.mxu0 %v7422_v27  ;;  %5171 = vmatprep.subr.bf16.mxu1 %v7427_v31  ;;  %v7493_v27 = vld [vmem:[#allocation6 + $0x30c] ss:$16 sps:$4 sm:$0xff]  }
 0x306   : > { %5214 = vmatprep.subr.bf16.mxu0 %v7430_v33  ;;  %v7544_v33 = vld [vmem:[#allocation9 + $0x74] ss:$8 sps:$4 sm:$0xff]  }
 0x308   : > { %5172 = vmatpush1.bf16.msra.mxu1 %v7425_v34 }
 0x309   : > { %5215 = vmatpush1.bf16.msra.mxu0 %v7428_v59  ;;  %5173 = vmatprep.subr.bf16.mxu1 %v7433_v36 }
 0x30a   : > { %5216 = vmatprep.subr.bf16.mxu0 %v7436_v38  ;;  %v7491_v38 = vld [vmem:[#allocation6 + $0x308] ss:$16 sps:$4 sm:$0xff]  }
 0x30c   : > { %5174 = vmatpush1.bf16.msra.mxu1 %v7431_v40 }
 0x30d   : > { %5217 = vmatpush1.bf16.msra.mxu0 %v7434_v42  ;;  %5175 = vmatprep.subr.bf16.mxu1 %v7439_v58  ;;  %v7496_v42 = vld [vmem:[#allocation6 + $0x6ec] ss:$16 sps:$4 sm:$0xff]  }
 0x30e   : > { %5218 = vmatprep.subr.bf16.mxu0 %v7442_v44  ;;  %v7542_v58 = vld [vmem:[#allocation9 + $0x70] ss:$8 sps:$4 sm:$0xff]   ;;  %v7547_v44 = vld [vmem:[#allocation9 + $0x64] ss:$8 sps:$4 sm:$0xff]  }
 0x310   : > { %5176 = vmatpush1.bf16.msra.mxu1 %v7437_v45  ;;  %v7494_v45 = vld [vmem:[#allocation6 + $0x6e8] ss:$16 sps:$4 sm:$0xff]  }
 0x311   : > { %5219 = vmatpush1.bf16.msra.mxu0 %v7440_v46  ;;  %5177 = vmatprep.subr.bf16.mxu1 %v7445_v47  ;;  %v7499_v46 = vld [vmem:[#allocation6 + $0x6cc] ss:$16 sps:$4 sm:$0xff]  }
 0x312   : > { %5220 = vmatprep.subr.bf16.mxu0 %v7448_v50  ;;  %v7545_v47 = vld [vmem:[#allocation9 + $0x60] ss:$8 sps:$4 sm:$0xff]   ;;  %v7550_v50 = vld [vmem:[#allocation9 + $0x54] ss:$8 sps:$4 sm:$0xff]  }
 0x314   : > { %5178 = vmatpush1.bf16.msra.mxu1 %v7443_v56  ;;  %v7497_v56 = vld [vmem:[#allocation6 + $0x6c8] ss:$16 sps:$4 sm:$0xff]  }
 0x315   : > { %5221 = vmatpush2.bf16.msra.mxu0 %v7446_v57  ;;  %5179 = vmatprep.subr.bf16.mxu1 %v7451_v62  ;;  %v7502_v57 = vld [vmem:[#allocation6 + $0x6ac] ss:$16 sps:$4 sm:$0xff]  }
 0x316   : > { %5222 = vmatprep.subr.bf16.mxu0 %v7454_v63  ;;  %v7548_v62 = vld [vmem:[#allocation9 + $0x50] ss:$8 sps:$4 sm:$0xff]   ;;  %v7553_v63 = vld [vmem:[#allocation9 + $0x44] ss:$8 sps:$4 sm:$0xff]  }
 0x318   : > { %5180 = vmatpush2.bf16.msra.mxu1 %v7449_v0  ;;  %v7505_v0 = vld [vmem:[#allocation6 + $0x68c] ss:$16 sps:$4 sm:$0xff]  }
 0x319   : > { %5223 = vmatpush2.bf16.msra.mxu0 %v7452_v21  ;;  %5181 = vmatprep.subr.bf16.mxu1 %v7457_v2  ;;  %v7551_v21 = vld [vmem:[#allocation9 + $0x40] ss:$8 sps:$4 sm:$0xff]   ;;  %v7556_v2 = vld [vmem:[#allocation9 + $0x34] ss:$8 sps:$4 sm:$0xff]  }
 0x31a   : > { %5224 = vmatprep.subr.bf16.mxu0 %v7460_v16  ;;  %v7508_v16 = vld [vmem:[#allocation6 + $0x66c] ss:$16 sps:$4 sm:$0xff]  }
 0x31c   : > { %5182 = vmatpush2.bf16.msra.mxu1 %v7455_v3  ;;  %v7559_v3 = vld [vmem:[#allocation9 + $0x24] ss:$8 sps:$4 sm:$0xff]  }
 0x31d   : > { %5225 = vmatpush2.bf16.msra.mxu0 %v7458_v4  ;;  %5183 = vmatprep.subr.bf16.mxu1 %v7463_v5  ;;  %v7506_v4 = vld [vmem:[#allocation6 + $0x668] ss:$16 sps:$4 sm:$0xff]   ;;  %v7511_v5 = vld [vmem:[#allocation6 + $0x64c] ss:$16 sps:$4 sm:$0xff]  }
 0x31e   : > { %5226 = vmatprep.subr.bf16.mxu0 %v7466_v6  ;;  %v7557_v6 = vld [vmem:[#allocation9 + $0x20] ss:$8 sps:$4 sm:$0xff]  }
 0x320   : > { %5184 = vmatpush2.bf16.msra.mxu1 %v7461_v29  ;;  %v7562_v29 = vld [vmem:[#allocation9 + $0x14] ss:$8 sps:$4 sm:$0xff]  }
 0x321   : > { %5227 = vmatpush2.bf16.msra.mxu0 %v7464_v52  ;;  %5185 = vmatprep.subr.bf16.mxu1 %v7469_v8  ;;  %v7509_v52 = vld [vmem:[#allocation6 + $0x648] ss:$16 sps:$4 sm:$0xff]   ;;  %v7514_v8 = vld [vmem:[#allocation6 + $0x62c] ss:$16 sps:$4 sm:$0xff]  }
 0x322   : > { %5228 = vmatprep.subr.bf16.mxu0 %v7472_v11  ;;  %v7560_v11 = vld [vmem:[#allocation9 + $0x10] ss:$8 sps:$4 sm:$0xff]  }
 0x324   : > { %5186 = vmatpush2.bf16.msra.mxu1 %v7467_v28  ;;  %v7565_v28 = vld [vmem:[#allocation9 + $0x4] ss:$8 sps:$4 sm:$0xff]  }
 0x325   : > { %5229 = vmatpush2.bf16.msra.mxu0 %v7470_v13  ;;  %5187 = vmatprep.subr.bf16.mxu1 %v7475_v55  ;;  %v7512_v13 = vld [vmem:[#allocation6 + $0x628] ss:$16 sps:$4 sm:$0xff]   ;;  %v7517_v55 = vld [vmem:[#allocation6 + $0x60c] ss:$16 sps:$4 sm:$0xff]  }
 0x326   : > { %5230 = vmatprep.subr.bf16.mxu0 %v7478_v48  ;;  %v7563_v48 = vld [vmem:[#allocation9] ss:$8 sps:$4 sm:$0xff]  }
 0x328   : > { %5188 = vmatpush2.bf16.msra.mxu1 %v7473_v12  ;;  %v7568_v12 = vld [vmem:[#allocation9 + $0xf4] ss:$8 sps:$4 sm:$0xff]  }
 0x329   : > { %5231 = vmatpush2.bf16.msra.mxu0 %v7476_v17  ;;  %5189 = vmatprep.subr.bf16.mxu1 %v7481_v41  ;;  %v7515_v17 = vld [vmem:[#allocation6 + $0x608] ss:$16 sps:$4 sm:$0xff]   ;;  %v7520_v41 = vld [vmem:[#allocation6 + $0x7ec] ss:$16 sps:$4 sm:$0xff]  }
 0x32a   : > { %v4992_v25 = vpop.f32.mrf.mxu0  ;;  %5232 = vmatprep.subr.bf16.mxu0 %v7484_v20  ;;  %v7566_v20 = vld [vmem:[#allocation9 + $0xf0] ss:$8 sps:$4 sm:$0xff]  }
 0x32b   : > { %v4993_v35 = vadd.f32 %v4992_v25, %v3661_v61  ;;  %v5033_v49 = vpop.f32.mrf.mxu1  ;;  %v7571_v61 = vld [vmem:[#allocation9 + $0xe4] ss:$8 sps:$4 sm:$0xff]  }
 0x32c   : > { %5190 = vmatpush2.bf16.msra.mxu1 %v7479_v14  ;;  %v4994_v53 = vpop.f32.mrf.mxu0  ;;  %v7518_v14 = vld [vmem:[#allocation6 + $0x7e8] ss:$16 sps:$4 sm:$0xff]  }
 0x32d   : > { %v8350_v54 = vadd.f32 %v5033_v49, %v4993_v35  ;;  %v4995_v30 = vadd.f32 %v4994_v53, %v3665_v23  ;;  %v5035_v10 = vpop.f32.mrf.mxu1  ;;  %5233 = vmatpush2.bf16.msra.mxu0 %v7482_v32  ;;  %5191 = vmatprep.subr.bf16.mxu1 %v7487_v24  ;;  %v7523_v32 = vld [vmem:[#allocation6 + $0x7cc] ss:$16 sps:$4 sm:$0xff]   ;;  %v7574_v24 = vld [vmem:[#allocation9 + $0xd4] ss:$8 sps:$4 sm:$0xff]   ;;  %v7577_v49 = vld [vmem:[#allocation9 + $0xc4] ss:$8 sps:$4 sm:$0xff]  }
 0x32e   : > { %v4996_v31 = vpop.f32.mrf.mxu0  ;;  %5234 = vmatprep.subr.bf16.mxu0 %v7490_v26  ;;  %v7569_v23 = vld [vmem:[#allocation9 + $0xe0] ss:$8 sps:$4 sm:$0xff]   ;;  %v7521_v25 = vld [vmem:[#allocation6 + $0x7c8] ss:$16 sps:$4 sm:$0xff]   ;;  %v7572_v35 = vld [vmem:[#allocation9 + $0xd0] ss:$8 sps:$4 sm:$0xff]  }
 0x32f   : > { %v8352_v34 = vadd.f32 %v5035_v10, %v4995_v30  ;;  %v5037_v59 = vpop.f32.mrf.mxu1  ;;  %v7526_v26 = vld [vmem:[#allocation6 + $0x7ac] ss:$16 sps:$4 sm:$0xff]   ;;  %v7524_v53 = vld [vmem:[#allocation6 + $0x7a8] ss:$16 sps:$4 sm:$0xff]  }
 0x330   : > { %5192 = vmatpush2.bf16.msra.mxu1 %v7485_v18  ;;  %v4997_v36 = vpop.f32.mrf.mxu0  ;;  %v7529_v18 = vld [vmem:[#allocation6 + $0x78c] ss:$16 sps:$4 sm:$0xff]   ;;  %v7580_v10 = vld [vmem:[#allocation9 + $0xb4] ss:$8 sps:$4 sm:$0xff]  }
 0x331   : > { %v5038_v40 = vpop.f32.mrf.mxu1  ;;  %5235 = vmatpush2.bf16.msra.mxu0 %v7488_v9  ;;  %5193 = vmatprep.subr.bf16.mxu1 %v7493_v27  ;;  %v7575_v30 = vld [vmem:[#allocation9 + $0xc0] ss:$8 sps:$4 sm:$0xff]   ;;  %v7527_v9 = vld [vmem:[#allocation6 + $0x788] ss:$16 sps:$4 sm:$0xff]   ;;  %v7578_v31 = vld [vmem:[#allocation9 + $0xb0] ss:$8 sps:$4 sm:$0xff]  }
 0x332   : > { %5690 = vmatprep.subr.bf16.mxu0 %v7544_v33  ;;  %v7532_v27 = vld [vmem:[#allocation6 + $0x76c] ss:$16 sps:$4 sm:$0xff]   ;;  %v7583_v33 = vld [vmem:[#allocation9 + $0xa4] ss:$8 sps:$4 sm:$0xff]   ;;  %v7586_v40 = vld [vmem:[#allocation9 + $0x94] ss:$8 sps:$4 sm:$0xff]  }
 0x333   : > { %v7530_v59 = vld [vmem:[#allocation6 + $0x768] ss:$16 sps:$4 sm:$0xff]   ;;  %v7535_v36 = vld [vmem:[#allocation6 + $0x74c] ss:$16 sps:$4 sm:$0xff]  }
 0x334   : > { %5194 = vmatpush2.bf16.msra.mxu1 %v7491_v38  ;;  %5237 = vmatmul.mubr.bf16.vlgmr.msra.gmra.mxu0 %v8324_v22  ;;  %v7500_v22 = vld [vmem:[#allocation6 + $0x6a8] ss:$16 sps:$4 sm:$0xff]   ;;  %v7581_v38 = vld [vmem:[#allocation9 + $0xa0] ss:$8 sps:$4 sm:$0xff]  }
 0x335   : > { %5245 = vmatprep.subr.bf16.mxu1 %v7496_v42  ;;  %5691 = vmatpush1.bf16.msra.mxu0 %v7542_v58  ;;  %v7533_v42 = vld [vmem:[#allocation6 + $0x748] ss:$16 sps:$4 sm:$0xff]   ;;  %v7538_v58 = vld [vmem:[#allocation6 + $0x72c] ss:$16 sps:$4 sm:$0xff]  }
 0x336   : > { %5692 = vmatprep.subr.bf16.mxu0 %v7547_v44  ;;  %v7584_v44 = vld [vmem:[#allocation9 + $0x90] ss:$8 sps:$4 sm:$0xff]  }
 0x337   : > { %5196 = vmatmul.mubr.bf16.vlgmr.msra.gmra.mxu1 %v8298_v37  ;;  %v7503_v37 = vld [vmem:[#allocation6 + $0x688] ss:$16 sps:$4 sm:$0xff]  }
 0x338   : > { %5246 = vmatpush1.bf16.msra.mxu1 %v7494_v45  ;;  %5277 = vmatprep.mubr.bf16.mxu1 %v8335_v39  ;;  %v7554_v39 = vld [vmem:[#allocation9 + $0x30] ss:$8 sps:$4 sm:$0xff]   ;;  %v7589_v45 = vld [vmem:[#allocation9 + $0x84] ss:$8 sps:$4 sm:$0xff]  }
 0x339   : > { %5247 = vmatprep.subr.bf16.mxu1 %v7499_v46  ;;  %5693 = vmatpush1.bf16.msra.mxu0 %v7545_v47  ;;  %v7536_v46 = vld [vmem:[#allocation6 + $0x728] ss:$16 sps:$4 sm:$0xff]   ;;  %v7541_v47 = vld [vmem:[#allocation6 + $0x70c] ss:$16 sps:$4 sm:$0xff]  }
 0x33a   : > { %5694 = vmatprep.subr.bf16.mxu0 %v7550_v50  ;;  %v7587_v50 = vld [vmem:[#allocation9 + $0x80] ss:$8 sps:$4 sm:$0xff]  }
 0x33c   : > { %5248 = vmatpush1.bf16.msra.mxu1 %v7497_v56  ;;  %v7539_v56 = vld [vmem:[#allocation6 + $0x708] ss:$16 sps:$4 sm:$0xff]  }
 0x33d   : > { %5249 = vmatprep.subr.bf16.mxu1 %v7502_v57  ;;  %5695 = vmatpush1.bf16.msra.mxu0 %v7548_v62 }
 0x33e   : > { %5696 = vmatprep.subr.bf16.mxu0 %v7553_v63 }
 0x340   : > { %5250 = vmatpush1.bf16.msra.mxu1 %v7500_v22 }
 0x341   : > { %5251 = vmatprep.subr.bf16.mxu1 %v7505_v0  ;;  %5697 = vmatpush1.bf16.msra.mxu0 %v7551_v21 }
 0x342   : > { %5698 = vmatprep.subr.bf16.mxu0 %v7556_v2  ;;  %v7590_v2 = vld [vmem:[#allocation9 + $0x170] ss:$8 sps:$4 sm:$0xff]  }
 0x344   : > { %5252 = vmatpush1.bf16.msra.mxu1 %v7503_v37  ;;  %v7592_v37 = vld [vmem:[#allocation9 + $0x174] ss:$8 sps:$4 sm:$0xff]  }
 0x345   : > { %5253 = vmatprep.subr.bf16.mxu1 %v7508_v16  ;;  %5699 = vmatpush1.bf16.msra.mxu0 %v7554_v39  ;;  %v7595_v16 = vld [vmem:[#allocation9 + $0x164] ss:$8 sps:$4 sm:$0xff]   ;;  %v7593_v39 = vld [vmem:[#allocation9 + $0x160] ss:$8 sps:$4 sm:$0xff]  }
 0x346   : > { %5700 = vmatprep.subr.bf16.mxu0 %v7559_v3  ;;  %v7598_v3 = vld [vmem:[#allocation9 + $0x154] ss:$8 sps:$4 sm:$0xff]  }
 0x348   : > { %5254 = vmatpush1.bf16.msra.mxu1 %v7506_v4  ;;  %v7596_v4 = vld [vmem:[#allocation9 + $0x150] ss:$8 sps:$4 sm:$0xff]  }
 0x349   : > { %5255 = vmatprep.subr.bf16.mxu1 %v7511_v5  ;;  %5701 = vmatpush1.bf16.msra.mxu0 %v7557_v6  ;;  %v7599_v5 = vld [vmem:[#allocation9 + $0x140] ss:$8 sps:$4 sm:$0xff]   ;;  %v7607_v6 = vld [vmem:[#allocation9 + $0x124] ss:$8 sps:$4 sm:$0xff]  }
 0x34a   : > { %5702 = vmatprep.subr.bf16.mxu0 %v7562_v29  ;;  %v7605_v29 = vld [vmem:[#allocation9 + $0x120] ss:$8 sps:$4 sm:$0xff]  }
 0x34c   : > { %5256 = vmatpush1.bf16.msra.mxu1 %v7509_v52  ;;  %v7610_v52 = vld [vmem:[#allocation9 + $0x114] ss:$8 sps:$4 sm:$0xff]  }
 0x34d   : > { %5257 = vmatprep.subr.bf16.mxu1 %v7514_v8  ;;  %5703 = vmatpush1.bf16.msra.mxu0 %v7560_v11  ;;  %v7608_v8 = vld [vmem:[#allocation9 + $0x110] ss:$8 sps:$4 sm:$0xff]   ;;  %v7613_v11 = vld [vmem:[#allocation9 + $0x104] ss:$8 sps:$4 sm:$0xff]  }
 0x34e   : > { %5704 = vmatprep.subr.bf16.mxu0 %v7565_v28  ;;  %v7611_v28 = vld [vmem:[#allocation9 + $0x100] ss:$8 sps:$4 sm:$0xff]  }
 0x350   : > { %5258 = vmatpush1.bf16.msra.mxu1 %v7512_v13  ;;  %v7616_v13 = vld [vmem:[#allocation9 + $0x1f4] ss:$8 sps:$4 sm:$0xff]  }
 0x351   : > { %5259 = vmatprep.subr.bf16.mxu1 %v7517_v55  ;;  %5705 = vmatpush1.bf16.msra.mxu0 %v7563_v48  ;;  %v7614_v55 = vld [vmem:[#allocation9 + $0x1f0] ss:$8 sps:$4 sm:$0xff]   ;;  %v7619_v48 = vld [vmem:[#allocation9 + $0x1e4] ss:$8 sps:$4 sm:$0xff]  }
 0x352   : > { %5706 = vmatprep.subr.bf16.mxu0 %v7568_v12  ;;  %v7617_v12 = vld [vmem:[#allocation9 + $0x1e0] ss:$8 sps:$4 sm:$0xff]  }
 0x354   : > { %5260 = vmatpush1.bf16.msra.mxu1 %v7515_v17  ;;  %v7622_v17 = vld [vmem:[#allocation9 + $0x1d4] ss:$8 sps:$4 sm:$0xff]  }
 0x355   : > { %5261 = vmatprep.subr.bf16.mxu1 %v7520_v41  ;;  %5707 = vmatpush2.bf16.msra.mxu0 %v7566_v20  ;;  %v7620_v41 = vld [vmem:[#allocation9 + $0x1d0] ss:$8 sps:$4 sm:$0xff]   ;;  %v7625_v20 = vld [vmem:[#allocation9 + $0x1c4] ss:$8 sps:$4 sm:$0xff]  }
 0x356   : > { %5708 = vmatprep.subr.bf16.mxu0 %v7571_v61  ;;  %v7623_v61 = vld [vmem:[#allocation9 + $0x1c0] ss:$8 sps:$4 sm:$0xff]  }
 0x358   : > { %5262 = vmatpush2.bf16.msra.mxu1 %v7518_v14  ;;  %v7628_v14 = vld [vmem:[#allocation9 + $0x1b4] ss:$8 sps:$4 sm:$0xff]  }
 0x359   : > { %5263 = vmatprep.subr.bf16.mxu1 %v7523_v32  ;;  %5709 = vmatpush2.bf16.msra.mxu0 %v7569_v23  ;;  %v7626_v32 = vld [vmem:[#allocation9 + $0x1b0] ss:$8 sps:$4 sm:$0xff]   ;;  %v7631_v23 = vld [vmem:[#allocation9 + $0x1a4] ss:$8 sps:$4 sm:$0xff]  }
 0x35a   : > { %5710 = vmatprep.subr.bf16.mxu0 %v7574_v24  ;;  %v7629_v24 = vld [vmem:[#allocation9 + $0x1a0] ss:$8 sps:$4 sm:$0xff]  }
 0x35c   : > { %5264 = vmatpush2.bf16.msra.mxu1 %v7521_v25 }
 0x35d   : > { %5265 = vmatprep.subr.bf16.mxu1 %v7526_v26  ;;  %5711 = vmatpush2.bf16.msra.mxu0 %v7572_v35 }
 0x35e   : > { %5712 = vmatprep.subr.bf16.mxu0 %v7577_v49  ;;  %v7634_v49 = vld [vmem:[#allocation9 + $0x194] ss:$8 sps:$4 sm:$0xff]  }
 0x360   : > { %5266 = vmatpush2.bf16.msra.mxu1 %v7524_v53 }
 0x361   : > { %5267 = vmatprep.subr.bf16.mxu1 %v7529_v18  ;;  %5713 = vmatpush2.bf16.msra.mxu0 %v7575_v30  ;;  %v7632_v30 = vld [vmem:[#allocation9 + $0x190] ss:$8 sps:$4 sm:$0xff]  }
 0x362   : > { %5714 = vmatprep.subr.bf16.mxu0 %v7580_v10 }
 0x364   : > { %5268 = vmatpush2.bf16.msra.mxu1 %v7527_v9 }
 0x365   : > { %5269 = vmatprep.subr.bf16.mxu1 %v7532_v27  ;;  %5715 = vmatpush2.bf16.msra.mxu0 %v7578_v31 }
 0x366   : > { %5716 = vmatprep.subr.bf16.mxu0 %v7583_v33 }
 0x368   : > { %5270 = vmatpush2.bf16.msra.mxu1 %v7530_v59  ;;  %v7637_v59 = vld [vmem:[#allocation9 + $0x184] ss:$8 sps:$4 sm:$0xff]  }
 0x369   : > { %5271 = vmatprep.subr.bf16.mxu1 %v7535_v36  ;;  %5717 = vmatpush2.bf16.msra.mxu0 %v7581_v38  ;;  %v7635_v38 = vld [vmem:[#allocation9 + $0x180] ss:$8 sps:$4 sm:$0xff]  }
 0x36a   : > { %5718 = vmatprep.subr.bf16.mxu0 %v7586_v40 }
 0x36c   : > { %5272 = vmatpush2.bf16.msra.mxu1 %v7533_v42 }
 0x36d   : > { %5273 = vmatprep.subr.bf16.mxu1 %v7538_v58  ;;  %5719 = vmatpush2.bf16.msra.mxu0 %v7584_v44  ;;  %v3669_v44 = vrot.slane %v8344_v15, %v921_v7  ;;  %v7639_v7 = vld [vmem:[#allocation12 + $0x38] sm:$0xff]  }
 0x36e   : > { %5720 = vmatprep.subr.bf16.mxu0 %v7589_v45  ;;  %v3673_v45 = vrot.slane %v8344_v15, %v925_v1  ;;  %v7642_v1 = vld [vmem:[#allocation12 + $0x68] sm:$0xff]  }
 0x36f   : > { %v7643_v15 = vld [vmem:[#allocation12 + $0x28] sm:$0xff]  }
 0x370   : > { %5274 = vmatpush2.bf16.msra.mxu1 %v7536_v46 }
 0x371   : > { %5275 = vmatprep.subr.bf16.mxu1 %v7541_v47  ;;  %5721 = vmatpush2.bf16.msra.mxu0 %v7587_v50 }
 0x374   : > { %5276 = vmatpush2.bf16.msra.mxu1 %v7539_v56  ;;  %v5074_v57 = vpop.f32.mrf.mxu0 }
 0x375   : > { %v8358_v62 = vadd.f32 %v5074_v57, %v8350_v54  ;;  %5731 = vmatprep.subr.bf16.mxu1 %v7592_v37  ;;  %v7601_v54 = vld [vmem:[#allocation9 + $0x144] ss:$8 sps:$4 sm:$0xff]  }
 0x376   : > { %v5076_v63 = vpop.f32.mrf.mxu0 }
 0x377   : > { %5278 = vmatmul.mubr.bf16.vlgmr.msra.gmra.mxu1 %v8338_v43  ;;  %v8362_v22 = vadd.f32 %v5076_v63, %v8352_v34  ;;  %v7604_v43 = vld [vmem:[#allocation9 + $0x134] ss:$8 sps:$4 sm:$0xff]   ;;  %v7602_v34 = vld [vmem:[#allocation9 + $0x130] ss:$8 sps:$4 sm:$0xff]  }
 0x378   : > { %v5078_v0 = vpop.f32.mrf.mxu0  ;;  %5732 = vmatpush1.bf16.msra.mxu1 %v7590_v2 }
 0x379   : > { %5733 = vmatprep.subr.bf16.mxu1 %v7595_v16 }
 0x37a   : > { %v5079_v21 = vpop.f32.mrf.mxu0 }
 0x37c   : > { %5734 = vmatpush1.bf16.msra.mxu1 %v7593_v39 }
 0x37d   : > { %5735 = vmatprep.subr.bf16.mxu1 %v7598_v3  ;;  %v7638_v3 = vld [vmem:[#allocation12 + $0x78] sm:$0xff]  }
 0x37e   : > { %6981 = vmatprep.subr.bf16.mxu0 %v7638_v3 }
 0x380   : > { %5736 = vmatpush1.bf16.msra.mxu1 %v7596_v4  ;;  %v7640_v4 = vld [vmem:[#allocation12 + $0x70] sm:$0xff]  }
 0x381   : > { %5737 = vmatprep.subr.bf16.mxu1 %v7601_v54  ;;  %v7644_v54 = vld [vmem:[#allocation12 + $0x60] sm:$0xff]  }
 0x384   : > { %5738 = vmatpush1.bf16.msra.mxu1 %v7599_v5  ;;  %v7645_v5 = vld [vmem:[#allocation12 + $0x20] sm:$0xff]  }
 0x385   : > { %5739 = vmatprep.subr.bf16.mxu1 %v7604_v43  ;;  %v7646_v43 = vld [vmem:[#allocation12 + $0x58] sm:$0xff]  }
 0x388   : > { %5740 = vmatpush1.bf16.msra.mxu1 %v7602_v34  ;;  %v7647_v34 = vld [vmem:[#allocation12 + $0x18] sm:$0xff]  }
 0x389   : > { %5741 = vmatprep.subr.bf16.mxu1 %v7607_v6  ;;  %v7648_v6 = vld [vmem:[#allocation12 + $0x50] sm:$0xff]  }
 0x38c   : > { %5742 = vmatpush1.bf16.msra.mxu1 %v7605_v29  ;;  %v7649_v29 = vld [vmem:[#allocation12 + $0x10] sm:$0xff]  }
 0x38d   : > { %5743 = vmatprep.subr.bf16.mxu1 %v7610_v52 }
 0x390   : > { %5744 = vmatpush1.bf16.msra.mxu1 %v7608_v8 }
 0x391   : > { %5745 = vmatprep.subr.bf16.mxu1 %v7613_v11 }
 0x394   : > { %5746 = vmatpush1.bf16.msra.mxu1 %v7611_v28 }
 0x395   : > { %5747 = vmatprep.subr.bf16.mxu1 %v7616_v13 }
 0x398   : > { %5748 = vmatpush2.bf16.msra.mxu1 %v7614_v55 }
 0x399   : > { %5749 = vmatprep.subr.bf16.mxu1 %v7619_v48 }
 0x39c   : > { %5750 = vmatpush2.bf16.msra.mxu1 %v7617_v12 }
 0x39d   : > { %5751 = vmatprep.subr.bf16.mxu1 %v7622_v17 }
 0x3a0   : > { %5752 = vmatpush2.bf16.msra.mxu1 %v7620_v41 }
 0x3a1   : > { %5753 = vmatprep.subr.bf16.mxu1 %v7625_v20 }
 0x3a4   : > { %5754 = vmatpush2.bf16.msra.mxu1 %v7623_v61  ;;  %v7650_v61 = vld [vmem:[#allocation12 + $0x48] sm:$0xff]  }
 0x3a5   : > { %5755 = vmatprep.subr.bf16.mxu1 %v7628_v14  ;;  %v7651_v14 = vld [vmem:[#allocation12 + $0x8] sm:$0xff]  }
 0x3a8   : > { %5756 = vmatpush2.bf16.msra.mxu1 %v7626_v32 }
 0x3a9   : > { %5757 = vmatprep.subr.bf16.mxu1 %v7631_v23 }
 0x3ac   : > { %5758 = vmatpush2.bf16.msra.mxu1 %v7629_v24  ;;  %v7652_v24 = vld [vmem:[#allocation12 + $0x40] sm:$0xff]  }
 0x3ad   : > { %5759 = vmatprep.subr.bf16.mxu1 %v7634_v49  ;;  %v7973_v49 = vmov 0.0  }
 0x3b0   : > { %5760 = vmatpush2.bf16.msra.mxu1 %v7632_v30  ;;  %v7657_v30 = vld [vmem:[#allocation15 + $0x20] sm:$0xff]  }
 0x3b1   : > { %5761 = vmatprep.subr.bf16.mxu1 %v7637_v59 }
 0x3b4   : > { %v5156_v25 = vpop.f32.mrf.mxu0  ;;  %5762 = vmatpush2.bf16.msra.mxu1 %v7635_v38 }
 0x3b5   : > { %v5157_v47 = vadd.f32 %v5156_v25, %v3669_v44  ;;  %v7653_v25 = vld [vmem:[#allocation12] sm:$0xff]   ;;  %7012 = vmatprep.subr.bf16.mxu1 %v7973_v49 }
 0x3b6   : > { %v5158_v26 = vpop.f32.mrf.mxu0 }
 0x3b7   : > { %v5115_v35 = vpop.f32.mrf.mxu1  ;;  %v5159_v57 = vadd.f32 %v5158_v26, %v3673_v45 }
 0x3b8   : > { %v5116_v53 = vadd.f32 %v5115_v35, %v8358_v62  ;;  %v5160_v18 = vpop.f32.mrf.mxu0  ;;  %v7654_v35 = vld [vmem:[#allocation15 + $0x38] sm:$0xff]  }
 0x3b9   : > { %v5117_v10 = vpop.f32.mrf.mxu1  ;;  %v7656_v18 = vld [vmem:[#allocation15 + $0x28] sm:$0xff]  }
 0x3ba   : > { %v5118_v9 = vadd.f32 %v5117_v10, %v8362_v22  ;;  %v5161_v27 = vpop.f32.mrf.mxu0  ;;  %v5286_v31 = vmax.f32 %v5116_v53, 0.0  ;;  %v7655_v53 = vld [vmem:[#allocation15 + $0x30] sm:$0xff]   ;;  %v7658_v10 = vld [vmem:[#allocation15 + $0x18] sm:$0xff]  }
 0x3bb   : > { %v5119_v33 = vpop.f32.mrf.mxu1 }
 0x3bc   : > { %v5287_v36 = vmax.f32 %v5118_v9, 0.0  ;;  %v5290_v58 = vpack.c.bf16 %v5286_v31, %v5286_v31  ;;  %v5358_v9 = vld [vmem:[#allocation10] sm:$0x3] }
 0x3bd   : > { %v5120_v40 = vpop.f32.mrf.mxu1  ;;  %v5363_v27 = vrot.slane %v5358_v9, %v8235_v51  ;;  %v5367_v31 = vrot.slane %v5358_v9, %v8240_v60  ;;  %v7660_v51 = vld [vmem:[#allocation15 + $0x8] sm:$0xff]   ;;  %v7661_v60 = vld [vmem:[#allocation15] sm:$0xff]  }
 0x3be   : > { %v5291_v42 = vpack.c.bf16 %v5287_v36, %v5287_v36 }
 0x3c0   : > { %5722 = vmatprep.mubr.bf16.mxu0 %v5291_v42 }
 0x3c1   : > { %5723 = vmatmul.mubr.bf16.vlgmr.msra.gmra.mxu0 %v5290_v58 }
 0x3c2   : > { %6982 = vmatpush3.bf16.msra.mxu0 %v7639_v7 }
 0x3c3   : > { %6983 = vmatprep.subr.bf16.mxu0 %v7640_v4 }
 0x3c6   : > { %6984 = vmatpush3.bf16.msra.mxu0 %v7641_v19 }
 0x3c7   : > { %6985 = vmatprep.subr.bf16.mxu0 %v7642_v1 }
 0x3ca   : > { %6986 = vmatpush3.bf16.msra.mxu0 %v7643_v15 }
 0x3cb   : > { %6987 = vmatprep.subr.bf16.mxu0 %v7644_v54 }
 0x3ce   : > { %6988 = vmatpush3.bf16.msra.mxu0 %v7645_v5 }
 0x3cf   : > { %6989 = vmatprep.subr.bf16.mxu0 %v7646_v43 }
 0x3d2   : > { %6990 = vmatpush3.bf16.msra.mxu0 %v7647_v34 }
 0x3d3   : > { %6991 = vmatprep.subr.bf16.mxu0 %v7648_v6 }
 0x3d6   : > { %6992 = vmatpush3.bf16.msra.mxu0 %v7649_v29 }
 0x3d7   : > { %6993 = vmatprep.subr.bf16.mxu0 %v7650_v61 }
 0x3da   : > { %6994 = vmatpush3.bf16.msra.mxu0 %v7651_v14 }
 0x3db   : > { %6995 = vmatprep.subr.bf16.mxu0 %v7652_v24 }
 0x3de   : > { %6996 = vmatpush3.bf16.msra.mxu0 %v7653_v25 }
 0x3f4   : > { %v5238_v46 = vpop.f32.mrf.mxu0 }
 0x3f6   : > { %v5240_v50 = vpop.f32.mrf.mxu0 }
 0x3f7   : > { %v5197_v56 = vpop.f32.mrf.mxu1 }
 0x3f8   : > { %v5198_v62 = vadd.f32 %v5197_v56, %v5157_v47  ;;  %v5242_v63 = vpop.f32.mrf.mxu0  ;;  %v7659_v56 = vld [vmem:[#allocation15 + $0x10] sm:$0xff]  }
 0x3f9   : > { %v5199_v22 = vpop.f32.mrf.mxu1 }
 0x3fa   : > { %v5200_v0 = vadd.f32 %v5199_v22, %v5159_v57  ;;  %v5243_v21 = vpop.f32.mrf.mxu0  ;;  %v5239_v2 = vadd.f32 %v5238_v46, %v5198_v62  ;;  %v6953_v62 = vld [vmem:[#allocation13] ss:$0 sm:$0xff] }
 0x3fb   : > { %v5201_v37 = vpop.f32.mrf.mxu1 }
 0x3fc   : > { %v5241_v16 = vadd.f32 %v5240_v50, %v5200_v0 }
 0x3fd   : > { %v5202_v39 = vpop.f32.mrf.mxu1 }
 0x3fe   : > { %v6970_v39 = vld [vmem:[#allocation16] ss:$0 sm:$0xff] }
 0x437   : > { %v5279_v52 = vpop.f32.mrf.mxu1 }
 0x438   : > { %v5280_v8 = vadd.f32 %v5279_v52, %v5239_v2 }
 0x439   : > { %v5281_v11 = vpop.f32.mrf.mxu1 }
 0x43a   : > { %v5282_v28 = vadd.f32 %v5281_v11, %v5241_v16  ;;  %v5288_v13 = vmax.f32 %v5280_v8, 0.0 }
 0x43b   : > { %v5283_v55 = vpop.f32.mrf.mxu1 }
 0x43c   : > { %v5289_v48 = vmax.f32 %v5282_v28, 0.0  ;;  %v5292_v41 = vpack.c.bf16 %v5288_v13, %v5288_v13 }
 0x43d   : > { %v5284_v12 = vpop.f32.mrf.mxu1 }
 0x43e   : > { %v5293_v17 = vpack.c.bf16 %v5289_v48, %v5289_v48 }
 0x440   : > { %5763 = vmatprep.mubr.bf16.mxu1 %v5293_v17 }
 0x441   : > { %5764 = vmatmul.mubr.bf16.vlgmr.msra.gmra.mxu1 %v5292_v41 }
 0x442   : > { %7013 = vmatpush3.bf16.msra.mxu1 %v7654_v35  ;;  %7028 = vmatprep.mubr.msk.bf16.mxu1 %vm7974_vm0, %v7973_v49 }
 0x443   : > { %7014 = vmatprep.subr.bf16.mxu1 %v7973_v49 }
 0x446   : > { %7015 = vmatpush3.bf16.msra.mxu1 %v7655_v53 }
 0x447   : > { %7016 = vmatprep.subr.bf16.mxu1 %v7973_v49 }
 0x44a   : > { %7017 = vmatpush3.bf16.msra.mxu1 %v7656_v18 }
 0x44b   : > { %7018 = vmatprep.subr.bf16.mxu1 %v7973_v49 }
 0x44e   : > { %7019 = vmatpush3.bf16.msra.mxu1 %v7657_v30 }
 0x44f   : > { %7020 = vmatprep.subr.bf16.mxu1 %v7973_v49 }
 0x452   : > { %7021 = vmatpush3.bf16.msra.mxu1 %v7658_v10 }
 0x453   : > { %7022 = vmatprep.subr.bf16.mxu1 %v7973_v49 }
 0x456   : > { %7023 = vmatpush3.bf16.msra.mxu1 %v7659_v56 }
 0x457   : > { %7024 = vmatprep.subr.bf16.mxu1 %v7973_v49 }
 0x45a   : > { %7025 = vmatpush3.bf16.msra.mxu1 %v7660_v51 }
 0x45b   : > { %7026 = vmatprep.subr.bf16.mxu1 %v7973_v49 }
 0x45e   : > { %7027 = vmatpush3.bf16.msra.mxu1 %v7661_v60 }
 0x481   : > { %v5724_v20 = vpop.f32.mrf.mxu0 }
 0x482   : > { %v5725_v33 = vadd.f32 %v5724_v20, %v5363_v27 }
 0x483   : > { %v5726_v32 = vpop.f32.mrf.mxu0 }
 0x484   : > { %v5727_v36 = vadd.f32 %v5726_v32, %v5367_v31 }
 0x485   : > { %v5728_v23 = vpop.f32.mrf.mxu0 }
 0x487   : > { %v5729_v26 = vpop.f32.mrf.mxu0 }
 0x501   : > { %v5765_v59 = vpop.f32.mrf.mxu1 }
 0x502   : > { %v5766_v38 = vadd.f32 %v5765_v59, %v5725_v33 }
 0x503   : > { %v5767_v40 = vpop.f32.mrf.mxu1 }
 0x504   : > { %v5768_v42 = vadd.f32 %v5767_v40, %v5727_v36  ;;  %v5772_v58 = vmax.f32 %v5766_v38, 0.0 }
 0x505   : > { %v5769_v44 = vpop.f32.mrf.mxu1 }
 0x506   : > { %v5773_v45 = vmax.f32 %v5768_v42, 0.0  ;;  %v5774_v50 = vpack.c.bf16 %v5772_v58, %v5772_v58 }
 0x507   : > { %v5770_v46 = vpop.f32.mrf.mxu1 }
 0x508   : > { %v5775_v47 = vpack.c.bf16 %v5773_v45, %v5773_v45 }
 0x50a   : > { %5943 = vmatprep.mubr.bf16.mxu0 %v5775_v47 }
 0x50b   : > { %5944 = vmatmul.mubr.bf16.vlgmr.msra.gmra.mxu0 %v5774_v50 }
 0x5cb   : > { %v6997_v57 = vpop.f32.mrf.mxu0 }
 0x5cd   : > { %v6998_v63 = vpop.f32.mrf.mxu0 }
 0x5ce   : > { %v6999_v22 = vadd.f32 %v6998_v63, %v6997_v57 }
 0x5cf   : > { %v7000_v0 = vpop.f32.mrf.mxu0 }
 0x5d0   : > { %v5946_v21 = vadd.f32 %v6999_v22, %v6953_v62 }
 0x5d1   : > { %v7001_v2 = vpop.f32.mrf.mxu0 }
 0x5d2   : > { %v5951_v37 = vmax.f32 %v5946_v21, 0.0 }
 0x5d4   : > { %v5952_v16 = vpack.c.bf16 %v5951_v37, %v5951_v37 }
 0x5d6   : > { %7029 = vmatmul.mubr.bf16.vlgmr.msra.gmra.mxu1 %v5952_v16 }
 0x696   : > { %v6058_v3 = vpop.f32.mrf.mxu1 }
 0x697   : > { %v6059_v7 = vadd.f32 %v6970_v39, %v6058_v3 }
 0x698   : > { %v7030_v4 = vpop.f32.mrf.mxu1 }
 0x699   : > { %6064 = vst [vmem:[%s520_s12] sm:$0xff] %v6059_v7 }
 0x69a   : > { %v6061_v19 = vpop.f32.mrf.mxu1 }
 0x69c   : > { %v7031_v1 = vpop.f32.mrf.mxu1 }
 0x69d PF: > { %s27_s17 = sadd.s32 1, %s7953_s17  }
 0x69e   : > { %p24_p1 = scmp.ge.s32.totalorder %s27_s17, 4  }
 0x6a0   :  { %26 = sbr.rel (!%p24_p1) target bundleno = 6 (0x6), region = 135 }
 0x6a5   :  { %6084 = vsyncpa [#allocation3], 1 }
 0x6a6   :  { %6086 = vsyncpa [#allocation3 + $0x1], 1 }
 0x6a7   :  { %6087 = vsyncpa [#allocation5], 1 }
 0x6a8   :  { %6088 = vsyncpa [#allocation8], 1 }
 0x6a9   :  { %6089 = vsyncpa [#allocation11], 1 }
 0x6aa   :  { %6090 = vsyncpa [#allocation14], 1 }
 0x6ab   :  { %6091 = vsyncpa [#allocation17], 1 }

</bundles_post_ra>
